<compile_context>
chip_gen: v7x
topology: tpu7x:2x2x1
jax: 0.10.0
libtpu: 0.0.40
codegen_flags: <defaults>
</compile_context>

<pallas_src>
import functools

import jax
import jax.numpy as jnp
import numpy as np
from jax.experimental import pallas as pl
from jax.experimental.pallas import tpu as pltpu


def _vmem_limit_bytes():
    # ~3/4 of physical VMEM per core (v5e/v6e: 96 MiB, v7x: 48 MiB); safe fallback.
    try:
        cap = pltpu.get_tpu_info().vmem_capacity_bytes
        return int(min(cap * 3 // 4, 96 * 1024 * 1024))
    except Exception:
        return 48 * 1024 * 1024


def _pick_tiling(T, total_halo, target=512):
    """Return (t_tile, halo_pad).  halo_pad == 0 -> single full-length window."""
    if T <= target:
        return T, 0
    halo_pad = ((total_halo + 127) // 128) * 128 if total_halo > 0 else 0
    t_tile = max(target, halo_pad)
    if halo_pad and t_tile % halo_pad:
        t_tile = ((t_tile + halo_pad - 1) // halo_pad) * halo_pad
    if t_tile >= T:
        return T, 0
    return t_tile, halo_pad


# ----------------------------------------------------------------------------
# Fused kernel: pre conv -> L x (dilated conv + gate + res/skip) -> proj ->
#               split -> reparameterised sample.
# ----------------------------------------------------------------------------
def _posterior_encoder_kernel(lens_ref, *refs, H, K, L, C, dilations,
                              t_tile, halo_pad, cdtype):
    if halo_pad > 0:
        (xc_ref, xl_ref, xr_ref, noise_ref, w_pre_ref, b_pre_ref,
         w_in_ref, cond_ref, w_rs_ref, b_rs_ref, w_proj_ref, b_proj_ref,
         z_ref, m_ref, logs_ref) = refs
    else:
        (xc_ref, noise_ref, w_pre_ref, b_pre_ref,
         w_in_ref, cond_ref, w_rs_ref, b_rs_ref, w_proj_ref, b_proj_ref,
         z_ref, m_ref, logs_ref) = refs
        xl_ref = xr_ref = None

    b = pl.program_id(0)
    t = pl.program_id(1)
    length = lens_ref[b]

    M = halo_pad                      # static margin on each side
    Wc = t_tile
    W = Wc + 2 * M

    # Extended input window  [t*Wc - M, (t+1)*Wc + M).
    if M > 0:
        x_ext = jnp.concatenate([xl_ref[0], xc_ref[0], xr_ref[0]], axis=1)
    else:
        x_ext = xc_ref[0]

    # In-kernel position mask: zeroes padding, out-of-length positions and the
    # clamped halo data at the sequence edges.
    pos = (t * Wc - M) + jax.lax.broadcasted_iota(jnp.int32, (1, W), 1)
    mask = jnp.logical_and(pos >= 0, pos < length).astype(jnp.float32)   # (1, W)

    # pre 1x1 conv + mask (h kept in float32 across the stack).
    h = jnp.dot(w_pre_ref[...], x_ext, preferred_element_type=jnp.float32)
    h = (h + b_pre_ref[...]) * mask                                       # (H, W)

    cond = cond_ref[0]                # (2H, L) f32: conv bias (+ conditioning)
    b_rs = b_rs_ref[...]              # (2H, L) f32

    skip = jnp.zeros((H, Wc), jnp.float32)
    for i in range(L):
        d = dilations[i]
        halo = d * (K - 1) // 2
        h_c = h.astype(cdtype)
        if halo > 0:
            zpad = jnp.zeros((H, halo), cdtype)
            xh = jnp.concatenate([zpad, h_c, zpad], axis=1)
        else:
            xh = h_c
        # im2col: K dilated taps stacked along the contraction axis.
        if K > 1:
            xcol = jnp.concatenate(
                [xh[:, k * d:k * d + W] for k in range(K)], axis=0)        # (K*H, W)
        else:
            xcol = xh
        u = jnp.dot(w_in_ref[i], xcol, preferred_element_type=jnp.float32)  # (2H, W)
        u = u + cond[:, i:i + 1]
        acts = (jnp.tanh(u[:H]) * jax.nn.sigmoid(u[H:])).astype(cdtype)     # (H, W)
        rs = jnp.dot(w_rs_ref[i], acts, preferred_element_type=jnp.float32) # (2H, W)
        rs = rs + b_rs[:, i:i + 1]
        skip = skip + rs[H:, M:M + Wc]             # f32 skip accumulation
        if i < L - 1:
            h = (h + rs[:H]) * mask

    # proj 1x1 conv + mask + split + sample.
    mask_c = mask[:, M:M + Wc]
    stats = jnp.dot(w_proj_ref[...], skip.astype(cdtype),
                    preferred_element_type=jnp.float32)
    stats = (stats + b_proj_ref[...]) * mask_c                              # (2C, Wc)
    mean = stats[:C]
    logs = stats[C:]
    z_out = (mean + noise_ref[0] * jnp.exp(logs)) * mask_c
    z_ref[0] = z_out.astype(z_ref.dtype)
    m_ref[0] = mean.astype(m_ref.dtype)
    logs_ref[0] = logs.astype(logs_ref.dtype)


# ----------------------------------------------------------------------------
# Wrapper
# ----------------------------------------------------------------------------
def posterior_encoder_pallas(params, x, x_lengths, noise, g=None, *, cfg,
                             compute_dtype=jnp.float32, target_t_tile=512):
    """Pallas forward.  `noise` plays the role of torch.randn_like(m).
    On v5e pass compute_dtype=jnp.bfloat16 for MXU-native throughput."""
    B, Cin, T = x.shape
    H = cfg["hidden_channels"]
    K = cfg["kernel_size"]
    drate = cfg["dilation_rate"]
    L = cfg["n_layers"]
    C = cfg["out_channels"]
    assert K % 2 == 1, "same-length dilated conv requires odd kernel_size"

    cdtype = compute_dtype
    dilations = tuple(int(drate) ** i for i in range(L))
    total_halo = sum(d * (K - 1) // 2 for d in dilations)
    t_tile, halo_pad = _pick_tiling(T, total_halo, target=target_t_tile)
    nt = -(-T // t_tile)
    T_pad = nt * t_tile

    x_p = jnp.pad(x, ((0, 0), (0, 0), (0, T_pad - T))) if T_pad != T else x
    noise_p = (jnp.pad(noise, ((0, 0), (0, 0), (0, T_pad - T)))
               if T_pad != T else noise)
    x_p = x_p.astype(cdtype)
    noise_p = noise_p.astype(jnp.float32)
    lens = x_lengths.astype(jnp.int32)

    # ---- effective weights, pre-cast to compute dtype ----
    w_pre = params["pre"]["w"].astype(cdtype)                        # (H, Cin)
    b_pre = params["pre"]["b"].reshape(H, 1).astype(jnp.float32)
    w_proj = params["proj"]["w"].astype(cdtype)                      # (2C, H)
    b_proj = params["proj"]["b"].reshape(2 * C, 1).astype(jnp.float32)

    w_in_all = jnp.stack(
        [jnp.transpose(params["in_layers"][i]["w"], (0, 2, 1)).reshape(2 * H, K * H)
         for i in range(L)], axis=0).astype(cdtype)                  # (L, 2H, K*H)

    # Fold conv bias and conditioning into one per-layer bias column.
    b_in_cols = jnp.stack([params["in_layers"][i]["b"] for i in range(L)],
                          axis=1).astype(jnp.float32)                # (2H, L)
    if g is not None:
        # TODO(synk): time-varying conditioning (g with T_g > 1) not implemented.
        assert g.shape[2] == 1
        g_all = (jnp.einsum("oc,bct->bot", params["cond"]["w"], g)
                 + params["cond"]["b"][None, :, None])               # (B, 2H*L, 1)
        g_all = jnp.transpose(g_all[:, :, 0].reshape(B, L, 2 * H), (0, 2, 1))
        cond = (b_in_cols[None] + g_all).astype(jnp.float32)         # (B, 2H, L)
        per_batch_cond = True
    else:
        cond = b_in_cols[None]                                       # (1, 2H, L)
        per_batch_cond = False

    # Res/skip weights stacked; the last layer's H-channel output goes into the
    # "skip" rows [H:2H] so every layer uses the same (2H, H) matmul.
    w_rs_list, b_rs_list = [], []
    for i in range(L):
        w = params["res_skip"][i]["w"]
        bb = params["res_skip"][i]["b"]
        if i == L - 1:
            w = jnp.concatenate([jnp.zeros((H, H), w.dtype), w], axis=0)
            bb = jnp.concatenate([jnp.zeros((H,), bb.dtype), bb], axis=0)
        w_rs_list.append(w)
        b_rs_list.append(bb)
    w_rs_all = jnp.stack(w_rs_list, axis=0).astype(cdtype)           # (L, 2H, H)
    b_rs_all = jnp.stack(b_rs_list, axis=1).astype(jnp.float32)      # (2H, L)

    # ---- BlockSpecs ----
    cur = lambda b_, t_, *_: (b_, 0, t_)
    const2 = lambda b_, t_, *_: (0, 0)
    const3 = lambda b_, t_, *_: (0, 0, 0)

    in_specs = [pl.BlockSpec((1, Cin, t_tile), cur)]
    args = [x_p]
    if halo_pad > 0:
        r = t_tile // halo_pad
        last_blk = nt * r - 1
        in_specs += [
            pl.BlockSpec((1, Cin, halo_pad),
                         lambda b_, t_, *_: (b_, 0, jnp.maximum(t_ * r - 1, 0))),
            pl.BlockSpec((1, Cin, halo_pad),
                         lambda b_, t_, *_: (b_, 0, jnp.minimum((t_ + 1) * r,
                                                                last_blk))),
        ]
        args += [x_p, x_p]
    in_specs += [
        pl.BlockSpec((1, C, t_tile), cur),
        pl.BlockSpec((H, Cin), const2),
        pl.BlockSpec((H, 1), const2),
        pl.BlockSpec((L, 2 * H, K * H), const3),
        pl.BlockSpec((1, 2 * H, L),
                     (lambda b_, t_, *_: (b_, 0, 0)) if per_batch_cond else const3),
        pl.BlockSpec((L, 2 * H, H), const3),
        pl.BlockSpec((2 * H, L), const2),
        pl.BlockSpec((2 * C, H), const2),
        pl.BlockSpec((2 * C, 1), const2),
    ]
    args += [noise_p, w_pre, b_pre, w_in_all, cond, w_rs_all, b_rs_all,
             w_proj, b_proj]

    out_shape = tuple(jax.ShapeDtypeStruct((B, C, T_pad), jnp.float32)
                      for _ in range(3))
    out_specs = tuple(pl.BlockSpec((1, C, t_tile), cur) for _ in range(3))

    kern = functools.partial(
        _posterior_encoder_kernel, H=H, K=K, L=L, C=C, dilations=dilations,
        t_tile=t_tile, halo_pad=halo_pad, cdtype=cdtype)

    z, m, logs = pl.pallas_call(
        kern,
        grid_spec=pltpu.PrefetchScalarGridSpec(
            num_scalar_prefetch=1, grid=(B, nt),
            in_specs=in_specs, out_specs=out_specs),
        out_shape=out_shape,
        compiler_params=pltpu.CompilerParams(
            dimension_semantics=("parallel", "parallel"),
            vmem_limit_bytes=_vmem_limit_bytes()),
    )(lens, *args)

    pos = jnp.arange(T, dtype=jnp.int32)
    x_mask = (pos[None, :] < lens[:, None]).astype(x.dtype)[:, None, :]
    return z[:, :, :T], m[:, :, :T], logs[:, :, :T], x_mask


# ----------------------------------------------------------------------------
# Pure-JAX reference (mirrors the PyTorch forward) for validation.
# ----------------------------------------------------------------------------
def posterior_encoder_ref(params, x, x_lengths, noise, cfg, g=None):
    B, Cin, T = x.shape
    H = cfg["hidden_channels"]
    K = cfg["kernel_size"]
    drate = cfg["dilation_rate"]
    L = cfg["n_layers"]
    C = cfg["out_channels"]

    pos = jnp.arange(T, dtype=jnp.int32)
    mask = (pos[None, :] < x_lengths[:, None].astype(jnp.int32)
            ).astype(x.dtype)[:, None, :]

    def conv1x1(v, w, b):
        return jnp.einsum("oc,bct->bot", w, v) + b[None, :, None]

    h = conv1x1(x, params["pre"]["w"], params["pre"]["b"]) * mask
    if g is not None:
        g_all = conv1x1(g, params["cond"]["w"], params["cond"]["b"])

    output = jnp.zeros_like(h)
    for i in range(L):
        d = drate ** i
        pad = (K * d - d) // 2
        w_in = params["in_layers"][i]["w"]
        b_in = params["in_layers"][i]["b"]
        x_in = jax.lax.conv_general_dilated(
            h, w_in, window_strides=(1,), padding=[(pad, pad)],
            rhs_dilation=(d,), dimension_numbers=("NCH", "OIH", "NCH"))
        x_in = x_in + b_in[None, :, None]
        if g is not None:
            x_in = x_in + g_all[:, i * 2 * H:(i + 1) * 2 * H, :]
        acts = jnp.tanh(x_in[:, :H]) * jax.nn.sigmoid(x_in[:, H:])
        rs = conv1x1(acts, params["res_skip"][i]["w"],
                     params["res_skip"][i]["b"])
        if i < L - 1:
            h = (h + rs[:, :H]) * mask
            output = output + rs[:, H:]
        else:
            output = output + rs
    enc = output * mask
    stats = conv1x1(enc, params["proj"]["w"], params["proj"]["b"]) * mask
    m, logs = stats[:, :C], stats[:, C:]
    z = (m + noise * jnp.exp(logs)) * mask
    return z, m, logs, mask


# ----------------------------------------------------------------------------
# Deterministic parameter init (effective weights; weight_norm folded in).
# ----------------------------------------------------------------------------
def init_params(key, cfg):
    in_ch = cfg["in_channels"]
    out_ch = cfg["out_channels"]
    H = cfg["hidden_channels"]
    K = cfg["kernel_size"]
    L = cfg["n_layers"]
    gin = cfg["gin_channels"]
    keys = iter(jax.random.split(key, 4 * L + 8))

    def nrm(shape, scale=0.1):
        return scale * jax.random.normal(next(keys), shape, jnp.float32)

    params = {
        "pre": {"w": nrm((H, in_ch)), "b": nrm((H,))},
        "in_layers": [],
        "res_skip": [],
        "proj": {"w": nrm((2 * out_ch, H)), "b": nrm((2 * out_ch,))},
    }
    for i in range(L):
        params["in_layers"].append({"w": nrm((2 * H, H, K)), "b": nrm((2 * H,))})
        cr = 2 * H if i < L - 1 else H
        params["res_skip"].append({"w": nrm((cr, H)), "b": nrm((cr,))})
    if gin > 0:
        params["cond"] = {"w": nrm((2 * H * L, gin)), "b": nrm((2 * H * L,))}
    return params


if __name__ == "__main__":
    # Keep both the Pallas kernel and the XLA reference at full f32 precision so
    # the comparison is tight.
    jax.config.update("jax_default_matmul_precision", "highest")

    def check(cfg, B, T, lens, seed, use_g=False, compute_dtype=jnp.float32,
              rtol=5e-3, atol=5e-4):
        k = jax.random.PRNGKey(seed)
        kp, kx, kn, kg = jax.random.split(k, 4)
        params = init_params(kp, cfg)
        x = jax.random.normal(kx, (B, cfg["in_channels"], T), jnp.float32)
        # torch.randn_like(m): noise generated outside the kernel (deterministic).
        noise = jax.random.normal(kn, (B, cfg["out_channels"], T), jnp.float32)
        x_lengths = jnp.asarray(lens, jnp.int32)
        g = (jax.random.normal(kg, (B, cfg["gin_channels"], 1), jnp.float32)
             if use_g else None)

        fwd = jax.jit(functools.partial(posterior_encoder_pallas, cfg=cfg,
                                        compute_dtype=compute_dtype))
        z, m, logs, x_mask = jax.block_until_ready(
            fwd(params, x, x_lengths, noise, g))
        z_r, m_r, logs_r, mask_r = posterior_encoder_ref(params, x, x_lengths,
                                                         noise, cfg, g=g)
        assert z.shape == (B, cfg["out_channels"], T), z.shape
        assert bool(jnp.all(jnp.isfinite(z)))
        np.testing.assert_allclose(np.asarray(x_mask), np.asarray(mask_r), atol=0)
        np.testing.assert_allclose(np.asarray(m), np.asarray(m_r),
                                   rtol=rtol, atol=atol)
        np.testing.assert_allclose(np.asarray(logs), np.asarray(logs_r),
                                   rtol=rtol, atol=atol)
        np.testing.assert_allclose(np.asarray(z), np.asarray(z_r),
                                   rtol=rtol, atol=atol)

    cfg = dict(in_channels=4, out_channels=8, hidden_channels=32,
               kernel_size=5, dilation_rate=2, n_layers=3, gin_channels=0)

    # 1) small single-window case (module's default g=None path).
    check(cfg, B=2, T=16, lens=[16, 11], seed=0)

    # 2) multi-tile overlap-save path (neighbour-halo BlockSpecs + cross-tile mask).
    check(cfg, B=2, T=700, lens=[700, 437], seed=1)

    # 3) speaker-conditioned path (g folded into the per-layer bias).
    cfg_g = dict(cfg, gin_channels=16)
    check(cfg_g, B=2, T=16, lens=[16, 9], seed=2, use_g=True)

    # 4) bf16 MXU-input path (f32 accumulation, f32 h/skip), loose tolerance.
    check(cfg, B=2, T=16, lens=[16, 11], seed=0,
          compute_dtype=jnp.bfloat16, rtol=5e-2, atol=5e-2)

    print("KERNEL_OK")
</pallas_src>

<mosaic_0001>
module attributes {stable_mosaic.version = 11 : i64} {
  func.func @_posterior_encoder_kernel(%arg0: i32, %arg1: i32, %arg2: memref<2xi32, #tpu.memory_space<smem>>, %arg3: memref<1x4x16xf32, #tpu.memory_space<vmem>>, %arg4: memref<1x8x16xf32, #tpu.memory_space<vmem>>, %arg5: memref<32x4xf32, #tpu.memory_space<vmem>>, %arg6: memref<32x1xf32, #tpu.memory_space<vmem>>, %arg7: memref<3x64x160xf32, #tpu.memory_space<vmem>>, %arg8: memref<1x64x3xf32, #tpu.memory_space<vmem>>, %arg9: memref<3x64x32xf32, #tpu.memory_space<vmem>>, %arg10: memref<64x3xf32, #tpu.memory_space<vmem>>, %arg11: memref<16x32xf32, #tpu.memory_space<vmem>>, %arg12: memref<16x1xf32, #tpu.memory_space<vmem>>, %arg13: memref<1x8x16xf32, #tpu.memory_space<vmem>>, %arg14: memref<1x8x16xf32, #tpu.memory_space<vmem>>, %arg15: memref<1x8x16xf32, #tpu.memory_space<vmem>>) attributes {dimension_semantics = [#tpu.dimension_semantics<parallel>, #tpu.dimension_semantics<parallel>], iteration_bounds = array<i64: 2, 1>, scalar_prefetch = 1 : i64, scratch_operands = 0 : i64, tpu.core_type = #tpu.core_type<tc>, window_params = [{transform_indices = @transform_0, window_bounds = array<i64: 1, 4, 16>}, {transform_indices = @transform_1, window_bounds = array<i64: 1, 8, 16>}, {pipeline_mode = #tpu.pipeline_mode<synchronous>, transform_indices = @transform_2, window_bounds = array<i64: 32, 4>}, {pipeline_mode = #tpu.pipeline_mode<synchronous>, transform_indices = @transform_3, window_bounds = array<i64: 32, 1>}, {pipeline_mode = #tpu.pipeline_mode<synchronous>, transform_indices = @transform_4, window_bounds = array<i64: 3, 64, 160>}, {pipeline_mode = #tpu.pipeline_mode<synchronous>, transform_indices = @transform_5, window_bounds = array<i64: 1, 64, 3>}, {pipeline_mode = #tpu.pipeline_mode<synchronous>, transform_indices = @transform_6, window_bounds = array<i64: 3, 64, 32>}, {pipeline_mode = #tpu.pipeline_mode<synchronous>, transform_indices = @transform_7, window_bounds = array<i64: 64, 3>}, {pipeline_mode = #tpu.pipeline_mode<synchronous>, transform_indices = @transform_8, window_bounds = array<i64: 16, 32>}, {pipeline_mode = #tpu.pipeline_mode<synchronous>, transform_indices = @transform_9, window_bounds = array<i64: 16, 1>}, {transform_indices = @transform_10, window_bounds = array<i64: 1, 8, 16>}, {transform_indices = @transform_11, window_bounds = array<i64: 1, 8, 16>}, {transform_indices = @transform_12, window_bounds = array<i64: 1, 8, 16>}]} {
    %0 = arith.index_cast %arg0 : i32 to index
    %1 = memref.load %arg2[%0] : memref<2xi32, #tpu.memory_space<smem>>
    %c0 = arith.constant 0 : index
    %c0_0 = arith.constant 0 : index
    %c0_1 = arith.constant 0 : index
    %2 = vector.load %arg3[%c0, %c0_0, %c0_1] : memref<1x4x16xf32, #tpu.memory_space<vmem>>, vector<1x4x16xf32>
    %3 = vector.shape_cast %2 : vector<1x4x16xf32> to vector<4x16xf32>
    %c16_i32 = arith.constant 16 : i32
    %4 = arith.muli %arg1, %c16_i32 : i32
    %c0_i32 = arith.constant 0 : i32
    %5 = arith.subi %4, %c0_i32 : i32
    %6 = tpu.iota {dimensions = array<i32: 1>} : vector<1x16xi32>
    %7 = vector.broadcast %5 : i32 to vector<1x16xi32>
    %8 = arith.addi %7, %6 : vector<1x16xi32>
    %c0_i32_2 = arith.constant 0 : i32
    %9 = vector.broadcast %c0_i32_2 : i32 to vector<1x16xi32>
    %10 = arith.cmpi sge, %8, %9 : vector<1x16xi32>
    %11 = vector.broadcast %1 : i32 to vector<1x16xi32>
    %12 = arith.cmpi slt, %8, %11 : vector<1x16xi32>
    %13 = arith.andi %10, %12 : vector<1x16xi1>
    %14 = arith.extui %13 : vector<1x16xi1> to vector<1x16xi32>
    %15 = arith.sitofp %14 : vector<1x16xi32> to vector<1x16xf32>
    %c0_3 = arith.constant 0 : index
    %c0_4 = arith.constant 0 : index
    %16 = vector.load %arg5[%c0_3, %c0_4] : memref<32x4xf32, #tpu.memory_space<vmem>>, vector<32x4xf32>
    %cst = arith.constant dense<0.000000e+00> : vector<32x16xf32>
    %17 = tpu.matmul %16, %3, %cst {dimension_numbers = #tpu.dot_dimension_numbers<[1], [0], [0], [1], [0, 0, 1, 1], [], []>, precision = #tpu.contract_precision<fp32>} : vector<32x4xf32>, vector<4x16xf32>, vector<32x16xf32> -> vector<32x16xf32>
    %c0_5 = arith.constant 0 : index
    %c0_6 = arith.constant 0 : index
    %18 = vector.load %arg6[%c0_5, %c0_6] : memref<32x1xf32, #tpu.memory_space<vmem>>, vector<32x1xf32>
    %19 = vector.broadcast %18 : vector<32x1xf32> to vector<32x16xf32>
    %20 = arith.addf %17, %19 : vector<32x16xf32>
    %21 = vector.broadcast %15 : vector<1x16xf32> to vector<32x16xf32>
    %22 = arith.mulf %20, %21 : vector<32x16xf32>
    %c0_7 = arith.constant 0 : index
    %c0_8 = arith.constant 0 : index
    %c0_9 = arith.constant 0 : index
    %23 = vector.load %arg8[%c0_7, %c0_8, %c0_9] : memref<1x64x3xf32, #tpu.memory_space<vmem>>, vector<1x64x3xf32>
    %24 = vector.shape_cast %23 : vector<1x64x3xf32> to vector<64x3xf32>
    %c0_10 = arith.constant 0 : index
    %c0_11 = arith.constant 0 : index
    %25 = vector.load %arg10[%c0_10, %c0_11] : memref<64x3xf32, #tpu.memory_space<vmem>>, vector<64x3xf32>
    %cst_12 = arith.constant 0.000000e+00 : f32
    %26 = vector.broadcast %cst_12 : f32 to vector<32x16xf32>
    %cst_13 = arith.constant 0.000000e+00 : f32
    %27 = vector.broadcast %cst_13 : f32 to vector<32x2xf32>
    %28 = tpu.concatenate %27, %22, %27 in 1 : vector<32x2xf32>, vector<32x16xf32>, vector<32x2xf32> -> vector<32x20xf32>
    %29 = vector.extract_strided_slice %28 {offsets = [0, 0], sizes = [32, 16], strides = [1, 1]} : vector<32x20xf32> to vector<32x16xf32>
    %30 = vector.extract_strided_slice %28 {offsets = [0, 1], sizes = [32, 16], strides = [1, 1]} : vector<32x20xf32> to vector<32x16xf32>
    %31 = vector.extract_strided_slice %28 {offsets = [0, 2], sizes = [32, 16], strides = [1, 1]} : vector<32x20xf32> to vector<32x16xf32>
    %32 = vector.extract_strided_slice %28 {offsets = [0, 3], sizes = [32, 16], strides = [1, 1]} : vector<32x20xf32> to vector<32x16xf32>
    %33 = vector.extract_strided_slice %28 {offsets = [0, 4], sizes = [32, 16], strides = [1, 1]} : vector<32x20xf32> to vector<32x16xf32>
    %34 = tpu.concatenate %29, %30, %31, %32, %33 in 0 : vector<32x16xf32>, vector<32x16xf32>, vector<32x16xf32>, vector<32x16xf32>, vector<32x16xf32> -> vector<160x16xf32>
    %c0_14 = arith.constant 0 : index
    %c0_15 = arith.constant 0 : index
    %c0_16 = arith.constant 0 : index
    %35 = vector.load %arg7[%c0_14, %c0_15, %c0_16] : memref<3x64x160xf32, #tpu.memory_space<vmem>>, vector<1x64x160xf32>
    %36 = vector.shape_cast %35 : vector<1x64x160xf32> to vector<64x160xf32>
    %cst_17 = arith.constant dense<0.000000e+00> : vector<64x16xf32>
    %37 = tpu.matmul %36, %34, %cst_17 {dimension_numbers = #tpu.dot_dimension_numbers<[1], [0], [0], [1], [0, 0, 1, 1], [], []>, precision = #tpu.contract_precision<fp32>} : vector<64x160xf32>, vector<160x16xf32>, vector<64x16xf32> -> vector<64x16xf32>
    %38 = vector.extract_strided_slice %24 {offsets = [0, 0], sizes = [64, 1], strides = [1, 1]} : vector<64x3xf32> to vector<64x1xf32>
    %39 = vector.broadcast %38 : vector<64x1xf32> to vector<64x16xf32>
    %40 = arith.addf %37, %39 : vector<64x16xf32>
    %41 = vector.extract_strided_slice %40 {offsets = [0, 0], sizes = [32, 16], strides = [1, 1]} : vector<64x16xf32> to vector<32x16xf32>
    %42 = math.tanh %41 : vector<32x16xf32>
    %43 = vector.extract_strided_slice %40 {offsets = [32, 0], sizes = [32, 16], strides = [1, 1]} : vector<64x16xf32> to vector<32x16xf32>
    %44 = arith.negf %43 : vector<32x16xf32>
    %45 = math.exp %44 : vector<32x16xf32>
    %cst_18 = arith.constant 1.000000e+00 : f32
    %46 = vector.broadcast %cst_18 : f32 to vector<32x16xf32>
    %47 = arith.addf %46, %45 : vector<32x16xf32>
    %48 = arith.divf %46, %47 : vector<32x16xf32>
    %49 = arith.mulf %42, %48 : vector<32x16xf32>
    %c0_19 = arith.constant 0 : index
    %c0_20 = arith.constant 0 : index
    %c0_21 = arith.constant 0 : index
    %50 = vector.load %arg9[%c0_19, %c0_20, %c0_21] : memref<3x64x32xf32, #tpu.memory_space<vmem>>, vector<1x64x32xf32>
    %51 = vector.shape_cast %50 : vector<1x64x32xf32> to vector<64x32xf32>
    %cst_22 = arith.constant dense<0.000000e+00> : vector<64x16xf32>
    %52 = tpu.matmul %51, %49, %cst_22 {dimension_numbers = #tpu.dot_dimension_numbers<[1], [0], [0], [1], [0, 0, 1, 1], [], []>, precision = #tpu.contract_precision<fp32>} : vector<64x32xf32>, vector<32x16xf32>, vector<64x16xf32> -> vector<64x16xf32>
    %53 = vector.extract_strided_slice %25 {offsets = [0, 0], sizes = [64, 1], strides = [1, 1]} : vector<64x3xf32> to vector<64x1xf32>
    %54 = vector.broadcast %53 : vector<64x1xf32> to vector<64x16xf32>
    %55 = arith.addf %52, %54 : vector<64x16xf32>
    %56 = vector.extract_strided_slice %55 {offsets = [32, 0], sizes = [32, 16], strides = [1, 1]} : vector<64x16xf32> to vector<32x16xf32>
    %57 = arith.addf %26, %56 : vector<32x16xf32>
    %58 = vector.extract_strided_slice %55 {offsets = [0, 0], sizes = [32, 16], strides = [1, 1]} : vector<64x16xf32> to vector<32x16xf32>
    %59 = arith.addf %22, %58 : vector<32x16xf32>
    %60 = vector.broadcast %15 : vector<1x16xf32> to vector<32x16xf32>
    %61 = arith.mulf %59, %60 : vector<32x16xf32>
    %cst_23 = arith.constant 0.000000e+00 : f32
    %62 = vector.broadcast %cst_23 : f32 to vector<32x4xf32>
    %63 = tpu.concatenate %62, %61, %62 in 1 : vector<32x4xf32>, vector<32x16xf32>, vector<32x4xf32> -> vector<32x24xf32>
    %64 = vector.extract_strided_slice %63 {offsets = [0, 0], sizes = [32, 16], strides = [1, 1]} : vector<32x24xf32> to vector<32x16xf32>
    %65 = vector.extract_strided_slice %63 {offsets = [0, 2], sizes = [32, 16], strides = [1, 1]} : vector<32x24xf32> to vector<32x16xf32>
    %66 = vector.extract_strided_slice %63 {offsets = [0, 4], sizes = [32, 16], strides = [1, 1]} : vector<32x24xf32> to vector<32x16xf32>
    %67 = vector.extract_strided_slice %63 {offsets = [0, 6], sizes = [32, 16], strides = [1, 1]} : vector<32x24xf32> to vector<32x16xf32>
    %68 = vector.extract_strided_slice %63 {offsets = [0, 8], sizes = [32, 16], strides = [1, 1]} : vector<32x24xf32> to vector<32x16xf32>
    %69 = tpu.concatenate %64, %65, %66, %67, %68 in 0 : vector<32x16xf32>, vector<32x16xf32>, vector<32x16xf32>, vector<32x16xf32>, vector<32x16xf32> -> vector<160x16xf32>
    %c1 = arith.constant 1 : index
    %c0_24 = arith.constant 0 : index
    %c0_25 = arith.constant 0 : index
    %70 = vector.load %arg7[%c1, %c0_24, %c0_25] : memref<3x64x160xf32, #tpu.memory_space<vmem>>, vector<1x64x160xf32>
    %71 = vector.shape_cast %70 : vector<1x64x160xf32> to vector<64x160xf32>
    %cst_26 = arith.constant dense<0.000000e+00> : vector<64x16xf32>
    %72 = tpu.matmul %71, %69, %cst_26 {dimension_numbers = #tpu.dot_dimension_numbers<[1], [0], [0], [1], [0, 0, 1, 1], [], []>, precision = #tpu.contract_precision<fp32>} : vector<64x160xf32>, vector<160x16xf32>, vector<64x16xf32> -> vector<64x16xf32>
    %73 = vector.extract_strided_slice %24 {offsets = [0, 1], sizes = [64, 1], strides = [1, 1]} : vector<64x3xf32> to vector<64x1xf32>
    %74 = vector.broadcast %73 : vector<64x1xf32> to vector<64x16xf32>
    %75 = arith.addf %72, %74 : vector<64x16xf32>
    %76 = vector.extract_strided_slice %75 {offsets = [0, 0], sizes = [32, 16], strides = [1, 1]} : vector<64x16xf32> to vector<32x16xf32>
    %77 = math.tanh %76 : vector<32x16xf32>
    %78 = vector.extract_strided_slice %75 {offsets = [32, 0], sizes = [32, 16], strides = [1, 1]} : vector<64x16xf32> to vector<32x16xf32>
    %79 = arith.negf %78 : vector<32x16xf32>
    %80 = math.exp %79 : vector<32x16xf32>
    %cst_27 = arith.constant 1.000000e+00 : f32
    %81 = vector.broadcast %cst_27 : f32 to vector<32x16xf32>
    %82 = arith.addf %81, %80 : vector<32x16xf32>
    %83 = arith.divf %81, %82 : vector<32x16xf32>
    %84 = arith.mulf %77, %83 : vector<32x16xf32>
    %c1_28 = arith.constant 1 : index
    %c0_29 = arith.constant 0 : index
    %c0_30 = arith.constant 0 : index
    %85 = vector.load %arg9[%c1_28, %c0_29, %c0_30] : memref<3x64x32xf32, #tpu.memory_space<vmem>>, vector<1x64x32xf32>
    %86 = vector.shape_cast %85 : vector<1x64x32xf32> to vector<64x32xf32>
    %cst_31 = arith.constant dense<0.000000e+00> : vector<64x16xf32>
    %87 = tpu.matmul %86, %84, %cst_31 {dimension_numbers = #tpu.dot_dimension_numbers<[1], [0], [0], [1], [0, 0, 1, 1], [], []>, precision = #tpu.contract_precision<fp32>} : vector<64x32xf32>, vector<32x16xf32>, vector<64x16xf32> -> vector<64x16xf32>
    %88 = vector.extract_strided_slice %25 {offsets = [0, 1], sizes = [64, 1], strides = [1, 1]} : vector<64x3xf32> to vector<64x1xf32>
    %89 = vector.broadcast %88 : vector<64x1xf32> to vector<64x16xf32>
    %90 = arith.addf %87, %89 : vector<64x16xf32>
    %91 = vector.extract_strided_slice %90 {offsets = [32, 0], sizes = [32, 16], strides = [1, 1]} : vector<64x16xf32> to vector<32x16xf32>
    %92 = arith.addf %57, %91 : vector<32x16xf32>
    %93 = vector.extract_strided_slice %90 {offsets = [0, 0], sizes = [32, 16], strides = [1, 1]} : vector<64x16xf32> to vector<32x16xf32>
    %94 = arith.addf %61, %93 : vector<32x16xf32>
    %95 = vector.broadcast %15 : vector<1x16xf32> to vector<32x16xf32>
    %96 = arith.mulf %94, %95 : vector<32x16xf32>
    %cst_32 = arith.constant 0.000000e+00 : f32
    %97 = vector.broadcast %cst_32 : f32 to vector<32x8xf32>
    %98 = tpu.concatenate %97, %96, %97 in 1 : vector<32x8xf32>, vector<32x16xf32>, vector<32x8xf32> -> vector<32x32xf32>
    %99 = vector.extract_strided_slice %98 {offsets = [0, 0], sizes = [32, 16], strides = [1, 1]} : vector<32x32xf32> to vector<32x16xf32>
    %100 = vector.extract_strided_slice %98 {offsets = [0, 4], sizes = [32, 16], strides = [1, 1]} : vector<32x32xf32> to vector<32x16xf32>
    %101 = vector.extract_strided_slice %98 {offsets = [0, 8], sizes = [32, 16], strides = [1, 1]} : vector<32x32xf32> to vector<32x16xf32>
    %102 = vector.extract_strided_slice %98 {offsets = [0, 12], sizes = [32, 16], strides = [1, 1]} : vector<32x32xf32> to vector<32x16xf32>
    %103 = vector.extract_strided_slice %98 {offsets = [0, 16], sizes = [32, 16], strides = [1, 1]} : vector<32x32xf32> to vector<32x16xf32>
    %104 = tpu.concatenate %99, %100, %101, %102, %103 in 0 : vector<32x16xf32>, vector<32x16xf32>, vector<32x16xf32>, vector<32x16xf32>, vector<32x16xf32> -> vector<160x16xf32>
    %c2 = arith.constant 2 : index
    %c0_33 = arith.constant 0 : index
    %c0_34 = arith.constant 0 : index
    %105 = vector.load %arg7[%c2, %c0_33, %c0_34] : memref<3x64x160xf32, #tpu.memory_space<vmem>>, vector<1x64x160xf32>
    %106 = vector.shape_cast %105 : vector<1x64x160xf32> to vector<64x160xf32>
    %cst_35 = arith.constant dense<0.000000e+00> : vector<64x16xf32>
    %107 = tpu.matmul %106, %104, %cst_35 {dimension_numbers = #tpu.dot_dimension_numbers<[1], [0], [0], [1], [0, 0, 1, 1], [], []>, precision = #tpu.contract_precision<fp32>} : vector<64x160xf32>, vector<160x16xf32>, vector<64x16xf32> -> vector<64x16xf32>
    %108 = vector.extract_strided_slice %24 {offsets = [0, 2], sizes = [64, 1], strides = [1, 1]} : vector<64x3xf32> to vector<64x1xf32>
    %109 = vector.broadcast %108 : vector<64x1xf32> to vector<64x16xf32>
    %110 = arith.addf %107, %109 : vector<64x16xf32>
    %111 = vector.extract_strided_slice %110 {offsets = [0, 0], sizes = [32, 16], strides = [1, 1]} : vector<64x16xf32> to vector<32x16xf32>
    %112 = math.tanh %111 : vector<32x16xf32>
    %113 = vector.extract_strided_slice %110 {offsets = [32, 0], sizes = [32, 16], strides = [1, 1]} : vector<64x16xf32> to vector<32x16xf32>
    %114 = arith.negf %113 : vector<32x16xf32>
    %115 = math.exp %114 : vector<32x16xf32>
    %cst_36 = arith.constant 1.000000e+00 : f32
    %116 = vector.broadcast %cst_36 : f32 to vector<32x16xf32>
    %117 = arith.addf %116, %115 : vector<32x16xf32>
    %118 = arith.divf %116, %117 : vector<32x16xf32>
    %119 = arith.mulf %112, %118 : vector<32x16xf32>
    %c2_37 = arith.constant 2 : index
    %c0_38 = arith.constant 0 : index
    %c0_39 = arith.constant 0 : index
    %120 = vector.load %arg9[%c2_37, %c0_38, %c0_39] : memref<3x64x32xf32, #tpu.memory_space<vmem>>, vector<1x64x32xf32>
    %121 = vector.shape_cast %120 : vector<1x64x32xf32> to vector<64x32xf32>
    %cst_40 = arith.constant dense<0.000000e+00> : vector<64x16xf32>
    %122 = tpu.matmul %121, %119, %cst_40 {dimension_numbers = #tpu.dot_dimension_numbers<[1], [0], [0], [1], [0, 0, 1, 1], [], []>, precision = #tpu.contract_precision<fp32>} : vector<64x32xf32>, vector<32x16xf32>, vector<64x16xf32> -> vector<64x16xf32>
    %123 = vector.extract_strided_slice %25 {offsets = [0, 2], sizes = [64, 1], strides = [1, 1]} : vector<64x3xf32> to vector<64x1xf32>
    %124 = vector.broadcast %123 : vector<64x1xf32> to vector<64x16xf32>
    %125 = arith.addf %122, %124 : vector<64x16xf32>
    %126 = vector.extract_strided_slice %125 {offsets = [32, 0], sizes = [32, 16], strides = [1, 1]} : vector<64x16xf32> to vector<32x16xf32>
    %127 = arith.addf %92, %126 : vector<32x16xf32>
    %c0_41 = arith.constant 0 : index
    %c0_42 = arith.constant 0 : index
    %128 = vector.load %arg11[%c0_41, %c0_42] : memref<16x32xf32, #tpu.memory_space<vmem>>, vector<16x32xf32>
    %cst_43 = arith.constant dense<0.000000e+00> : vector<16x16xf32>
    %129 = tpu.matmul %128, %127, %cst_43 {dimension_numbers = #tpu.dot_dimension_numbers<[1], [0], [0], [1], [0, 0, 1, 1], [], []>, precision = #tpu.contract_precision<fp32>} : vector<16x32xf32>, vector<32x16xf32>, vector<16x16xf32> -> vector<16x16xf32>
    %c0_44 = arith.constant 0 : index
    %c0_45 = arith.constant 0 : index
    %130 = vector.load %arg12[%c0_44, %c0_45] : memref<16x1xf32, #tpu.memory_space<vmem>>, vector<16x1xf32>
    %131 = vector.broadcast %130 : vector<16x1xf32> to vector<16x16xf32>
    %132 = arith.addf %129, %131 : vector<16x16xf32>
    %133 = vector.broadcast %15 : vector<1x16xf32> to vector<16x16xf32>
    %134 = arith.mulf %132, %133 : vector<16x16xf32>
    %135 = vector.extract_strided_slice %134 {offsets = [0, 0], sizes = [8, 16], strides = [1, 1]} : vector<16x16xf32> to vector<8x16xf32>
    %136 = vector.extract_strided_slice %134 {offsets = [8, 0], sizes = [8, 16], strides = [1, 1]} : vector<16x16xf32> to vector<8x16xf32>
    %c0_46 = arith.constant 0 : index
    %c0_47 = arith.constant 0 : index
    %c0_48 = arith.constant 0 : index
    %137 = vector.load %arg4[%c0_46, %c0_47, %c0_48] : memref<1x8x16xf32, #tpu.memory_space<vmem>>, vector<1x8x16xf32>
    %138 = vector.shape_cast %137 : vector<1x8x16xf32> to vector<8x16xf32>
    %139 = math.exp %136 : vector<8x16xf32>
    %140 = arith.mulf %138, %139 : vector<8x16xf32>
    %141 = arith.addf %135, %140 : vector<8x16xf32>
    %142 = vector.broadcast %15 : vector<1x16xf32> to vector<8x16xf32>
    %143 = arith.mulf %141, %142 : vector<8x16xf32>
    %c0_49 = arith.constant 0 : index
    %c0_50 = arith.constant 0 : index
    %c0_51 = arith.constant 0 : index
    %144 = vector.load %arg13[%c0_49, %c0_50, %c0_51] : memref<1x8x16xf32, #tpu.memory_space<vmem>>, vector<1x8x16xf32>
    %145 = vector.shape_cast %144 : vector<1x8x16xf32> to vector<8x16xf32>
    %146 = vector.shape_cast %143 : vector<8x16xf32> to vector<1x8x16xf32>
    tpu.vector_store %arg13[%c0_49, %c0_50, %c0_51], %146 {strides = array<i32>} : memref<1x8x16xf32, #tpu.memory_space<vmem>>, vector<1x8x16xf32>,
    %c0_52 = arith.constant 0 : index
    %c0_53 = arith.constant 0 : index
    %c0_54 = arith.constant 0 : index
    %147 = vector.load %arg14[%c0_52, %c0_53, %c0_54] : memref<1x8x16xf32, #tpu.memory_space<vmem>>, vector<1x8x16xf32>
    %148 = vector.shape_cast %147 : vector<1x8x16xf32> to vector<8x16xf32>
    %149 = vector.shape_cast %135 : vector<8x16xf32> to vector<1x8x16xf32>
    tpu.vector_store %arg14[%c0_52, %c0_53, %c0_54], %149 {strides = array<i32>} : memref<1x8x16xf32, #tpu.memory_space<vmem>>, vector<1x8x16xf32>,
    %c0_55 = arith.constant 0 : index
    %c0_56 = arith.constant 0 : index
    %c0_57 = arith.constant 0 : index
    %150 = vector.load %arg15[%c0_55, %c0_56, %c0_57] : memref<1x8x16xf32, #tpu.memory_space<vmem>>, vector<1x8x16xf32>
    %151 = vector.shape_cast %150 : vector<1x8x16xf32> to vector<8x16xf32>
    %152 = vector.shape_cast %136 : vector<8x16xf32> to vector<1x8x16xf32>
    tpu.vector_store %arg15[%c0_55, %c0_56, %c0_57], %152 {strides = array<i32>} : memref<1x8x16xf32, #tpu.memory_space<vmem>>, vector<1x8x16xf32>,
    return
  }
  func.func @transform_0(%arg0: i32, %arg1: i32, %arg2: memref<2xi32, #tpu.memory_space<smem>>) -> (i32, i32, i32) {
    %c0_i32 = arith.constant 0 : i32
    %c0_i32_0 = arith.constant 0 : i32
    return %arg0, %c0_i32, %arg1 : i32, i32, i32
  }
  func.func @transform_1(%arg0: i32, %arg1: i32, %arg2: memref<2xi32, #tpu.memory_space<smem>>) -> (i32, i32, i32) {
    %c0_i32 = arith.constant 0 : i32
    %c0_i32_0 = arith.constant 0 : i32
    return %arg0, %c0_i32, %arg1 : i32, i32, i32
  }
  func.func @transform_2(%arg0: i32, %arg1: i32, %arg2: memref<2xi32, #tpu.memory_space<smem>>) -> (i32, i32) {
    %c0_i32 = arith.constant 0 : i32
    %c0_i32_0 = arith.constant 0 : i32
    %c0_i32_1 = arith.constant 0 : i32
    return %c0_i32, %c0_i32_0 : i32, i32
  }
  func.func @transform_3(%arg0: i32, %arg1: i32, %arg2: memref<2xi32, #tpu.memory_space<smem>>) -> (i32, i32) {
    %c0_i32 = arith.constant 0 : i32
    %c0_i32_0 = arith.constant 0 : i32
    %c0_i32_1 = arith.constant 0 : i32
    return %c0_i32, %c0_i32_0 : i32, i32
  }
  func.func @transform_4(%arg0: i32, %arg1: i32, %arg2: memref<2xi32, #tpu.memory_space<smem>>) -> (i32, i32, i32) {
    %c0_i32 = arith.constant 0 : i32
    %c0_i32_0 = arith.constant 0 : i32
    %c0_i32_1 = arith.constant 0 : i32
    %c0_i32_2 = arith.constant 0 : i32
    return %c0_i32, %c0_i32_0, %c0_i32_1 : i32, i32, i32
  }
  func.func @transform_5(%arg0: i32, %arg1: i32, %arg2: memref<2xi32, #tpu.memory_space<smem>>) -> (i32, i32, i32) {
    %c0_i32 = arith.constant 0 : i32
    %c0_i32_0 = arith.constant 0 : i32
    %c0_i32_1 = arith.constant 0 : i32
    %c0_i32_2 = arith.constant 0 : i32
    return %c0_i32, %c0_i32_0, %c0_i32_1 : i32, i32, i32
  }
  func.func @transform_6(%arg0: i32, %arg1: i32, %arg2: memref<2xi32, #tpu.memory_space<smem>>) -> (i32, i32, i32) {
    %c0_i32 = arith.constant 0 : i32
    %c0_i32_0 = arith.constant 0 : i32
    %c0_i32_1 = arith.constant 0 : i32
    %c0_i32_2 = arith.constant 0 : i32
    return %c0_i32, %c0_i32_0, %c0_i32_1 : i32, i32, i32
  }
  func.func @transform_7(%arg0: i32, %arg1: i32, %arg2: memref<2xi32, #tpu.memory_space<smem>>) -> (i32, i32) {
    %c0_i32 = arith.constant 0 : i32
    %c0_i32_0 = arith.constant 0 : i32
    %c0_i32_1 = arith.constant 0 : i32
    return %c0_i32, %c0_i32_0 : i32, i32
  }
  func.func @transform_8(%arg0: i32, %arg1: i32, %arg2: memref<2xi32, #tpu.memory_space<smem>>) -> (i32, i32) {
    %c0_i32 = arith.constant 0 : i32
    %c0_i32_0 = arith.constant 0 : i32
    %c0_i32_1 = arith.constant 0 : i32
    return %c0_i32, %c0_i32_0 : i32, i32
  }
  func.func @transform_9(%arg0: i32, %arg1: i32, %arg2: memref<2xi32, #tpu.memory_space<smem>>) -> (i32, i32) {
    %c0_i32 = arith.constant 0 : i32
    %c0_i32_0 = arith.constant 0 : i32
    %c0_i32_1 = arith.constant 0 : i32
    return %c0_i32, %c0_i32_0 : i32, i32
  }
  func.func @transform_10(%arg0: i32, %arg1: i32, %arg2: memref<2xi32, #tpu.memory_space<smem>>) -> (i32, i32, i32) {
    %c0_i32 = arith.constant 0 : i32
    %c0_i32_0 = arith.constant 0 : i32
    return %arg0, %c0_i32, %arg1 : i32, i32, i32
  }
  func.func @transform_11(%arg0: i32, %arg1: i32, %arg2: memref<2xi32, #tpu.memory_space<smem>>) -> (i32, i32, i32) {
    %c0_i32 = arith.constant 0 : i32
    %c0_i32_0 = arith.constant 0 : i32
    return %arg0, %c0_i32, %arg1 : i32, i32, i32
  }
  func.func @transform_12(%arg0: i32, %arg1: i32, %arg2: memref<2xi32, #tpu.memory_space<smem>>) -> (i32, i32, i32) {
    %c0_i32 = arith.constant 0 : i32
    %c0_i32_0 = arith.constant 0 : i32
    return %arg0, %c0_i32, %arg1 : i32, i32, i32
  }
}

</mosaic_0001>

<bundles_post_ra>
// kernel: posterior_encoder_pallas.1
= control target key start
LH: loop header
LB: loop body
LE: loop exit
PB: predicated region body
PF: predicated region fallthrough
CT: control target
= control target key end

     0   :  { %s13647_s0 = inlined_call_operand.vmem [shape: s32[2], index: 0, kind: input, shape index: {}]   ;;  %s13648_s1 = inlined_call_operand.vmem [shape: f32[2,4,16], index: 1, kind: input, shape index: {}]   ;;  %s13649_s2 = inlined_call_operand.vmem [shape: f32[2,8,16], index: 2, kind: input, shape index: {}]   ;;  %s13650_s3 = inlined_call_operand.vmem [shape: f32[32,4], index: 3, kind: input, shape index: {}]   ;;  %s13651_s4 = inlined_call_operand.vmem [shape: f32[32,1], index: 4, kind: input, shape index: {}]   ;;  %s13652_s5 = inlined_call_operand.vmem [shape: f32[3,64,160], index: 5, kind: input, shape index: {}]   ;;  %s13653_s6 = inlined_call_operand.vmem [shape: f32[1,64,3], index: 6, kind: input, shape index: {}]   ;;  %s13654_s7 = inlined_call_operand.vmem [shape: f32[3,64,32], index: 7, kind: input, shape index: {}]   ;;  %s13655_s8 = inlined_call_operand.vmem [shape: f32[64,3], index: 8, kind: input, shape index: {}]   ;;  %s13656_s9 = inlined_call_operand.vmem [shape: f32[16,32], index: 9, kind: input, shape index: {}]   ;;  %s13657_s10 = inlined_call_operand.vmem [shape: f32[16,1], index: 10, kind: input, shape index: {}]   ;;  %s13658_s11 = inlined_call_operand.hbm [shape: f32[2,8,16], index: 11, kind: output, shape index: {0}]   ;;  %s13659_s12 = inlined_call_operand.hbm [shape: f32[2,8,16], index: 12, kind: output, shape index: {1}]   ;;  %s13660_s13 = inlined_call_operand.hbm [shape: f32[2,8,16], index: 13, kind: output, shape index: {2}]  }
   0x1   :  { %13849 = sst [smem:[#allocation47_spill]] %s13648_s1  ;;  %s19_s27 = sshll.u32 %s13647_s0, 4  ;;  %s20_s27 = int_to_ptr.vmem [resolvable:$true] %s19_s27 }
   0x2   :  { %13850 = sst [smem:[#allocation48_spill]] %s13650_s3  ;;  %s10495_s28 = scalar_lea.vmem %s20_s27, 16 }
   0x3   :  { %13851 = sst [smem:[#allocation49_spill]] %s13651_s4  ;;  %p10496_p0 = scmp.ne.s32.totalorder %s20_s27, %s10495_s28 }
   0x4   :  { %13852 = sst [smem:[#allocation50_spill]] %s13652_s5  ;;  %p10500_p1 = scmp.lt.s32.totalorder %s20_s27, %s20_s27 }
   0x5   :  { %13853 = sst [smem:[#allocation51_spill]] %s13653_s6  ;;  %p10501_p2 = scmp.lt.s32.totalorder %s10495_s28, %s10495_s28 }
   0x6   :  { %13854 = sst [smem:[#allocation52_spill]] %s13654_s7 }
   0x7   :  { %13855 = sst [smem:[#allocation53_spill]] %s13655_s8  ;;  %p10502_p3 = por %p10501_p2, %p10500_p1 }
   0x9   :  { %p10503_p4 = pnand %p10502_p3, %p10496_p0 }
   0xb   :  { %10506 = shalt.err (!%p10503_p4)  }
   0xc   :  { %s10649_s29 = smov [#allocation3]  }
   0xd   :  { %22 = dma.vmem_to_smem %s20_s27, 16, %s10649_s29, [#allocation2] }
   0xe   :  { %10615 = dma.done.wait [#allocation2], 16 }
   0xf   :  { %10616 = vsyncadd [#allocation2], 4294967280 }
  0x10   :  { %24 = sfence }
  0x11   :  { %25 = vsyncpa [#allocation5], 0 }
  0x12   :  { %27 = vsyncpa [#allocation5 + $0x1], 0 }
  0x13   :  { %28 = vsyncpa [#allocation7], 0 }
  0x14   :  { %30 = vsyncpa [#allocation7 + $0x1], 0  ;;  %s10742_s30 = smov 0   ;;  %s10744_s0 = smov 0  }
  0x15   :  { %s10746_s14 = smov 0   ;;  %s10748_s15 = smov 0  }
  0x16   :  { %s10750_s16 = smov 0   ;;  %s10752_s17 = smov 0  }
  0x17 LB: > { %s13662_s18 = sadd.s32 4294967295, %s10647_s17   ;;  %s13661_s19 = sadd.s32 4294967294, %s10647_s17   ;;  %s10647_s17 = sphi %s10752_s17, %s36_s17   ;;  %s10643_s16 = sphi %s10750_s16, %s14233_s16   ;;  %s10639_s15 = sphi %s10748_s15, %s14232_s15   ;;  %s10635_s14 = sphi %s10746_s14, %s14231_s14   ;;  %s10631_s0 = sphi %s10744_s0, %s14230_s0   ;;  %s10627_s30 = sphi %s10742_s30, %s14229_s30  }
  0x18   : > { %s48_s20 = sadd.s32 1, %s10643_s16  ;;  %s281_s21 = sadd.s32 1, %s10635_s14 }
  0x19   : > { %p50_p5 = scmp.ge.s32.totalorder %s48_s20, 2  ;;  %p291_p6 = scmp.ne.s32.totalorder %s10635_s14, %s10631_s0 }
  0x1a   : > { %p292_p7 = scmp.eq.s32.totalorder %s13662_s18, 1  ;;  %p297_p8 = scmp.ne.s32.totalorder %s10631_s0, %s10627_s30 }
  0x1b   : > { %s14235_s20 = smov (%p50_p5, %s48_s20), 0  ;;  %p298_p10 = scmp.eq.s32.totalorder %s13661_s19, 1 }
  0x1c   : > { %p10784_p9 = por %p292_p7, %p291_p6  ;;  %s276_s23 = ssub.s32 %s10643_s16, %s14235_s20 }
  0x1d   : > { %p8320_p11 = scmp.ge.s32.totalorder %s10647_s17, 1  ;;  %p279_p12 = scmp.eq.s32.totalorder %s276_s23, 0 }
  0x1e   : > { %p10793_p13 = por %p298_p10, %p297_p8  ;;  %p416_p0 = scmp.lt.s32.totalorder %s10647_s17, 3 }
  0x1f   : > { %s10799_s25 = scalar_select %p279_p12, %s10635_s14, %s281_s21  }
  0x20   : > { %p417_p1 = pnand %p8320_p11, %p416_p0 }
  0x22   : > { %420 = sbr.rel (%p417_p1) target bundleno = 3779 (0xec3), region = 60 }
  0x29   : > { %p477_p2 = scmp.lt.s32.totalorder %s10639_s15, 1  ;;  %s13858_s3 = sld [smem:[#allocation48_spill]]  ;;  %vm532_vm0 = vcmask 31744   ;;  %v13667_v12 = vmov 0   ;;  %vm545_vm1 = vcmask 1043456   ;;  %v494_v44 = vlaneseq }
  0x2a   : > { %s13859_s4 = sld [smem:[#allocation49_spill]]  ;;  %10393 = vset.pattern.permute.xlu0 %v13667_v12  ;;  %10394 = vset.pattern.permute.xlu1 %v13667_v12  ;;  %s13860_s1 = sld [smem:[#allocation47_spill]]  ;;  %v13679_v50 = vmov 0.0|0.0   ;;  %v10652_v54 = vmov 0.0   ;;  %vm1160_vm3 = vcmask 15360   ;;  %vm1165_vm4 = vcmask 146432  }
  0x2b   : > { %s10821_s28 = scalar_select %p477_p2, %s10639_s15, 1  ;;  %v495_v46 = vand.u32 127, %v494_v44  ;;  %vm1278_vm5 = vcmask 261120   ;;  %vm3323_vm6 = vcmask 162816   ;;  %vm5462_vm7 = vcmask 64512  }
  0x2c   : > { %s10654_s23 = smov 127   ;;  %s13663_s21 = smov 126   ;;  %vm5467_vm8 = vcmask 195584   ;;  %vm8110_vm9 = vcmask 130048  }
  0x2d   : > { %s8324_s29 = sshll.u32 %s10821_s28, 2  ;;  %s13869_s5 = sld [smem:[#allocation50_spill]] }
  0x2e   : > { %s10656_s18 = smov 125   ;;  %s13665_s19 = smov 124  }
  0x2f   : > { %v504_v0 = vld [vmem:[%s13858_s3] sm:$0xff]  ;;  %v505_v1 = vld [vmem:[%s13858_s3 + $0x8] sm:$0xff]  ;;  %v506_v2 = vld [vmem:[%s13858_s3 + $0x10] sm:$0xff]  ;;  %s13871_s6 = sld [smem:[#allocation51_spill]]  ;;  %s13872_s8 = sld [smem:[#allocation53_spill]] }
  0x30   : > { %v534_v3 = vsel %vm532_vm0, %v504_v0, 0  ;;  %v537_v4 = vsel %vm532_vm0, %v505_v1, 0  ;;  %v540_v5 = vsel %vm532_vm0, %v506_v2, 0  ;;  %v507_v6 = vld [vmem:[%s13858_s3 + $0x18] sm:$0xff]  ;;  %v508_v7 = vld [vmem:[%s13859_s4] sm:$0xff]  ;;  %v510_v13 = vld [vmem:[%s13859_s4 + $0x10] sm:$0xff]  ;;  %s483_s3 = scalar_lea.vmem %s13860_s1, %s8324_s29 }
  0x31   : > { %v10823_v8 = vand.u32 4294901760, %v534_v3  ;;  %v10825_v9 = vand.u32 4294901760, %v537_v4  ;;  %v10827_v10 = vand.u32 4294901760, %v540_v5  ;;  %v543_v11 = vsel %vm532_vm0, %v507_v6, 0  ;;  %514 = vperm.xlu0 %10393, %v508_v7   ;;  %524 = vperm.xlu1 %10394, %v510_v13   ;;  %v509_v18 = vld [vmem:[%s13859_s4 + $0x8] sm:$0xff]  ;;  %v511_v19 = vld [vmem:[%s13859_s4 + $0x18] sm:$0xff] }
  0x32   : > { %v10835_v14 = vand.u32 4294901760, %v543_v11  ;;  %v492_v21 = vld [vmem:[%s483_s3] sm:$0xf]  ;;  %s491_s3 = sld [smem:[#allocation3 + %s10639_s15]]  ;;  %s10653_s29 = smov 2  }
  0x33   : > { %8687 = vmatprep.mubr.f32.mxu0 %v10823_v8  ;;  %v626_v15 = vsub.f32 %v537_v4, %v10825_v9  ;;  %v616_v16 = vsub.f32 %v534_v3, %v10823_v8  ;;  %v636_v17 = vsub.f32 %v540_v5, %v10827_v10  ;;  %v547_v25 = vsel %vm545_vm1, %v492_v21, 0  ;;  %s13979_s7 = sld [smem:[#allocation52_spill]]  ;;  %s10660_s1 = smov 120  }
  0x34   : > { %v646_v20 = vsub.f32 %v543_v11, %v10835_v14  ;;  %v550_v27 = vand.u32 4294901760, %v547_v25  ;;  %s10662_s27 = smov 8   ;;  %s14223_s26 = sadd.s32 4294967295, %s10647_s17  }
  0x35   : > { %v617_v22 = vand.u32 4294901760, %v616_v16  ;;  %v627_v23 = vand.u32 4294901760, %v626_v15  ;;  %v637_v24 = vand.u32 4294901760, %v636_v17  ;;  %519 = vperm.xlu0 %10393, %v509_v18   ;;  %529 = vperm.xlu1 %10394, %v511_v19  }
  0x36   : > { %v647_v26 = vand.u32 4294901760, %v646_v20  ;;  %v657_v32 = vsub.f32 %v547_v25, %v550_v27  ;;  %8677 = vmatprep.subr.mxu1 %v550_v27 }
  0x37   : > { %v618_v28 = vsub.f32 %v616_v16, %v617_v22  ;;  %v628_v29 = vsub.f32 %v626_v15, %v627_v23  ;;  %v638_v30 = vsub.f32 %v636_v17, %v637_v24  ;;  %8678 = vmatpush3.msra.mxu1 %v550_v27 }
  0x38   : > { %v648_v31 = vsub.f32 %v646_v20, %v647_v26  ;;  %v658_v36 = vand.u32 4294901760, %v657_v32  ;;  %v499_v48 = vstv %s491_s3  ;;  %9151 = vmatprep.subr.bf16.mxu1 %v13679_v50  ;;  %s10658_s3 = smov 4  }
  0x39   : > { %v619_v33 = vand.u32 4294901760, %v618_v28  ;;  %v629_v34 = vand.u32 4294901760, %v628_v29  ;;  %v639_v35 = vand.u32 4294901760, %v638_v30  ;;  %vm500_vm2 = vcmp.lt.s32.totalorder %v495_v46, %v499_v48 }
  0x3a   : > { %v649_v37 = vand.u32 4294901760, %v648_v31  ;;  %v659_v38 = vsub.f32 %v657_v32, %v658_v36  ;;  %v10865_v55 = vsel %vm500_vm2, 1.0, %v10652_v54 }
  0x3b   : > { %8679 = vmatprep.mubr.f32.mxu1 %v619_v33  ;;  %13861 = vst [vmem:[#allocation12_spill] sm:$0xff] %v10865_v55 }
  0x3c   : > { %8680 = vmatmul.mubr.f32.vlgmr.msra.gmra.mrb[0].mxu1 %v629_v34  ;;  %v660_v39 = vand.u32 4294901760, %v659_v38 }
  0x3d   : > { %8682 = vmatprep.mubr.f32.mxu1 %v639_v35 }
  0x3e   : > { %8685 = vmatprep.subr.mxu0 %v660_v39 }
  0x3f   : > { %8686 = vmatpush3.msra.mxu0 %v660_v39 }
  0x40   : > { %8683 = vmatmul.mubr.f32.gmra.mrb[2].mxu1 %v649_v37  ;;  %8688 = vmatmul.mubr.f32.vlgmr.msra.gmra.mrb[0].mxu0 %v10825_v9 }
  0x41   : > { %8693 = vmatprep.subr.mxu0 %v657_v32  ;;  %8690 = vmatprep.mubr.f32.mxu0 %v10827_v10 }
  0x42   : > { %8694 = vmatpush3.msra.mxu0 %v657_v32 }
  0x43   : > { %8701 = vmatprep.subr.mxu0 %v550_v27 }
  0x44   : > { %8691 = vmatmul.mubr.f32.gmra.mrb[2].mxu0 %v10835_v14 }
  0x45   : > { %8695 = vmatprep.mubr.f32.mxu0 %v616_v16 }
  0x48   : > { %8696 = vmatmul.mubr.f32.vlgmr.msra.gmra.mrb[0].mxu0 %v626_v15 }
  0x49   : > { %8698 = vmatprep.mubr.f32.mxu0 %v636_v17  ;;  %8702 = vmatpush3.msra.mxu0 %v550_v27 }
  0x4a   : > { %8709 = vmatprep.subr.mxu0 %v658_v36 }
  0x4c   : > { %8699 = vmatmul.mubr.f32.gmra.mrb[2].mxu0 %v646_v20 }
  0x4d   : > { %8703 = vmatprep.mubr.f32.mxu0 %v617_v22 }
  0x50   : > { %8704 = vmatmul.mubr.f32.vlgmr.msra.gmra.mrb[0].mxu0 %v627_v23 }
  0x51   : > { %8706 = vmatprep.mubr.f32.mxu0 %v637_v24  ;;  %8710 = vmatpush3.msra.mxu0 %v658_v36 }
  0x52   : > { %8717 = vmatprep.subr.mxu0 %v550_v27 }
  0x54   : > { %8707 = vmatmul.mubr.f32.gmra.mrb[2].mxu0 %v647_v26 }
  0x55   : > { %8711 = vmatprep.mubr.f32.mxu0 %v10823_v8 }
  0x58   : > { %8712 = vmatmul.mubr.f32.vlgmr.msra.gmra.mrb[0].mxu0 %v10825_v9 }
  0x59   : > { %8714 = vmatprep.mubr.f32.mxu0 %v10827_v10  ;;  %8718 = vmatpush3.msra.mxu0 %v550_v27 }
  0x5c   : > { %8715 = vmatmul.mubr.f32.gmra.mrb[2].mxu0 %v10835_v14 }
  0x5d   : > { %8719 = vmatprep.mubr.f32.mxu0 %v10823_v8 }
  0x60   : > { %8720 = vmatmul.mubr.f32.vlgmr.msra.gmra.mrb[0].mxu0 %v10825_v9 }
  0x61   : > { %8722 = vmatprep.mubr.f32.mxu0 %v10827_v10 }
  0x64   : > { %8723 = vmatmul.mubr.f32.gmra.mrb[2].mxu0 %v10835_v14 }
  0xb0   : > { %v515_v45 = vpop.permute.xlu0 %514  ;;  %v525_v47 = vpop.permute.xlu1 %524 }
  0xb4   : > { %v520_v49 = vpop.permute.xlu0 %519  ;;  %v530_v53 = vpop.permute.xlu1 %529 }
 0x10f   : > { %v8681_v40 = vpop.f32.mrb[0].mxu1 }
 0x110   : > { %v621_v41 = vpop.f32.mrb[1].mxu1  ;;  %v632_v51 = vadd.f32 %v8681_v40, %v520_v49 }
 0x111   : > { %v622_v52 = vadd.f32 %v621_v41, %v515_v45  ;;  %v1223_v41 = vld [vmem:[%s13869_s5 + $0x8] sm:$0xff] }
 0x112   : > { %v1280_v45 = vsel %vm1278_vm5, %v1223_v41, 0 }
 0x113   : > { %v8684_v42 = vpop.f32.mrb[2].mxu1 }
 0x114   : > { %v641_v43 = vpop.f32.mrb[3].mxu1  ;;  %v652_v60 = vadd.f32 %v8684_v42, %v530_v53 }
 0x115   : > { %v642_v62 = vadd.f32 %v641_v43, %v525_v47  ;;  %v10945_v47 = vand.u32 4294901760, %v1280_v45 }
 0x117   : > { %v10948_v49 = vsub.f32 %v1280_v45, %v10945_v47  ;;  %v1225_v45 = vld [vmem:[%s13869_s5 + $0x18] sm:$0xff] }
 0x133   : > { %v8721_v56 = vpop.f32.mrb[0].mxu0 }
 0x134   : > { %v9884_v57 = vadd.f32 %v8721_v56, %v632_v51  ;;  %v1102_v58 = vpop.f32.mrb[1].mxu0  ;;  %v1133_v56 = vld [vmem:[%s13871_s6 + $0x28] sm:$0xff] }
 0x135   : > { %v9886_v59 = vadd.f32 %v1102_v58, %v622_v52  ;;  %v13669_v52 = vand.u32 4294901760, %v10948_v49  ;;  %v1135_v58 = vld [vmem:[%s13871_s6 + $0x38] sm:$0xff] }
 0x136   : > { %v10868_v61 = vmul.f32 %v9884_v57, %v10865_v55  ;;  %v1132_v57 = vld [vmem:[%s13871_s6 + $0x20] sm:$0xff] }
 0x137   : > { %v10871_v63 = vmul.f32 %v9886_v59, %v10865_v55  ;;  %v8724_v0 = vpop.f32.mrb[2].mxu0  ;;  %v1390_v53 = vsub.f32 %v10948_v49, %v13669_v52  ;;  %v1134_v59 = vld [vmem:[%s13871_s6 + $0x30] sm:$0xff] }
 0x138   : > { %13862 = vst [vmem:[#allocation13_spill] sm:$0xff] %v10868_v61  ;;  %v9888_v1 = vadd.f32 %v8724_v0, %v652_v60  ;;  %v1114_v2 = vpop.f32.mrb[3].mxu0  ;;  %1150 = vrot.lane.b32.xlu1 %v10868_v61, %s10653_s29  ;;  %v1129_v60 = vld [vmem:[%s13871_s6 + $0x8] sm:$0xff]  ;;  %v1131_v0 = vld [vmem:[%s13871_s6 + $0x18] sm:$0xff] }
 0x139   : > { %13863 = vst [vmem:[#allocation14_spill] sm:$0xff] %v10871_v63  ;;  %v9890_v3 = vadd.f32 %v1114_v2, %v642_v62  ;;  %1148 = vrot.lane.b32.xlu0 %v10871_v63, %s10653_s29  ;;  %v1391_v54 = vand.u32 4294901760, %v1390_v53  ;;  %v1128_v62 = vld [vmem:[%s13871_s6] sm:$0xff]  ;;  %v1137_v2 = vld [vmem:[%s13872_s8 + $0x8] sm:$0xff] }
 0x13a   : > { %v10876_v4 = vmul.f32 %v9888_v1, %v10865_v55  ;;  %v1130_v1 = vld [vmem:[%s13871_s6 + $0x10] sm:$0xff] }
 0x13b   : > { %v10879_v5 = vmul.f32 %v9890_v3, %v10865_v55  ;;  %1392 = vmatprep.mubr.f32.mxu1 %v1391_v54  ;;  %v1136_v3 = vld [vmem:[%s13872_s8] sm:$0xff] }
 0x13c   : > { %13864 = vst [vmem:[#allocation15_spill] sm:$0xff] %v10876_v4  ;;  %1154 = vrot.lane.b32.xlu1 %v10876_v4, %s10653_s29  ;;  %v13888_v4 = vmov 0.0|0.0  }
 0x13d   : > { %13865 = vst [vmem:[#allocation16_spill] sm:$0xff] %v10879_v5  ;;  %1152 = vrot.lane.b32.xlu0 %v10879_v5, %s10653_s29  ;;  %s13989_s29 = smov 126  }
 0x1aa   : > { %v1151_v6 = vpop.permute.xlu1 %1150 }
 0x1ab   : > { %v1162_v7 = vsel %vm1160_vm3, 0.0, %v1151_v6  ;;  %v1149_v8 = vpop.permute.xlu0 %1148  ;;  %v1139_v6 = vld [vmem:[%s13872_s8 + $0x18] sm:$0xff] }
 0x1ac   : > { %v10885_v9 = vsel %vm1165_vm4, %v1162_v7, 0.0  ;;  %v1161_v10 = vsel %vm1160_vm3, 0.0, %v1149_v8  ;;  %v1138_v7 = vld [vmem:[%s13872_s8 + $0x10] sm:$0xff] }
 0x1ad   : > { %v10889_v11 = vsel %vm1165_vm4, %v1161_v10, 0.0  ;;  %1176 = vrot.lane.b32.xlu1 %v10885_v9, %s10654_s23  ;;  %v1307_v13 = vand.u32 4294901760, %v10885_v9 }
 0x1ae   : > { %v1155_v14 = vpop.permute.xlu1 %1154  ;;  %1174 = vrot.lane.b32.xlu0 %v10889_v11, %s10654_s23  ;;  %v1304_v15 = vand.u32 4294901760, %v10889_v11 }
 0x1af   : > { %v1164_v16 = vsel %vm1160_vm3, 0.0, %v1155_v14  ;;  %v1153_v17 = vpop.permute.xlu0 %1152  ;;  %v10897_v18 = vsub.f32 %v10885_v9, %v1307_v13 }
 0x1b0   : > { %v1169_v19 = vsel %vm1165_vm4, %v1164_v16, 0.0  ;;  %v1163_v20 = vsel %vm1160_vm3, 0.0, %v1153_v17  ;;  %v10901_v21 = vpack.c.bf16 %v1307_v13, %v1304_v15  ;;  %v10904_v22 = vsub.f32 %v10889_v11, %v1304_v15 }
 0x1b1   : > { %v1168_v23 = vsel %vm1165_vm4, %v1163_v20, 0.0  ;;  %1180 = vrot.lane.b32.xlu1 %v1169_v19, %s10654_s23  ;;  %v1313_v24 = vand.u32 4294901760, %v1169_v19  ;;  %v1518_v25 = vand.u32 4294901760, %v10897_v18 }
 0x1b2   : > { %13866 = vst [vmem:[#allocation17_spill] sm:$0xff] %v10901_v21  ;;  %9153 = vmatpush1.bf16.msra.mxu1 %v10901_v21  ;;  %1178 = vrot.lane.b32.xlu0 %v1168_v23, %s10654_s23  ;;  %v1310_v26 = vand.u32 4294901760, %v1168_v23  ;;  %v1511_v27 = vand.u32 4294901760, %v10904_v22  ;;  %s13993_s23 = smov 124  }
 0x1b3   : > { %9154 = vmatprep.subr.bf16.mxu1 %v13679_v50  ;;  %v10913_v29 = vsub.f32 %v1169_v19, %v1313_v24  ;;  %v1519_v30 = vsub.f32 %v10897_v18, %v1518_v25 }
 0x1b4   : > { %v10916_v31 = vpack.c.bf16 %v1313_v24, %v1310_v26  ;;  %v10918_v32 = vsub.f32 %v1168_v23, %v1310_v26  ;;  %v1512_v33 = vsub.f32 %v10904_v22, %v1511_v27  ;;  %v10921_v34 = vpack.c.bf16 %v1518_v25, %v1511_v27 }
 0x1b5   : > { %1188 = vrot.lane.b32.xlu1 %v10885_v9, %s13663_s21  ;;  %v1520_v35 = vand.u32 4294901760, %v1519_v30  ;;  %v1532_v36 = vand.u32 4294901760, %v10913_v29 }
 0x1b6   : > { %13867 = vst [vmem:[#allocation18_spill] sm:$0xff] %v10916_v31  ;;  %13868 = vst [vmem:[#allocation19_spill] sm:$0xff] %v10921_v34  ;;  %1186 = vrot.lane.b32.xlu0 %v10889_v11, %s13663_s21  ;;  %9156 = vmatpush1.bf16.msra.mxu1 %v10916_v31  ;;  %v1513_v37 = vand.u32 4294901760, %v1512_v33  ;;  %v1525_v38 = vand.u32 4294901760, %v10918_v32 }
 0x1b7   : > { %9157 = vmatprep.subr.bf16.mxu1 %v13679_v50  ;;  %v1533_v40 = vsub.f32 %v10913_v29, %v1532_v36 }
 0x1b8   : > { %v10937_v42 = vpack.c.bf16 %v1520_v35, %v1513_v37  ;;  %v1526_v43 = vsub.f32 %v10918_v32, %v1525_v38  ;;  %v10940_v44 = vpack.c.bf16 %v1532_v36, %v1525_v38 }
 0x1b9   : > { %1192 = vrot.lane.b32.xlu1 %v1169_v19, %s13663_s21  ;;  %v1534_v46 = vand.u32 4294901760, %v1533_v40 }
 0x1ba   : > { %13870 = vst [vmem:[#allocation20_spill] sm:$0xff] %v10940_v44  ;;  %1190 = vrot.lane.b32.xlu0 %v1168_v23, %s13663_s21  ;;  %v1527_v48 = vand.u32 4294901760, %v1526_v43  ;;  %s10664_s21 = smov 116  }
 0x1bc   : > { %v10950_v51 = vpack.c.bf16 %v1534_v46, %v1527_v48 }
 0x1bd   : > { %1200 = vrot.lane.b32.xlu1 %v10885_v9, %s10656_s18 }
 0x1be   : > { %1198 = vrot.lane.b32.xlu0 %v10889_v11, %s10656_s18 }
 0x1c1   : > { %1204 = vrot.lane.b32.xlu1 %v1169_v19, %s10656_s18 }
 0x1c2   : > { %1202 = vrot.lane.b32.xlu0 %v1168_v23, %s10656_s18  ;;  %s10659_s18 = smov 122  }
 0x1c5   : > { %1212 = vrot.lane.b32.xlu1 %v10885_v9, %s13665_s19 }
 0x1c6   : > { %1210 = vrot.lane.b32.xlu0 %v10889_v11, %s13665_s19 }
 0x1c9   : > { %1216 = vrot.lane.b32.xlu1 %v1169_v19, %s13665_s19 }
 0x1ca   : > { %1214 = vrot.lane.b32.xlu0 %v1168_v23, %s13665_s19  ;;  %v1222_v23 = vld [vmem:[%s13869_s5] sm:$0xff] }
 0x1cb   : > { %v11019_v35 = vand.u32 4294901760, %v1222_v23 }
 0x1cd   : > { %1265 = vperm.xlu1 %10394, %v1133_v56   ;;  %v11041_v56 = vsub.f32 %v1222_v23, %v11019_v35 }
 0x1ce   : > { %1260 = vperm.xlu0 %10393, %v1132_v57  }
 0x1cf   : > { %13877 = vst [vmem:[#allocation25_spill] sm:$0xff] %v11041_v56 }
 0x1d1   : > { %1275 = vperm.xlu1 %10394, %v1135_v58  }
 0x1d2   : > { %1270 = vperm.xlu0 %10393, %v1134_v59  }
 0x1d5   : > { %1245 = vperm.xlu1 %10394, %v1129_v60   ;;  %v1283_v60 = vsel %vm1278_vm5, %v1225_v45, 0 }
 0x1d6   : > { %1240 = vperm.xlu0 %10393, %v1128_v62  }
 0x1d9   : > { %1255 = vperm.xlu1 %10394, %v1131_v0  }
 0x1da   : > { %1250 = vperm.xlu0 %10393, %v1130_v1  }
 0x1dd   : > { %2448 = vperm.xlu1 %10394, %v1137_v2  }
 0x1de   : > { %2443 = vperm.xlu0 %10393, %v1136_v3  }
 0x1e1   : > { %2458 = vperm.xlu1 %10394, %v1139_v6  }
 0x1e2   : > { %2453 = vperm.xlu0 %10393, %v1138_v7  }
 0x21f   : > { %v1177_v8 = vpop.permute.xlu1 %1176 }
 0x220   : > { %v1319_v9 = vand.u32 4294901760, %v1177_v8  ;;  %v1175_v10 = vpop.permute.xlu0 %1174 }
 0x221   : > { %v1316_v11 = vand.u32 4294901760, %v1175_v10 }
 0x222   : > { %v11000_v13 = vsub.f32 %v1177_v8, %v1319_v9  ;;  %v11060_v8 = vand.u32 4294901760, %v1283_v60 }
 0x223   : > { %v11002_v14 = vpack.c.bf16 %v1319_v9, %v1316_v11  ;;  %v11004_v15 = vsub.f32 %v1175_v10, %v1316_v11  ;;  %v1181_v16 = vpop.permute.xlu1 %1180  ;;  %v1227_v9 = vld [vmem:[%s13869_s5 + $0x28] sm:$0xff] }
 0x224   : > { %v13678_v17 = vand.u32 4294901760, %v11000_v13  ;;  %v1325_v19 = vand.u32 4294901760, %v1181_v16  ;;  %v1179_v20 = vpop.permute.xlu0 %1178 }
 0x225   : > { %13873 = vst [vmem:[#allocation21_spill] sm:$0xff] %v11002_v14  ;;  %v13677_v24 = vand.u32 4294901760, %v11004_v15  ;;  %v1322_v25 = vand.u32 4294901760, %v1179_v20  ;;  %9159 = vmatpush1.bf16.msra.mxu1 %v11002_v14 }
 0x226   : > { %v11012_v26 = vsub.f32 %v1181_v16, %v1325_v19  ;;  %9160 = vmatprep.subr.bf16.mxu1 %v13679_v50 }
 0x227   : > { %v11015_v27 = vpack.c.bf16 %v1325_v19, %v1322_v25  ;;  %v11017_v30 = vsub.f32 %v1179_v20, %v1322_v25  ;;  %v1189_v33 = vpop.permute.xlu1 %1188  ;;  %v11025_v36 = vpack.c.bf16 %v13678_v17, %v13677_v24  ;;  %v13671_v19 = vand.u32 4294901760, %v11041_v56  ;;  %v1224_v20 = vld [vmem:[%s13869_s5 + $0x10] sm:$0xff] }
 0x228   : > { %v13676_v37 = vand.u32 4294901760, %v11012_v26  ;;  %v1331_v38 = vand.u32 4294901760, %v1189_v33  ;;  %v1187_v40 = vpop.permute.xlu0 %1186 }
 0x229   : > { %13874 = vst [vmem:[#allocation22_spill] sm:$0xff] %v11015_v27  ;;  %13875 = vst [vmem:[#allocation23_spill] sm:$0xff] %v11025_v36  ;;  %v13673_v41 = vand.u32 4294901760, %v11017_v30  ;;  %v1328_v43 = vand.u32 4294901760, %v1187_v40  ;;  %9162 = vmatpush1.bf16.msra.mxu1 %v11015_v27 }
 0x22a   : > { %v11033_v46 = vsub.f32 %v1189_v33, %v1331_v38  ;;  %9163 = vmatprep.subr.bf16.mxu1 %v13679_v50 }
 0x22b   : > { %v11036_v48 = vpack.c.bf16 %v1331_v38, %v1328_v43  ;;  %v11038_v53 = vsub.f32 %v1187_v40, %v1328_v43  ;;  %v1193_v54 = vpop.permute.xlu1 %1192  ;;  %v11049_v62 = vpack.c.bf16 %v13676_v37, %v13673_v41  ;;  %v1286_v40 = vsel %vm1278_vm5, %v1227_v9, 0  ;;  %v1229_v43 = vld [vmem:[%s13869_s5 + $0x38] sm:$0xff] }
 0x22c   : > { %v13672_v57 = vand.u32 4294901760, %v11033_v46  ;;  %v1337_v58 = vand.u32 4294901760, %v1193_v54  ;;  %v1191_v59 = vpop.permute.xlu0 %1190  ;;  %v11111_v39 = vand.u32 4294901760, %v1286_v40  ;;  %v1289_v28 = vsel %vm1278_vm5, %v1229_v43, 0  ;;  %v1228_v43 = vld [vmem:[%s13869_s5 + $0x30] sm:$0xff] }
 0x22d   : > { %13876 = vst [vmem:[#allocation24_spill] sm:$0xff] %v11036_v48  ;;  %13878 = vst [vmem:[#allocation26_spill] sm:$0xff] %v11049_v62  ;;  %v13670_v0 = vand.u32 4294901760, %v11038_v53  ;;  %v1334_v1 = vand.u32 4294901760, %v1191_v59  ;;  %9165 = vmatpush1.bf16.msra.mxu1 %v11036_v48  ;;  %v11154_v63 = vand.u32 4294901760, %v1228_v43  ;;  %v1237_v48 = vld [vmem:[%s13869_s5 + $0x78] sm:$0xff] }
 0x22e   : > { %v11053_v2 = vsub.f32 %v1193_v54, %v1337_v58  ;;  %9166 = vmatprep.subr.bf16.mxu1 %v13679_v50  ;;  %v11146_v5 = vsub.f32 %v1286_v40, %v11111_v39 }
 0x22f   : > { %v11056_v3 = vpack.c.bf16 %v1337_v58, %v1334_v1  ;;  %v11058_v6 = vsub.f32 %v1191_v59, %v1334_v1  ;;  %v1201_v7 = vpop.permute.xlu1 %1200  ;;  %v11074_v23 = vpack.c.bf16 %v13672_v57, %v13670_v0  ;;  %v11090_v59 = vsub.f32 %v1283_v60, %v11060_v8 }
 0x230   : > { %v13675_v10 = vand.u32 4294901760, %v11053_v2  ;;  %v1343_v11 = vand.u32 4294901760, %v1201_v7  ;;  %v1199_v16 = vpop.permute.xlu0 %1198  ;;  %v11092_v1 = vand.u32 4294901760, %v1224_v20  ;;  %13887 = vst [vmem:[#allocation35_spill] sm:$0xff] %v11146_v5 }
 0x231   : > { %13879 = vst [vmem:[#allocation27_spill] sm:$0xff] %v11056_v3  ;;  %13880 = vst [vmem:[#allocation28_spill] sm:$0xff] %v11074_v23  ;;  %v13674_v25 = vand.u32 4294901760, %v11058_v6  ;;  %v1340_v33 = vand.u32 4294901760, %v1199_v16  ;;  %9168 = vmatpush1.bf16.msra.mxu1 %v11056_v3 }
 0x232   : > { %v11078_v38 = vsub.f32 %v1201_v7, %v1343_v11  ;;  %9169 = vmatprep.subr.bf16.mxu1 %v13679_v50  ;;  %13882 = vst [vmem:[#allocation30_spill] sm:$0xff] %v11090_v59  ;;  %v1226_v7 = vld [vmem:[%s13869_s5 + $0x20] sm:$0xff]  ;;  %v11125_v37 = vsub.f32 %v1224_v20, %v11092_v1 }
 0x233   : > { %v11085_v45 = vpack.c.bf16 %v1343_v11, %v1340_v33  ;;  %v11087_v54 = vsub.f32 %v1199_v16, %v1340_v33  ;;  %v1205_v58 = vpop.permute.xlu1 %1204  ;;  %v11101_v11 = vsub.f32 %v11041_v56, %v13671_v19  ;;  %v11107_v60 = vpack.c.bf16 %v13675_v10, %v13674_v25 }
 0x234   : > { %v13687_v9 = vand.u32 4294901760, %v11078_v38  ;;  %v1349_v12 = vand.u32 4294901760, %v1205_v58  ;;  %v1203_v52 = vpop.permute.xlu0 %1202  ;;  %v11117_v19 = vand.u32 4294901760, %v1226_v7  ;;  %13885 = vst [vmem:[#allocation33_spill] sm:$0xff] %v11125_v37  ;;  %v13898_v34 = vand.u32 4294901760, %v11125_v37 }
 0x235   : > { %13881 = vst [vmem:[#allocation29_spill] sm:$0xff] %v11085_v45  ;;  %13883 = vst [vmem:[#allocation31_spill] sm:$0xff] %v11107_v60  ;;  %v13686_v16 = vand.u32 4294901760, %v11087_v54  ;;  %v1346_v33 = vand.u32 4294901760, %v1203_v52  ;;  %9171 = vmatpush1.bf16.msra.mxu1 %v11085_v45  ;;  %v1232_v45 = vld [vmem:[%s13869_s5 + $0x50] sm:$0xff] }
 0x236   : > { %v11114_v0 = vsub.f32 %v1205_v58, %v1349_v12  ;;  %9172 = vmatprep.subr.bf16.mxu1 %v13679_v50  ;;  %v1231_v58 = vld [vmem:[%s13869_s5 + $0x48] sm:$0xff]  ;;  %v1397_v50 = vand.u32 4294901760, %v11101_v11  ;;  %v11152_v55 = vsub.f32 %v1226_v7, %v11117_v19  ;;  %v13891_v11 = vand.u32 4294901760, %v11090_v59  ;;  %v1233_v7 = vld [vmem:[%s13869_s5 + $0x58] sm:$0xff] }
 0x237   : > { %v11119_v57 = vpack.c.bf16 %v1349_v12, %v1346_v33  ;;  %v11121_v41 = vsub.f32 %v1203_v52, %v1346_v33  ;;  %v1213_v25 = vpop.permute.xlu1 %1212  ;;  %v11134_v52 = vand.u32 4294901760, %v1289_v28  ;;  %v11140_v20 = vpack.c.bf16 %v13687_v9, %v13686_v16 }
 0x238   : > { %v1355_v12 = vand.u32 4294901760, %v1213_v25  ;;  %v1211_v17 = vpop.permute.xlu0 %1210  ;;  %13889 = vst [vmem:[#allocation36_spill] sm:$0xff] %v11152_v55  ;;  %v1292_v16 = vsel %vm1278_vm5, %v1231_v58, 0  ;;  %v1405_v40 = vsub.f32 %v11090_v59, %v13891_v11  ;;  %v1295_v11 = vsel %vm1278_vm5, %v1233_v7, 0 }
 0x239   : > { %13884 = vst [vmem:[#allocation32_spill] sm:$0xff] %v11119_v57  ;;  %13886 = vst [vmem:[#allocation34_spill] sm:$0xff] %v11140_v20  ;;  %v1352_v10 = vand.u32 4294901760, %v1211_v17  ;;  %9174 = vmatpush1.bf16.msra.mxu1 %v11119_v57  ;;  %v11170_v58 = vsub.f32 %v1289_v28, %v11134_v52  ;;  %v11181_v36 = vand.u32 4294901760, %v1292_v16  ;;  %v1230_v28 = vld [vmem:[%s13869_s5 + $0x40] sm:$0xff] }
 0x23a   : > { %v11148_v24 = vsub.f32 %v1213_v25, %v1355_v12  ;;  %9175 = vmatprep.subr.bf16.mxu1 %v13888_v4  ;;  %v1406_v44 = vand.u32 4294901760, %v1405_v40  ;;  %v11206_v57 = vand.u32 4294901760, %v1230_v28 }
 0x23b   : > { %v11157_v9 = vpack.c.bf16 %v1355_v12, %v1352_v10  ;;  %v11159_v33 = vsub.f32 %v1211_v17, %v1352_v10  ;;  %v1217_v61 = vpop.permute.xlu1 %1216  ;;  %13892 = vst [vmem:[#allocation38_spill] sm:$0xff] %v11170_v58  ;;  %v13893_v17 = vand.u32 4294901760, %v11121_v41  ;;  %v13894_v10 = vand.u32 4294901760, %v11114_v0 }
 0x23c   : > { %v1361_v60 = vand.u32 4294901760, %v1217_v61  ;;  %v1215_v23 = vpop.permute.xlu0 %1214  ;;  %v13910_v40 = vand.u32 4294901760, %v11170_v58 }
 0x23d   : > { %13890 = vst [vmem:[#allocation37_spill] sm:$0xff] %v11157_v9  ;;  %v11176_v12 = vpack.c.bf16 %v13894_v10, %v13893_v17  ;;  %v1358_v25 = vand.u32 4294901760, %v1215_v23  ;;  %9177 = vmatpush1.bf16.msra.mxu1 %v11157_v9  ;;  %v11191_v10 = vsub.f32 %v1228_v43, %v11154_v63  ;;  %v1411_v9 = vsub.f32 %v11125_v37, %v13898_v34 }
 0x23e   : > { %v11186_v20 = vsub.f32 %v1217_v61, %v1361_v60  ;;  %9178 = vmatprep.subr.bf16.mxu1 %v13888_v4  ;;  %v1235_v61 = vld [vmem:[%s13869_s5 + $0x68] sm:$0xff]  ;;  %v13902_v34 = vand.u32 4294901760, %v11146_v5  ;;  %v11220_v17 = vsub.f32 %v1292_v16, %v11181_v36  ;;  %v11222_v43 = vand.u32 4294901760, %v1295_v11 }
 0x23f   : > { %13895 = vst [vmem:[#allocation39_spill] sm:$0xff] %v11176_v12  ;;  %13896 = vst [vmem:[#allocation40_spill] sm:$0xff] %v11191_v10  ;;  %v11194_v12 = vpack.c.bf16 %v1361_v60, %v1358_v25  ;;  %v11196_v62 = vsub.f32 %v1215_v23, %v1358_v25  ;;  %v13899_v60 = vand.u32 4294901760, %v11159_v33  ;;  %v13900_v23 = vand.u32 4294901760, %v11148_v24 }
 0x240   : > { %v1420_v7 = vsub.f32 %v11146_v5, %v13902_v34  ;;  %13903 = vst [vmem:[#allocation43_spill] sm:$0xff] %v11220_v17  ;;  %v13905_v34 = vand.u32 4294901760, %v11000_v13 }
 0x241   : > { %13897 = vst [vmem:[#allocation41_spill] sm:$0xff] %v11194_v12  ;;  %v11212_v25 = vpack.c.bf16 %v13900_v23, %v13899_v60  ;;  %9180 = vmatpush1.bf16.msra.mxu1 %v11194_v12  ;;  %v13904_v60 = vand.u32 4294901760, %v11152_v55  ;;  %v13906_v12 = vand.u32 4294901760, %v11004_v15  ;;  %v13907_v27 = vand.u32 4294901760, %v11196_v62 }
 0x242   : > { %9181 = vmatprep.subr.bf16.mxu1 %v13888_v4  ;;  %v1547_v16 = vsub.f32 %v11000_v13, %v13905_v34  ;;  %v1435_v34 = vsub.f32 %v11170_v58, %v13910_v40  ;;  %v1421_v5 = vand.u32 4294901760, %v1420_v7  ;;  %v13912_v40 = vand.u32 4294901760, %v11191_v10 }
 0x243   : > { %13901 = vst [vmem:[#allocation42_spill] sm:$0xff] %v11212_v25  ;;  %v1426_v23 = vsub.f32 %v11152_v55, %v13904_v60  ;;  %v1298_v25 = vsel %vm1278_vm5, %v1235_v61, 0  ;;  %v1540_v3 = vsub.f32 %v11004_v15, %v13906_v12  ;;  %v13908_v60 = vand.u32 4294901760, %v11186_v20 }
 0x244   : > { %1398 = vmatmul.mubr.f32.vlgmr.msra.gmra.mrb[4].mxu1 %v1397_v50  ;;  %v1412_v61 = vand.u32 4294901760, %v1411_v9  ;;  %v11252_v55 = vsub.f32 %v1230_v28, %v11206_v57  ;;  %v11254_v12 = vand.u32 4294901760, %v1232_v45  ;;  %v11261_v50 = vand.u32 4294901760, %v1298_v25  ;;  %v1234_v9 = vld [vmem:[%s13869_s5 + $0x60] sm:$0xff] }
 0x245   : > { %v11246_v14 = vpack.c.bf16 %v13908_v60, %v13907_v27  ;;  %9183 = vmatpush1.bf16.msra.mxu1 %v10937_v42  ;;  %1407 = vmatprep.mubr.f32.mxu1 %v1406_v44  ;;  %v11259_v27 = vsub.f32 %v1295_v11, %v11222_v43  ;;  %v1427_v28 = vand.u32 4294901760, %v1426_v23  ;;  %v1441_v42 = vsub.f32 %v11191_v10, %v13912_v40 }
 0x246   : > { %9184 = vmatprep.subr.bf16.mxu1 %v13888_v4  ;;  %v1301_v44 = vsel %vm1278_vm5, %v1237_v48, 0  ;;  %v1548_v7 = vand.u32 4294901760, %v1547_v16  ;;  %v1541_v60 = vand.u32 4294901760, %v1540_v3  ;;  %v13913_v11 = vand.u32 4294901760, %v11012_v26 }
 0x247   : > { %13909 = vst [vmem:[#allocation44_spill] sm:$0xff] %v11246_v14  ;;  %13911 = vst [vmem:[#allocation45_spill] sm:$0xff] %v11259_v27  ;;  %v13914_v14 = vand.u32 4294901760, %v11017_v30  ;;  %v1436_v37 = vand.u32 4294901760, %v1435_v34  ;;  %v11279_v59 = vsub.f32 %v1232_v45, %v11254_v12  ;;  %v11281_v40 = vand.u32 4294901760, %v1234_v9  ;;  %v1236_v45 = vld [vmem:[%s13869_s5 + $0x70] sm:$0xff] }
 0x248   : > { %v1561_v31 = vsub.f32 %v11012_v26, %v13913_v11  ;;  %1413 = vmatmul.mubr.f32.gmra.mrb[6].mxu1 %v1412_v61  ;;  %v13915_v48 = vand.u32 4294901760, %v11220_v17  ;;  %v11291_v61 = vand.u32 4294901760, %v1301_v44  ;;  %v13916_v34 = vand.u32 4294901760, %v11033_v46 }
 0x249   : > { %v1554_v58 = vsub.f32 %v11017_v30, %v13914_v14  ;;  %9186 = vmatpush1.bf16.msra.mxu1 %v10950_v51  ;;  %1422 = vmatprep.mubr.f32.mxu1 %v1421_v5  ;;  %v11289_v14 = vsub.f32 %v1298_v25, %v11261_v50  ;;  %v13917_v5 = vand.u32 4294901760, %v11038_v53  ;;  %v9188_v25 = vpack.c.bf16 %v1548_v7, %v1541_v60 }
 0x24a   : > { %v1450_v3 = vsub.f32 %v11220_v17, %v13915_v48  ;;  %v1575_v51 = vsub.f32 %v11033_v46, %v13916_v34  ;;  %9187 = vmatprep.subr.bf16.mxu1 %v13888_v4  ;;  %v1562_v48 = vand.u32 4294901760, %v1561_v31  ;;  %v1442_v23 = vand.u32 4294901760, %v1441_v42 }
 0x24b   : > { %v1568_v11 = vsub.f32 %v11038_v53, %v13917_v5  ;;  %v1555_v16 = vand.u32 4294901760, %v1554_v58  ;;  %v13918_v17 = vand.u32 4294901760, %v11252_v55  ;;  %v13727_v21 = vand.u32 4294901760, %v11279_v59 }
 0x24c   : > { %1428 = vmatmul.mubr.f32.gmra.mrb[8].mxu1 %v1427_v28  ;;  %v11308_v56 = vsub.f32 %v1234_v9, %v11281_v40  ;;  %v11310_v34 = vand.u32 4294901760, %v1236_v45  ;;  %v1451_v5 = vand.u32 4294901760, %v1450_v3  ;;  %v13919_v31 = vand.u32 4294901760, %v11259_v27 }
 0x24d   : > { %v1456_v10 = vsub.f32 %v11252_v55, %v13918_v17  ;;  %9189 = vmatpush1.bf16.msra.mxu1 %v9188_v25  ;;  %1437 = vmatprep.mubr.f32.mxu1 %v1436_v37  ;;  %v11317_v42 = vsub.f32 %v1301_v44, %v11291_v61  ;;  %v1576_v17 = vand.u32 4294901760, %v1575_v51  ;;  %v1569_v7 = vand.u32 4294901760, %v1568_v11 }
 0x24e   : > { %v1465_v58 = vsub.f32 %v11259_v27, %v13919_v31  ;;  %9190 = vmatprep.subr.bf16.mxu1 %v13888_v4  ;;  %v13921_v9 = vand.u32 4294901760, %v11053_v2  ;;  %v13922_v37 = vand.u32 4294901760, %v11058_v6  ;;  %v9191_v25 = vpack.c.bf16 %v1562_v48, %v1555_v16 }
 0x24f   : > { %13920 = vst [vmem:[#allocation46_spill] sm:$0xff] %v11317_v42  ;;  %v1457_v31 = vand.u32 4294901760, %v1456_v10  ;;  %v1471_v44 = vsub.f32 %v11279_v59, %v13727_v21  ;;  %v13728_v51 = vand.u32 4294901760, %v11308_v56  ;;  %v11331_v11 = vsub.f32 %v1236_v45, %v11310_v34 }
 0x250   : > { %v1589_v60 = vsub.f32 %v11053_v2, %v13921_v9  ;;  %v1582_v3 = vsub.f32 %v11058_v6, %v13922_v37  ;;  %1443 = vmatmul.mubr.f32.gmra.mrb[10].mxu1 %v1442_v23  ;;  %v1466_v28 = vand.u32 4294901760, %v1465_v58  ;;  %v13923_v9 = vand.u32 4294901760, %v11289_v14 }
 0x251   : > { %9192 = vmatpush1.bf16.msra.mxu1 %v9191_v25  ;;  %1452 = vmatprep.mubr.f32.mxu1 %v1451_v5  ;;  %v13729_v16 = vand.u32 4294901760, %v11317_v42  ;;  %v9194_v10 = vpack.c.bf16 %v1576_v17, %v1569_v7  ;;  %v13924_v37 = vand.u32 4294901760, %v11078_v38  ;;  %v13925_v45 = vand.u32 4294901760, %v11087_v54 }
 0x252   : > { %v1480_v27 = vsub.f32 %v11289_v14, %v13923_v9  ;;  %9193 = vmatprep.subr.bf16.mxu1 %v13888_v4  ;;  %v1590_v23 = vand.u32 4294901760, %v1589_v60  ;;  %v1583_v48 = vand.u32 4294901760, %v1582_v3  ;;  %v1472_v58 = vand.u32 4294901760, %v1471_v44 }
 0x253   : > { %v1603_v21 = vsub.f32 %v11078_v38, %v13924_v37  ;;  %v1596_v5 = vsub.f32 %v11087_v54, %v13925_v45  ;;  %v1486_v25 = vsub.f32 %v11308_v56, %v13728_v51  ;;  %v1500_v9 = vand.u32 4294901760, %v11331_v11 }
 0x254   : > { %1458 = vmatmul.mubr.f32.gmra.mrb[12].mxu1 %v1457_v31  ;;  %v1481_v17 = vand.u32 4294901760, %v1480_v27  ;;  %v1495_v7 = vsub.f32 %v11317_v42, %v13729_v16  ;;  %v13926_v60 = vand.u32 4294901760, %v11114_v0  ;;  %v13927_v31 = vand.u32 4294901760, %v11121_v41 }
 0x255   : > { %9195 = vmatpush1.bf16.msra.mxu1 %v9194_v10  ;;  %1467 = vmatprep.mubr.f32.mxu1 %v1466_v28  ;;  %v1604_v37 = vand.u32 4294901760, %v1603_v21  ;;  %v1597_v45 = vand.u32 4294901760, %v1596_v5  ;;  %v9197_v51 = vpack.c.bf16 %v1590_v23, %v1583_v48  ;;  %v1487_v28 = vand.u32 4294901760, %v1486_v25 }
 0x256   : > { %v1617_v3 = vsub.f32 %v11114_v0, %v13926_v60  ;;  %v1610_v44 = vsub.f32 %v11121_v41, %v13927_v31  ;;  %9196 = vmatprep.subr.bf16.mxu1 %v13888_v4  ;;  %v1501_v27 = vsub.f32 %v11331_v11, %v1500_v9  ;;  %v1496_v10 = vand.u32 4294901760, %v1495_v7 }
 0x257   : > { %v13928_v31 = vand.u32 4294901760, %v11148_v24  ;;  %v13929_v21 = vand.u32 4294901760, %v11159_v33  ;;  %v9200_v48 = vpack.c.bf16 %v1604_v37, %v1597_v45 }
 0x258   : > { %1473 = vmatmul.mubr.f32.gmra.mrb[14].mxu1 %v1472_v58  ;;  %v1618_v16 = vand.u32 4294901760, %v1617_v3  ;;  %v1611_v60 = vand.u32 4294901760, %v1610_v44  ;;  %v1502_v5 = vand.u32 4294901760, %v1501_v27  ;;  %v13931_v3 = vand.u32 4294901760, %v11196_v62 }
 0x259   : > { %9198 = vmatpush1.bf16.msra.mxu1 %v9197_v51  ;;  %1482 = vmatprep.mubr.f32.mxu1 %v1481_v17  ;;  %v1631_v42 = vsub.f32 %v11148_v24, %v13928_v31  ;;  %v1624_v23 = vsub.f32 %v11159_v33, %v13929_v21  ;;  %v13930_v17 = vand.u32 4294901760, %v11186_v20  ;;  %v13933_v27 = vpack.c.bf16 %v10913_v29, %v10918_v32  ;;  %v13948_v31 = vld [vmem:[#allocation27_spill] sm:$0xff]  ;;  %v13949_v21 = vld [vmem:[#allocation29_spill] sm:$0xff] }
 0x25a   : > { %9199 = vmatprep.subr.bf16.mxu1 %v13888_v4  ;;  %v9203_v51 = vpack.c.bf16 %v1618_v16, %v1611_v60  ;;  %v1638_v44 = vsub.f32 %v11196_v62, %v13931_v3  ;;  %v13932_v16 = vpack.c.bf16 %v10897_v18, %v10904_v22  ;;  %v9221_v18 = vpack.c.bf16 %v11012_v26, %v11017_v30  ;;  %v13934_v30 = vld [vmem:[#allocation25_spill] sm:$0xff]  ;;  %v13959_v3 = vld [vmem:[#allocation20_spill] sm:$0xff] }
 0x25b   : > { %v1632_v58 = vand.u32 4294901760, %v1631_v42  ;;  %v1625_v25 = vand.u32 4294901760, %v1624_v23  ;;  %v1645_v7 = vsub.f32 %v11186_v20, %v13930_v17  ;;  %v9224_v22 = vpack.c.bf16 %v11033_v46, %v11038_v53  ;;  %v13936_v46 = vld [vmem:[#allocation30_spill] sm:$0xff]  ;;  %v13937_v53 = vld [vmem:[#allocation33_spill] sm:$0xff]  ;;  %v13956_v17 = vld [vmem:[#allocation19_spill] sm:$0xff] }
 0x25c   : > { %1488 = vmatmul.mubr.f32.gmra.mrb[16].mxu1 %v1487_v28  ;;  %v1639_v45 = vand.u32 4294901760, %v1638_v44  ;;  %v9227_v29 = vpack.c.bf16 %v11053_v2, %v11058_v6  ;;  %v9230_v32 = vpack.c.bf16 %v11078_v38, %v11087_v54  ;;  %v9239_v26 = vpack.c.bf16 %v11186_v20, %v11196_v62  ;;  %v13940_v62 = vld [vmem:[#allocation36_spill] sm:$0xff]  ;;  %v13941_v2 = vld [vmem:[#allocation21_spill] sm:$0xff]  ;;  %v13942_v6 = vld [vmem:[#allocation38_spill] sm:$0xff] }
 0x25d   : > { %9201 = vmatpush1.bf16.msra.mxu1 %v9200_v48  ;;  %1497 = vmatprep.mubr.f32.mxu1 %v1496_v10  ;;  %v1646_v37 = vand.u32 4294901760, %v1645_v7  ;;  %v9206_v28 = vpack.c.bf16 %v1632_v58, %v1625_v25  ;;  %v9218_v10 = vpack.c.bf16 %v11000_v13, %v11004_v15  ;;  %v9233_v13 = vpack.c.bf16 %v11114_v0, %v11121_v41  ;;  %v13935_v41 = vld [vmem:[#allocation17_spill] sm:$0xff]  ;;  %v13939_v0 = vld [vmem:[#allocation35_spill] sm:$0xff]  ;;  %v13943_v38 = vld [vmem:[#allocation40_spill] sm:$0xff] }
 0x25e   : > { %9202 = vmatprep.subr.bf16.mxu1 %v13888_v4  ;;  %v9236_v15 = vpack.c.bf16 %v11148_v24, %v11159_v33  ;;  %v13938_v24 = vld [vmem:[#allocation18_spill] sm:$0xff]  ;;  %v13945_v20 = vld [vmem:[#allocation43_spill] sm:$0xff]  ;;  %v13946_v33 = vld [vmem:[#allocation24_spill] sm:$0xff]  ;;  %v13955_v25 = vand.u32 4294901760, %v13934_v30  ;;  %v13957_v7 = vand.u32 4294901760, %v13936_v46  ;;  %v13960_v44 = vand.u32 4294901760, %v13939_v0 }
 0x25f   : > { %v9209_v42 = vpack.c.bf16 %v1646_v37, %v1639_v45  ;;  %v13944_v54 = vld [vmem:[#allocation22_spill] sm:$0xff]  ;;  %v13947_v60 = vld [vmem:[#allocation45_spill] sm:$0xff]  ;;  %v13951_v48 = vld [vmem:[#allocation32_spill] sm:$0xff]  ;;  %v13961_v37 = vand.u32 4294901760, %v13940_v62 }
 0x260   : > { %1503 = vmatmul.mubr.f32.gmra.mrb[18].mxu1 %v1502_v5  ;;  %v13950_v23 = vld [vmem:[#allocation46_spill] sm:$0xff]  ;;  %v13952_v5 = vand.u32 4294901760, %v10948_v49  ;;  %v13954_v58 = vld [vmem:[#allocation41_spill] sm:$0xff]  ;;  %v13962_v45 = vld [vmem:[#allocation23_spill] sm:$0xff] }
 0x261   : > { %9204 = vmatpush1.bf16.msra.mxu1 %v9203_v51  ;;  %1673 = vmatprep.mubr.f32.mxu1 %v10945_v47  ;;  %v13953_v51 = vld [vmem:[#allocation37_spill] sm:$0xff] }
 0x262   : > { %9205 = vmatprep.subr.bf16.mxu1 %v13888_v4 }
 0x265   : > { %9207 = vmatpush1.bf16.msra.mxu1 %v9206_v28  ;;  %v13963_v28 = vand.u32 4294901760, %v13942_v6 }
 0x266   : > { %9208 = vmatprep.subr.bf16.mxu1 %v13888_v4 }
 0x269   : > { %9210 = vmatpush1.bf16.msra.mxu1 %v9209_v42  ;;  %v13964_v42 = vand.u32 4294901760, %v13943_v38 }
 0x26a   : > { %9211 = vmatprep.subr.bf16.mxu1 %v13888_v4 }
 0x26c   : > { %1675 = vmatmul.mubr.f32.vlgmr.msra.gmra.mrb[4].mxu1 %v11019_v35 }
 0x26d   : > { %9213 = vmatpush1.bf16.msra.mxu1 %v13932_v16  ;;  %1680 = vmatprep.mubr.f32.mxu1 %v11060_v8  ;;  %v13965_v16 = vld [vmem:[#allocation26_spill] sm:$0xff] }
 0x26e   : > { %9214 = vmatprep.subr.bf16.mxu1 %v13888_v4 }
 0x270   : > { %1682 = vmatmul.mubr.f32.gmra.mrb[6].mxu1 %v11092_v1 }
 0x271   : > { %9216 = vmatpush1.bf16.msra.mxu1 %v13933_v27  ;;  %1687 = vmatprep.mubr.f32.mxu1 %v11111_v39  ;;  %v13966_v27 = vand.u32 4294901760, %v13945_v20 }
 0x272   : > { %9217 = vmatprep.subr.bf16.mxu1 %v13888_v4 }
 0x274   : > { %1689 = vmatmul.mubr.f32.gmra.mrb[8].mxu1 %v11117_v19 }
 0x275   : > { %9219 = vmatpush1.bf16.msra.mxu1 %v9218_v10  ;;  %1694 = vmatprep.mubr.f32.mxu1 %v11134_v52  ;;  %v13967_v10 = vand.u32 4294901760, %v11252_v55 }
 0x276   : > { %9220 = vmatprep.subr.bf16.mxu1 %v13888_v4 }
 0x278   : > { %1696 = vmatmul.mubr.f32.gmra.mrb[10].mxu1 %v11154_v63 }
 0x279   : > { %9222 = vmatpush1.bf16.msra.mxu1 %v9221_v18  ;;  %1701 = vmatprep.mubr.f32.mxu1 %v11181_v36  ;;  %v13968_v18 = vld [vmem:[#allocation28_spill] sm:$0xff] }
 0x27a   : > { %9223 = vmatprep.subr.bf16.mxu1 %v13888_v4 }
 0x27c   : > { %1703 = vmatmul.mubr.f32.gmra.mrb[12].mxu1 %v11206_v57 }
 0x27d   : > { %9225 = vmatpush1.bf16.msra.mxu1 %v9224_v22  ;;  %1708 = vmatprep.mubr.f32.mxu1 %v11222_v43  ;;  %v13969_v22 = vand.u32 4294901760, %v13947_v60 }
 0x27e   : > { %9226 = vmatprep.subr.bf16.mxu1 %v13888_v4 }
 0x280   : > { %1710 = vmatmul.mubr.f32.gmra.mrb[14].mxu1 %v11254_v12 }
 0x281   : > { %9228 = vmatpush1.bf16.msra.mxu1 %v9227_v29  ;;  %1715 = vmatprep.mubr.f32.mxu1 %v11261_v50  ;;  %v13970_v29 = vand.u32 4294901760, %v11279_v59 }
 0x282   : > { %9229 = vmatprep.subr.bf16.mxu1 %v13888_v4 }
 0x284   : > { %1717 = vmatmul.mubr.f32.gmra.mrb[16].mxu1 %v11281_v40 }
 0x285   : > { %9231 = vmatpush1.bf16.msra.mxu1 %v9230_v32  ;;  %1722 = vmatprep.mubr.f32.mxu1 %v11291_v61  ;;  %v13971_v32 = vld [vmem:[#allocation31_spill] sm:$0xff] }
 0x286   : > { %9232 = vmatprep.subr.bf16.mxu1 %v13888_v4 }
 0x288   : > { %1724 = vmatmul.mubr.f32.gmra.mrb[18].mxu1 %v11310_v34 }
 0x289   : > { %9234 = vmatpush1.bf16.msra.mxu1 %v9233_v13  ;;  %1835 = vmatprep.mubr.f32.mxu1 %v10948_v49  ;;  %v13958_v49 = vand.u32 4294901760, %v13937_v53  ;;  %v13972_v13 = vand.u32 4294901760, %v11289_v14 }
 0x28a   : > { %9235 = vmatprep.subr.bf16.mxu1 %v13888_v4 }
 0x28d   : > { %9237 = vmatpush1.bf16.msra.mxu1 %v9236_v15  ;;  %v13974_v15 = vld [vmem:[#allocation34_spill] sm:$0xff] }
 0x28e   : > { %9238 = vmatprep.subr.bf16.mxu1 %v13888_v4 }
 0x291   : > { %9240 = vmatpush1.bf16.msra.mxu1 %v9239_v26  ;;  %v13975_v26 = vand.u32 4294901760, %v13950_v23 }
 0x292   : > { %9241 = vmatprep.subr.bf16.mxu1 %v13888_v4 }
 0x294   : > { %1838 = vmatmul.mubr.f32.vlgmr.msra.gmra.mrb[4].mxu1 %v13934_v30 }
 0x295   : > { %9243 = vmatpush1.bf16.msra.mxu1 %v13935_v41  ;;  %1844 = vmatprep.mubr.f32.mxu1 %v13936_v46  ;;  %v1266_v46 = vpop.permute.xlu1 %1265 }
 0x296   : > { %9244 = vmatprep.subr.bf16.mxu1 %v13888_v4 }
 0x298   : > { %1847 = vmatmul.mubr.f32.gmra.mrb[6].mxu1 %v13937_v53 }
 0x299   : > { %9246 = vmatpush1.bf16.msra.mxu1 %v13938_v24  ;;  %1853 = vmatprep.mubr.f32.mxu1 %v13939_v0 }
 0x29a   : > { %9247 = vmatprep.subr.bf16.mxu1 %v13888_v4 }
 0x29c   : > { %1856 = vmatmul.mubr.f32.gmra.mrb[8].mxu1 %v13940_v62 }
 0x29d   : > { %9249 = vmatpush1.bf16.msra.mxu1 %v13941_v2  ;;  %1862 = vmatprep.mubr.f32.mxu1 %v13942_v6 }
 0x29e   : > { %9250 = vmatprep.subr.bf16.mxu1 %v13888_v4 }
 0x2a0   : > { %1865 = vmatmul.mubr.f32.gmra.mrb[10].mxu1 %v13943_v38 }
 0x2a1   : > { %9252 = vmatpush1.bf16.msra.mxu1 %v13944_v54  ;;  %1871 = vmatprep.mubr.f32.mxu1 %v13945_v20  ;;  %v1276_v20 = vpop.permute.xlu1 %1275 }
 0x2a2   : > { %9253 = vmatprep.subr.bf16.mxu1 %v13888_v4 }
 0x2a4   : > { %1874 = vmatmul.mubr.f32.gmra.mrb[12].mxu1 %v11252_v55  ;;  %v13973_v55 = vand.u32 4294901760, %v11308_v56 }
 0x2a5   : > { %9255 = vmatpush1.bf16.msra.mxu1 %v13946_v33  ;;  %1880 = vmatprep.mubr.f32.mxu1 %v13947_v60 }
 0x2a6   : > { %9256 = vmatprep.subr.bf16.mxu1 %v13888_v4 }
 0x2a8   : > { %1883 = vmatmul.mubr.f32.gmra.mrb[14].mxu1 %v11279_v59  ;;  %v13976_v59 = vld [vmem:[#allocation39_spill] sm:$0xff] }
 0x2a9   : > { %9258 = vmatpush1.bf16.msra.mxu1 %v13948_v31  ;;  %1889 = vmatprep.mubr.f32.mxu1 %v11289_v14  ;;  %v13977_v14 = vld [vmem:[#allocation42_spill] sm:$0xff] }
 0x2aa   : > { %9259 = vmatprep.subr.bf16.mxu1 %v13888_v4 }
 0x2ac   : > { %1892 = vmatmul.mubr.f32.gmra.mrb[16].mxu1 %v11308_v56  ;;  %v13978_v56 = vld [vmem:[#allocation44_spill] sm:$0xff] }
 0x2ad   : > { %9261 = vmatpush1.bf16.msra.mxu1 %v13949_v21  ;;  %1898 = vmatprep.mubr.f32.mxu1 %v13950_v23 }
 0x2ae   : > { %9262 = vmatprep.subr.bf16.mxu1 %v13888_v4 }
 0x2b0   : > { %1901 = vmatmul.mubr.f32.gmra.mrb[18].mxu1 %v11331_v11 }
 0x2b1   : > { %9264 = vmatpush1.bf16.msra.mxu1 %v13951_v48  ;;  %1993 = vmatprep.mubr.f32.mxu1 %v13952_v5 }
 0x2b2   : > { %9265 = vmatprep.subr.bf16.mxu1 %v13888_v4 }
 0x2b5   : > { %9267 = vmatpush1.bf16.msra.mxu1 %v13953_v51 }
 0x2b6   : > { %9268 = vmatprep.subr.bf16.mxu1 %v13888_v4 }
 0x2b9   : > { %9270 = vmatpush1.bf16.msra.mxu1 %v13954_v58 }
 0x2ba   : > { %9271 = vmatprep.subr.bf16.mxu1 %v13888_v4 }
 0x2bc   : > { %1997 = vmatmul.mubr.f32.vlgmr.msra.gmra.mrb[4].mxu1 %v13955_v25 }
 0x2bd   : > { %9273 = vmatpush1.bf16.msra.mxu1 %v13956_v17  ;;  %2004 = vmatprep.mubr.f32.mxu1 %v13957_v7 }
 0x2be   : > { %9274 = vmatprep.subr.bf16.mxu1 %v13888_v4 }
 0x2c0   : > { %2008 = vmatmul.mubr.f32.gmra.mrb[6].mxu1 %v13958_v49 }
 0x2c1   : > { %9276 = vmatpush1.bf16.msra.mxu1 %v13959_v3  ;;  %2015 = vmatprep.mubr.f32.mxu1 %v13960_v44 }
 0x2c2   : > { %9277 = vmatprep.subr.bf16.mxu1 %v13888_v4 }
 0x2c4   : > { %2019 = vmatmul.mubr.f32.gmra.mrb[8].mxu1 %v13961_v37 }
 0x2c5   : > { %9279 = vmatpush1.bf16.msra.mxu1 %v13962_v45  ;;  %2026 = vmatprep.mubr.f32.mxu1 %v13963_v28 }
 0x2c6   : > { %9280 = vmatprep.subr.bf16.mxu1 %v13888_v4 }
 0x2c8   : > { %2030 = vmatmul.mubr.f32.gmra.mrb[10].mxu1 %v13964_v42  ;;  %v2434_v42 = vld [vmem:[%s13979_s7 + $0x8] sm:$0xff] }
 0x2c9   : > { %9282 = vmatpush1.bf16.msra.mxu1 %v13965_v16  ;;  %2037 = vmatprep.mubr.f32.mxu1 %v13966_v27 }
 0x2ca   : > { %9283 = vmatprep.subr.bf16.mxu1 %v13888_v4 }
 0x2cc   : > { %2041 = vmatmul.mubr.f32.gmra.mrb[12].mxu1 %v13967_v10  ;;  %v2435_v10 = vld [vmem:[%s13979_s7 + $0x10] sm:$0xff] }
 0x2cd   : > { %9285 = vmatpush1.bf16.msra.mxu1 %v13968_v18  ;;  %2048 = vmatprep.mubr.f32.mxu1 %v13969_v22  ;;  %v2485_v22 = vsel %vm1278_vm5, %v2434_v42, 0 }
 0x2ce   : > { %9286 = vmatprep.subr.bf16.mxu1 %v13888_v4 }
 0x2d0   : > { %2052 = vmatmul.mubr.f32.gmra.mrb[14].mxu1 %v13970_v29 }
 0x2d1   : > { %9288 = vmatpush1.bf16.msra.mxu1 %v13971_v32  ;;  %2059 = vmatprep.mubr.f32.mxu1 %v13972_v13  ;;  %v2436_v13 = vld [vmem:[%s13979_s7 + $0x18] sm:$0xff] }
 0x2d2   : > { %9289 = vmatprep.subr.bf16.mxu1 %v13888_v4 }
 0x2d4   : > { %2063 = vmatmul.mubr.f32.gmra.mrb[16].mxu1 %v13973_v55 }
 0x2d5   : > { %9291 = vmatpush1.bf16.msra.mxu1 %v13974_v15  ;;  %2070 = vmatprep.mubr.f32.mxu1 %v13975_v26  ;;  %v2488_v15 = vsel %vm1278_vm5, %v2435_v10, 0  ;;  %v11590_v26 = vand.u32 4294901760, %v2485_v22 }
 0x2d6   : > { %9292 = vmatprep.subr.bf16.mxu1 %v13888_v4 }
 0x2d8   : > { %2074 = vmatmul.mubr.f32.gmra.mrb[18].mxu1 %v1500_v9 }
 0x2d9   : > { %9294 = vmatpush1.bf16.msra.mxu1 %v13976_v59  ;;  %2204 = vmatprep.mubr.f32.mxu1 %v10945_v47  ;;  %v2437_v59 = vld [vmem:[%s13979_s7 + $0x20] sm:$0xff] }
 0x2da   : > { %9295 = vmatprep.subr.bf16.mxu1 %v13888_v4 }
 0x2dd   : > { %9297 = vmatpush1.bf16.msra.mxu1 %v13977_v14 }
 0x2de   : > { %9298 = vmatprep.subr.bf16.mxu1 %v13888_v4 }
 0x2e1   : > { %9300 = vmatpush1.bf16.msra.mxu1 %v13978_v56 }
 0x2e2   : > { %9301 = vmatprep.subr.bf16.mxu1 %v13888_v4 }
 0x2e4   : > { %2206 = vmatmul.mubr.f32.vlgmr.msra.gmra.mrb[4].mxu1 %v11019_v35 }
 0x2e5   : > { %9303 = vmatpush1.bf16.msra.mxu1 %v13935_v41  ;;  %2211 = vmatprep.mubr.f32.mxu1 %v11060_v8 }
 0x2e6   : > { %9304 = vmatprep.subr.bf16.mxu1 %v13888_v4 }
 0x2e8   : > { %2213 = vmatmul.mubr.f32.gmra.mrb[6].mxu1 %v11092_v1 }
 0x2e9   : > { %9306 = vmatpush1.bf16.msra.mxu1 %v13938_v24  ;;  %2218 = vmatprep.mubr.f32.mxu1 %v11111_v39 }
 0x2ea   : > { %9307 = vmatprep.subr.bf16.mxu1 %v13888_v4 }
 0x2ec   : > { %2220 = vmatmul.mubr.f32.gmra.mrb[8].mxu1 %v11117_v19 }
 0x2ed   : > { %9309 = vmatpush1.bf16.msra.mxu1 %v13941_v2  ;;  %2225 = vmatprep.mubr.f32.mxu1 %v11134_v52 }
 0x2ee   : > { %9310 = vmatprep.subr.bf16.mxu1 %v13888_v4 }
 0x2f0   : > { %2227 = vmatmul.mubr.f32.gmra.mrb[10].mxu1 %v11154_v63 }
 0x2f1   : > { %9312 = vmatpush1.bf16.msra.mxu1 %v13944_v54  ;;  %2232 = vmatprep.mubr.f32.mxu1 %v11181_v36 }
 0x2f2   : > { %9313 = vmatprep.subr.bf16.mxu1 %v13888_v4 }
 0x2f4   : > { %2234 = vmatmul.mubr.f32.gmra.mrb[12].mxu1 %v11206_v57 }
 0x2f5   : > { %9315 = vmatpush1.bf16.msra.mxu1 %v13946_v33  ;;  %2239 = vmatprep.mubr.f32.mxu1 %v11222_v43 }
 0x2f6   : > { %9316 = vmatprep.subr.bf16.mxu1 %v13888_v4 }
 0x2f8   : > { %2241 = vmatmul.mubr.f32.gmra.mrb[14].mxu1 %v11254_v12 }
 0x2f9   : > { %9318 = vmatpush1.bf16.msra.mxu1 %v13948_v31  ;;  %2246 = vmatprep.mubr.f32.mxu1 %v11261_v50 }
 0x2fa   : > { %9319 = vmatprep.subr.bf16.mxu1 %v13888_v4 }
 0x2fc   : > { %2248 = vmatmul.mubr.f32.gmra.mrb[16].mxu1 %v11281_v40 }
 0x2fd   : > { %9321 = vmatpush1.bf16.msra.mxu1 %v13949_v21  ;;  %2253 = vmatprep.mubr.f32.mxu1 %v11291_v61 }
 0x2fe   : > { %9322 = vmatprep.subr.bf16.mxu1 %v13888_v4 }
 0x300   : > { %2255 = vmatmul.mubr.f32.gmra.mrb[18].mxu1 %v11310_v34 }
 0x301   : > { %9324 = vmatpush1.bf16.msra.mxu1 %v13951_v48  ;;  %2345 = vmatprep.mubr.f32.mxu1 %v10945_v47 }
 0x302   : > { %9325 = vmatprep.subr.bf16.mxu1 %v13888_v4 }
 0x305   : > { %9327 = vmatpush1.bf16.msra.mxu1 %v13953_v51 }
 0x306   : > { %9328 = vmatprep.subr.bf16.mxu1 %v13888_v4 }
 0x309   : > { %9330 = vmatpush1.bf16.msra.mxu1 %v13954_v58  ;;  %v1246_v58 = vpop.permute.xlu1 %1245 }
 0x30a   : > { %9607 = vmatprep.subr.bf16.mxu1 %v13888_v4 }
 0x30c   : > { %2347 = vmatmul.mubr.f32.vlgmr.msra.gmra.mrb[4].mxu1 %v11019_v35 }
 0x30d   : > { %2352 = vmatprep.mubr.f32.mxu1 %v11060_v8  ;;  %v1256_v45 = vpop.permute.xlu1 %1255 }
 0x310   : > { %2354 = vmatmul.mubr.f32.gmra.mrb[6].mxu1 %v11092_v1 }
 0x311   : > { %2359 = vmatprep.mubr.f32.mxu1 %v11111_v39 }
 0x314   : > { %2361 = vmatmul.mubr.f32.gmra.mrb[8].mxu1 %v11117_v19 }
 0x315   : > { %2366 = vmatprep.mubr.f32.mxu1 %v11134_v52 }
 0x318   : > { %2368 = vmatmul.mubr.f32.gmra.mrb[10].mxu1 %v11154_v63  ;;  %v2433_v63 = vld [vmem:[%s13979_s7] sm:$0xff] }
 0x319   : > { %2373 = vmatprep.mubr.f32.mxu1 %v11181_v36  ;;  %v2482_v39 = vsel %vm1278_vm5, %v2433_v63, 0  ;;  %v2491_v63 = vsel %vm1278_vm5, %v2436_v13, 0 }
 0x31a   : > { %v11570_v47 = vand.u32 4294901760, %v2482_v39 }
 0x31c   : > { %2375 = vmatmul.mubr.f32.gmra.mrb[12].mxu1 %v11206_v57  ;;  %v11573_v35 = vsub.f32 %v2482_v39, %v11570_v47 }
 0x31d   : > { %2380 = vmatprep.mubr.f32.mxu1 %v11222_v43 }
 0x31e   : > { %v2576_v36 = vand.u32 4294901760, %v11573_v35 }
 0x320   : > { %2382 = vmatmul.mubr.f32.gmra.mrb[14].mxu1 %v11254_v12  ;;  %v2577_v57 = vsub.f32 %v11573_v35, %v2576_v36 }
 0x321   : > { %2387 = vmatprep.mubr.f32.mxu1 %v11261_v50 }
 0x322   : > { %v2578_v8 = vand.u32 4294901760, %v2577_v57  ;;  %v11596_v57 = vand.u32 4294901760, %v2488_v15 }
 0x324   : > { %2389 = vmatmul.mubr.f32.gmra.mrb[16].mxu1 %v11281_v40  ;;  %8733 = vmatprep.mubr.f32.mxu0 %v2578_v8  ;;  %v2438_v8 = vld [vmem:[%s13979_s7 + $0x28] sm:$0xff] }
 0x325   : > { %2394 = vmatprep.mubr.f32.mxu1 %v11291_v61 }
 0x328   : > { %2396 = vmatmul.mubr.f32.gmra.mrb[18].mxu1 %v11310_v34  ;;  %v1261_v34 = vpop.permute.xlu0 %1260 }
 0x32c   : > { %v1271_v24 = vpop.permute.xlu0 %1270 }
 0x330   : > { %v1241_v33 = vpop.permute.xlu0 %1240 }
 0x334   : > { %v1251_v49 = vpop.permute.xlu0 %1250 }
 0x3df   : > { %v2348_v19 = vpop.f32.mrb[4].mxu1 }
 0x3e0   : > { %v2350_v1 = vpop.f32.mrb[5].mxu1  ;;  %v9891_v31 = vadd.f32 %v2348_v19, %v1241_v33 }
 0x3e3   : > { %v2355_v52 = vpop.f32.mrb[6].mxu1 }
 0x3e4   : > { %v2357_v43 = vpop.f32.mrb[7].mxu1  ;;  %v9892_v17 = vadd.f32 %v2355_v52, %v1246_v58  ;;  %v2494_v52 = vsel %vm1278_vm5, %v2437_v59, 0 }
 0x3e5   : > { %v11603_v43 = vsub.f32 %v2485_v22, %v11590_v26 }
 0x3e7   : > { %v2362_v12 = vpop.f32.mrb[8].mxu1 }
 0x3e8   : > { %v2364_v50 = vpop.f32.mrb[9].mxu1  ;;  %v9893_v44 = vadd.f32 %v2362_v12, %v1251_v49  ;;  %v11605_v12 = vand.u32 4294901760, %v2491_v63 }
 0x3e9   : > { %v2439_v50 = vld [vmem:[%s13979_s7 + $0x30] sm:$0xff] }
 0x3eb   : > { %v2369_v40 = vpop.f32.mrb[10].mxu1 }
 0x3ec   : > { %v2371_v61 = vpop.f32.mrb[11].mxu1  ;;  %v9894_v16 = vadd.f32 %v2369_v40, %v1256_v45 }
 0x3ef   : > { %v2376_v11 = vpop.f32.mrb[12].mxu1 }
 0x3f0   : > { %v9895_v9 = vadd.f32 %v2376_v11, %v1261_v34  ;;  %v2378_v30 = vpop.f32.mrb[13].mxu1  ;;  %v2497_v11 = vsel %vm1278_vm5, %v2438_v8, 0 }
 0x3f2   : > { %v8327_v41 = vmul.f32 -1.442695, %v9895_v9  ;;  %v2440_v9 = vld [vmem:[%s13979_s7 + $0x38] sm:$0xff] }
 0x3f3   : > { %v2383_v53 = vpop.f32.mrb[14].mxu1 }
 0x3f4   : > { %10409 = vpow2.f32 %v8327_v41  ;;  %v9896_v0 = vadd.f32 %v2383_v53, %v1266_v46  ;;  %v2385_v62 = vpop.f32.mrb[15].mxu1  ;;  %v11615_v41 = vsub.f32 %v2488_v15, %v11596_v57  ;;  %v11617_v46 = vand.u32 4294901760, %v2494_v52 }
 0x3f5   : > { %v2500_v62 = vsel %vm1278_vm5, %v2439_v50, 0 }
 0x3f6   : > { %v8328_v2 = vmul.f32 -1.442695, %v9896_v0 }
 0x3f7   : > { %v2390_v6 = vpop.f32.mrb[16].mxu1 }
 0x3f8   : > { %10411 = vpow2.f32 %v8328_v2  ;;  %v9897_v38 = vadd.f32 %v2390_v6, %v1271_v24  ;;  %v2392_v54 = vpop.f32.mrb[17].mxu1  ;;  %v2586_v2 = vand.u32 4294901760, %v11603_v43  ;;  %v11624_v6 = vsub.f32 %v2491_v63, %v11605_v12 }
 0x3f9   : > { %v2503_v54 = vsel %vm1278_vm5, %v2440_v9, 0 }
 0x3fa   : > { %v8329_v60 = vmul.f32 -1.442695, %v9897_v38  ;;  %v11626_v38 = vand.u32 4294901760, %v2497_v11  ;;  %v2587_v49 = vsub.f32 %v11603_v43, %v2586_v2 }
 0x3fb   : > { %v2397_v21 = vpop.f32.mrb[18].mxu1 }
 0x3fc   : > { %10413 = vpow2.f32 %v8329_v60  ;;  %v9898_v23 = vadd.f32 %v2397_v21, %v1276_v20  ;;  %v2399_v48 = vpop.f32.mrb[19].mxu1  ;;  %v2588_v13 = vand.u32 4294901760, %v2587_v49 }
 0x3fd   : > { %10415 = vtanh.f32 %v9891_v31  ;;  %v2596_v48 = vand.u32 4294901760, %v11615_v41 }
 0x3fe   : > { %v10410_v5 = vpop.eup %10409  ;;  %v8330_v51 = vmul.f32 -1.442695, %v9898_v23 }
 0x3ff   : > { %v2417_v25 = vadd.f32 1.0, %v10410_v5  ;;  %v11635_v5 = vsub.f32 %v2494_v52, %v11617_v46 }
 0x400   : > { %10417 = vpow2.f32 %v8330_v51  ;;  %v11637_v51 = vand.u32 4294901760, %v2500_v62 }
 0x401   : > { %10419 = vrcp.f32 %v2417_v25  ;;  %v2616_v10 = vand.u32 4294901760, %v11635_v5 }
 0x402   : > { %v10412_v7 = vpop.eup %10411  ;;  %10421 = vtanh.f32 %v9892_v17 }
 0x403   : > { %v2418_v3 = vadd.f32 1.0, %v10412_v7  ;;  %v2617_v8 = vsub.f32 %v11635_v5, %v2616_v10 }
 0x405   : > { %10423 = vrcp.f32 %v2418_v3  ;;  %v2606_v3 = vand.u32 4294901760, %v11624_v6  ;;  %v2618_v9 = vand.u32 4294901760, %v2617_v8 }
 0x406   : > { %v10414_v37 = vpop.eup %10413  ;;  %10425 = vtanh.f32 %v9893_v44  ;;  %v11646_v44 = vsub.f32 %v2497_v11, %v11626_v38 }
 0x407   : > { %v2419_v28 = vadd.f32 1.0, %v10414_v37  ;;  %v10416_v27 = vpop.eup %10415  ;;  %v11648_v37 = vand.u32 4294901760, %v2503_v54 }
 0x408   : > { %v2626_v15 = vand.u32 4294901760, %v11646_v44 }
 0x409   : > { %10427 = vrcp.f32 %v2419_v28 }
 0x40a   : > { %v10418_v18 = vpop.eup %10417  ;;  %10429 = vtanh.f32 %v9894_v16 }
 0x40b   : > { %v10420_v29 = vpop.eup %10419  ;;  %v2420_v32 = vadd.f32 1.0, %v10418_v18  ;;  %v11655_v18 = vsub.f32 %v2500_v62, %v11637_v51 }
 0x40c   : > { %v2429_v55 = vmul.f32 %v10420_v29, %v10416_v27  ;;  %v10422_v14 = vpop.eup %10421  ;;  %v2597_v27 = vsub.f32 %v11615_v41, %v2596_v48 }
 0x40d   : > { %10431 = vrcp.f32 %v2420_v32 }
 0x40e   : > { %v2506_v56 = vand.u32 4294901760, %v2429_v55 }
 0x40f   : > { %v10424_v39 = vpop.eup %10423 }
 0x410   : > { %v2430_v19 = vmul.f32 %v10424_v39, %v10422_v14  ;;  %v2656_v1 = vsub.f32 %v2429_v55, %v2506_v56  ;;  %v10426_v40 = vpop.eup %10425  ;;  %v2607_v55 = vsub.f32 %v11624_v6, %v2606_v3  ;;  %v2598_v39 = vand.u32 4294901760, %v2597_v27 }
 0x412   : > { %v2509_v61 = vand.u32 4294901760, %v2430_v19  ;;  %v2657_v34 = vand.u32 4294901760, %v2656_v1  ;;  %v2608_v50 = vand.u32 4294901760, %v2607_v55 }
 0x413   : > { %v10428_v30 = vpop.eup %10427 }
 0x414   : > { %v2431_v53 = vmul.f32 %v10428_v30, %v10426_v40  ;;  %v11619_v24 = vpack.c.bf16 %v2509_v61, %v2506_v56  ;;  %v2663_v0 = vsub.f32 %v2430_v19, %v2509_v61  ;;  %v10430_v20 = vpop.eup %10429  ;;  %v2658_v60 = vsub.f32 %v2656_v1, %v2657_v34 }
 0x415   : > { %v11665_v56 = vsub.f32 %v2503_v54, %v11648_v37  ;;  %v2636_v19 = vand.u32 4294901760, %v11655_v18 }
 0x416   : > { %v2512_v33 = vand.u32 4294901760, %v2431_v53  ;;  %9332 = vmatprep.subr.bf16.mxu0 %v11619_v24  ;;  %v2664_v31 = vand.u32 4294901760, %v2663_v0  ;;  %v11630_v21 = vpack.c.bf16 %v2663_v0, %v2656_v1  ;;  %v2659_v28 = vand.u32 4294901760, %v2658_v60 }
 0x417   : > { %v10432_v23 = vpop.eup %10431  ;;  %9334 = vmatpush3.bf16.msra.mxu0 %v11619_v24  ;;  %v2646_v11 = vand.u32 4294901760, %v11665_v56  ;;  %v2637_v30 = vsub.f32 %v11655_v18, %v2636_v19 }
 0x418   : > { %v2432_v58 = vmul.f32 %v10432_v23, %v10430_v20  ;;  %v2665_v25 = vsub.f32 %v2663_v0, %v2664_v31  ;;  %v2670_v17 = vsub.f32 %v2431_v53, %v2512_v33  ;;  %v11639_v7 = vpack.c.bf16 %v2664_v31, %v2657_v34 }
 0x419   : > { %v2627_v34 = vsub.f32 %v11646_v44, %v2626_v15  ;;  %v2647_v62 = vsub.f32 %v11665_v56, %v2646_v11  ;;  %v2638_v54 = vand.u32 4294901760, %v2637_v30 }
 0x41a   : > { %v2515_v45 = vand.u32 4294901760, %v2432_v58  ;;  %v2666_v42 = vand.u32 4294901760, %v2665_v25  ;;  %v2671_v16 = vand.u32 4294901760, %v2670_v17 }
 0x41b   : > { %v2628_v0 = vand.u32 4294901760, %v2627_v34  ;;  %v2648_v20 = vand.u32 4294901760, %v2647_v62 }
 0x41c   : > { %v11657_v22 = vpack.c.bf16 %v2515_v45, %v2512_v33  ;;  %v9339_v29 = vpack.c.bf16 %v2666_v42, %v2659_v28  ;;  %v2677_v32 = vsub.f32 %v2432_v58, %v2515_v45  ;;  %v2672_v59 = vsub.f32 %v2670_v17, %v2671_v16  ;;  %v13986_v58 = vld [vmem:[#allocation16_spill] sm:$0xff] }
 0x41e   : > { %9336 = vmatprep.subr.bf16.mxu0 %v11657_v22  ;;  %v2678_v14 = vand.u32 4294901760, %v2677_v32  ;;  %v9351_v63 = vpack.c.bf16 %v2677_v32, %v2670_v17  ;;  %v2673_v40 = vand.u32 4294901760, %v2672_v59 }
 0x41f   : > { %9338 = vmatpush3.bf16.msra.mxu0 %v11657_v22 }
 0x420   : > { %9340 = vmatprep.subr.bf16.mxu0 %v9339_v29  ;;  %v2679_v1 = vsub.f32 %v2677_v32, %v2678_v14  ;;  %v9367_v52 = vpack.c.bf16 %v2678_v14, %v2671_v16 }
 0x422   : > { %8734 = vmatmul.mubr.f32.vlgmr.msra.gmra.mrb[4].mxu0 %v2588_v13  ;;  %v2680_v61 = vand.u32 4294901760, %v2679_v1 }
 0x423   : > { %9342 = vmatpush3.bf16.msra.mxu0 %v9339_v29  ;;  %8736 = vmatprep.mubr.f32.mxu0 %v2598_v39 }
 0x424   : > { %v9343_v53 = vpack.c.bf16 %v2680_v61, %v2673_v40 }
 0x426   : > { %8737 = vmatmul.mubr.f32.gmra.mrb[6].mxu0 %v2608_v50  ;;  %9344 = vmatprep.subr.bf16.mxu0 %v9343_v53 }
 0x427   : > { %9346 = vmatpush3.bf16.msra.mxu0 %v9343_v53  ;;  %8739 = vmatprep.mubr.f32.mxu0 %v2618_v9 }
 0x428   : > { %9348 = vmatprep.subr.bf16.mxu0 %v11630_v21 }
 0x42a   : > { %8740 = vmatmul.mubr.f32.gmra.mrb[8].mxu0 %v2628_v0 }
 0x42b   : > { %8742 = vmatprep.mubr.f32.mxu0 %v2638_v54 }
 0x42e   : > { %8743 = vmatmul.mubr.f32.gmra.mrb[10].mxu0 %v2648_v20  ;;  %v8332_v20 = vld [vmem:[%s13869_s5 + $0x88] sm:$0xff] }
 0x42f   : > { %8753 = vmatprep.mubr.f32.mxu0 %v11570_v47 }
 0x432   : > { %8754 = vmatmul.mubr.f32.vlgmr.msra.gmra.mrb[4].mxu0 %v11590_v26 }
 0x433   : > { %9350 = vmatpush3.bf16.msra.mxu0 %v11630_v21  ;;  %8756 = vmatprep.mubr.f32.mxu0 %v11596_v57 }
 0x434   : > { %9352 = vmatprep.subr.bf16.mxu0 %v9351_v63 }
 0x436   : > { %8757 = vmatmul.mubr.f32.gmra.mrb[6].mxu0 %v11605_v12 }
 0x437   : > { %9354 = vmatpush3.bf16.msra.mxu0 %v9351_v63  ;;  %8759 = vmatprep.mubr.f32.mxu0 %v11617_v46 }
 0x438   : > { %9356 = vmatprep.subr.bf16.mxu0 %v11619_v24 }
 0x43a   : > { %8760 = vmatmul.mubr.f32.gmra.mrb[8].mxu0 %v11626_v38 }
 0x43b   : > { %8762 = vmatprep.mubr.f32.mxu0 %v11637_v51 }
 0x43e   : > { %8763 = vmatmul.mubr.f32.gmra.mrb[10].mxu0 %v11648_v37 }
 0x43f   : > { %8773 = vmatprep.mubr.f32.mxu0 %v11573_v35  ;;  %v2449_v35 = vpop.permute.xlu1 %2448 }
 0x442   : > { %8774 = vmatmul.mubr.f32.vlgmr.msra.gmra.mrb[4].mxu0 %v11603_v43 }
 0x443   : > { %9358 = vmatpush3.bf16.msra.mxu0 %v11619_v24  ;;  %8776 = vmatprep.mubr.f32.mxu0 %v11615_v41 }
 0x444   : > { %9360 = vmatprep.subr.bf16.mxu0 %v11657_v22 }
 0x446   : > { %8777 = vmatmul.mubr.f32.gmra.mrb[6].mxu0 %v11624_v6  ;;  %v2459_v6 = vpop.permute.xlu1 %2458 }
 0x447   : > { %9362 = vmatpush3.bf16.msra.mxu0 %v11657_v22  ;;  %8779 = vmatprep.mubr.f32.mxu0 %v11635_v5  ;;  %v13985_v5 = vld [vmem:[#allocation15_spill] sm:$0xff] }
 0x448   : > { %9364 = vmatprep.subr.bf16.mxu0 %v11639_v7 }
 0x44a   : > { %8780 = vmatmul.mubr.f32.gmra.mrb[8].mxu0 %v11646_v44 }
 0x44b   : > { %8782 = vmatprep.mubr.f32.mxu0 %v11655_v18 }
 0x44e   : > { %8783 = vmatmul.mubr.f32.gmra.mrb[10].mxu0 %v11665_v56 }
 0x44f   : > { %8793 = vmatprep.mubr.f32.mxu0 %v2576_v36  ;;  %v2444_v36 = vpop.permute.xlu0 %2443 }
 0x452   : > { %8794 = vmatmul.mubr.f32.vlgmr.msra.gmra.mrb[4].mxu0 %v2586_v2  ;;  %v13980_v2 = vld [vmem:[#allocation13_spill] sm:$0xff] }
 0x453   : > { %9366 = vmatpush3.bf16.msra.mxu0 %v11639_v7  ;;  %8796 = vmatprep.mubr.f32.mxu0 %v2596_v48  ;;  %v2454_v60 = vpop.permute.xlu0 %2453 }
 0x454   : > { %9368 = vmatprep.subr.bf16.mxu0 %v9367_v52 }
 0x456   : > { %8797 = vmatmul.mubr.f32.gmra.mrb[6].mxu0 %v2606_v3 }
 0x457   : > { %9370 = vmatpush3.bf16.msra.mxu0 %v9367_v52  ;;  %8799 = vmatprep.mubr.f32.mxu0 %v2616_v10 }
 0x458   : > { %9372 = vmatprep.subr.bf16.mxu0 %v11619_v24 }
 0x45a   : > { %8800 = vmatmul.mubr.f32.gmra.mrb[8].mxu0 %v2626_v15 }
 0x45b   : > { %8802 = vmatprep.mubr.f32.mxu0 %v2636_v19 }
 0x45e   : > { %8803 = vmatmul.mubr.f32.gmra.mrb[10].mxu0 %v2646_v11 }
 0x45f   : > { %8813 = vmatprep.mubr.f32.mxu0 %v11570_v47 }
 0x462   : > { %8814 = vmatmul.mubr.f32.vlgmr.msra.gmra.mrb[4].mxu0 %v11590_v26 }
 0x463   : > { %9374 = vmatpush3.bf16.msra.mxu0 %v11619_v24  ;;  %8816 = vmatprep.mubr.f32.mxu0 %v11596_v57 }
 0x464   : > { %9376 = vmatprep.subr.bf16.mxu0 %v11657_v22 }
 0x466   : > { %8817 = vmatmul.mubr.f32.gmra.mrb[6].mxu0 %v11605_v12 }
 0x467   : > { %9378 = vmatpush3.bf16.msra.mxu0 %v11657_v22  ;;  %8819 = vmatprep.mubr.f32.mxu0 %v11617_v46 }
 0x468   : > { %9379 = vmatprep.subr.bf16.mxu0 %v13888_v4 }
 0x46a   : > { %8820 = vmatmul.mubr.f32.gmra.mrb[8].mxu0 %v11626_v38 }
 0x46b   : > { %8822 = vmatprep.mubr.f32.mxu0 %v11637_v51 }
 0x46e   : > { %8823 = vmatmul.mubr.f32.gmra.mrb[10].mxu0 %v11648_v37 }
 0x46f   : > { %8833 = vmatprep.mubr.f32.mxu0 %v11570_v47 }
 0x472   : > { %8834 = vmatmul.mubr.f32.vlgmr.msra.gmra.mrb[4].mxu0 %v11590_v26 }
 0x473   : > { %8836 = vmatprep.mubr.f32.mxu0 %v11596_v57  ;;  %v13981_v57 = vld [vmem:[#allocation14_spill] sm:$0xff] }
 0x476   : > { %8837 = vmatmul.mubr.f32.gmra.mrb[6].mxu0 %v11605_v12 }
 0x477   : > { %8839 = vmatprep.mubr.f32.mxu0 %v11617_v46 }
 0x47a   : > { %8840 = vmatmul.mubr.f32.gmra.mrb[8].mxu0 %v11626_v38  ;;  %v13982_v38 = vld [vmem:[#allocation12_spill] sm:$0xff] }
 0x47b   : > { %8842 = vmatprep.mubr.f32.mxu0 %v11637_v51 }
 0x47e   : > { %8843 = vmatmul.mubr.f32.gmra.mrb[10].mxu0 %v11648_v37 }
 0x545   : > { %v8835_v43 = vpop.f32.mrb[4].mxu0 }
 0x546   : > { %v9899_v41 = vadd.f32 %v8835_v43, %v2449_v35  ;;  %v3245_v24 = vpop.f32.mrb[5].mxu0 }
 0x547   : > { %v9900_v47 = vadd.f32 %v3245_v24, %v2444_v36  ;;  %v3430_v36 = vsel %vm1278_vm5, %v8332_v20, 0 }
 0x548   : > { %v3296_v26 = vadd.f32 %v9899_v41, %v13980_v2  ;;  %v11809_v41 = vand.u32 4294901760, %v3430_v36 }
 0x549   : > { %v3295_v33 = vadd.f32 %v9900_v47, %v13981_v57  ;;  %v8838_v12 = vpop.f32.mrb[6].mxu0 }
 0x54a   : > { %v9901_v46 = vadd.f32 %v8838_v12, %v2459_v6  ;;  %v3257_v31 = vpop.f32.mrb[7].mxu0  ;;  %v11738_v21 = vmul.f32 %v13982_v38, %v3296_v26  ;;  %v11814_v47 = vsub.f32 %v3430_v36, %v11809_v41 }
 0x54b   : > { %v9902_v23 = vadd.f32 %v3257_v31, %v2454_v60  ;;  %v11741_v48 = vmul.f32 %v13982_v38, %v3295_v33 }
 0x54c   : > { %13983 = vst [vmem:[#allocation25_spill] sm:$0xff] %v11738_v21  ;;  %v3298_v51 = vadd.f32 %v9901_v46, %v13985_v5  ;;  %3309 = vrot.lane.b32.xlu1 %v11738_v21, %s10658_s3  ;;  %v13732_v2 = vand.u32 4294901760, %v11814_v47 }
 0x54d   : > { %13984 = vst [vmem:[#allocation17_spill] sm:$0xff] %v11741_v48  ;;  %v3297_v25 = vadd.f32 %v9902_v23, %v13986_v58  ;;  %3307 = vrot.lane.b32.xlu0 %v11741_v48, %s10658_s3 }
 0x54e   : > { %v11748_v17 = vmul.f32 %v13982_v38, %v3298_v51  ;;  %v3540_v26 = vsub.f32 %v11814_v47, %v13732_v2 }
 0x54f   : > { %v11751_v7 = vmul.f32 %v13982_v38, %v3297_v25 }
 0x550   : > { %13987 = vst [vmem:[#allocation30_spill] sm:$0xff] %v11748_v17  ;;  %3313 = vrot.lane.b32.xlu1 %v11748_v17, %s10658_s3  ;;  %v3541_v6 = vand.u32 4294901760, %v3540_v26 }
 0x551   : > { %13988 = vst [vmem:[#allocation33_spill] sm:$0xff] %v11751_v7  ;;  %3311 = vrot.lane.b32.xlu0 %v11751_v7, %s10658_s3  ;;  %s13848_s3 = sand.u32 1, %s10631_s0  }
 0x552   : > { %3542 = vmatprep.mubr.f32.mxu0 %v3541_v6 }
 0x5be   : > { %v3310_v49 = vpop.permute.xlu1 %3309 }
 0x5bf   : > { %v3320_v3 = vsel %vm532_vm0, 0.0, %v3310_v49  ;;  %v3308_v44 = vpop.permute.xlu0 %3307  ;;  %v8331_v49 = vld [vmem:[%s13869_s5 + $0x80] sm:$0xff] }
 0x5c0   : > { %v3325_v37 = vsel %vm3323_vm6, %v3320_v3, 0.0  ;;  %v3319_v45 = vsel %vm532_vm0, 0.0, %v3308_v44 }
 0x5c1   : > { %v3324_v28 = vsel %vm3323_vm6, %v3319_v45, 0.0  ;;  %3334 = vrot.lane.b32.xlu1 %v3325_v37, %s13989_s29  ;;  %v3457_v42 = vand.u32 4294901760, %v3325_v37 }
 0x5c2   : > { %v3314_v16 = vpop.permute.xlu1 %3313  ;;  %3332 = vrot.lane.b32.xlu0 %v3324_v28, %s13989_s29  ;;  %v3454_v27 = vand.u32 4294901760, %v3324_v28 }
 0x5c3   : > { %v3322_v10 = vsel %vm532_vm0, 0.0, %v3314_v16  ;;  %v3312_v18 = vpop.permute.xlu0 %3311  ;;  %v11762_v22 = vsub.f32 %v3325_v37, %v3457_v42  ;;  %v11843_v16 = vand.u32 4294901760, %v8331_v49 }
 0x5c4   : > { %v3327_v29 = vsel %vm3323_vm6, %v3322_v10, 0.0  ;;  %v3321_v32 = vsel %vm532_vm0, 0.0, %v3312_v18  ;;  %v11766_v13 = vpack.c.bf16 %v3457_v42, %v3454_v27  ;;  %v11768_v55 = vsub.f32 %v3324_v28, %v3454_v27 }
 0x5c5   : > { %v3326_v15 = vsel %vm3323_vm6, %v3321_v32, 0.0  ;;  %3338 = vrot.lane.b32.xlu1 %v3327_v29, %s13989_s29  ;;  %v3463_v59 = vand.u32 4294901760, %v3327_v29  ;;  %v3668_v14 = vand.u32 4294901760, %v11762_v22 }
 0x5c6   : > { %13990 = vst [vmem:[#allocation18_spill] sm:$0xff] %v11766_v13  ;;  %9381 = vmatpush1.bf16.msra.mxu0 %v11766_v13  ;;  %3336 = vrot.lane.b32.xlu0 %v3326_v15, %s13989_s29  ;;  %v3460_v56 = vand.u32 4294901760, %v3326_v15  ;;  %v3661_v63 = vand.u32 4294901760, %v11768_v55  ;;  %s13503_s29 = sshll.u32 %s13848_s3, 3 }
 0x5c7   : > { %9382 = vmatprep.subr.bf16.mxu0 %v13888_v4  ;;  %v11779_v8 = vsub.f32 %v3327_v29, %v3463_v59  ;;  %v3669_v19 = vsub.f32 %v11762_v22, %v3668_v14 }
 0x5c8   : > { %v11782_v1 = vpack.c.bf16 %v3463_v59, %v3460_v56  ;;  %v11784_v52 = vsub.f32 %v3326_v15, %v3460_v56  ;;  %v3662_v50 = vsub.f32 %v11768_v55, %v3661_v63  ;;  %v11787_v40 = vpack.c.bf16 %v3668_v14, %v3661_v63  ;;  %v8334_v59 = vld [vmem:[%s13869_s5 + $0x98] sm:$0xff] }
 0x5c9   : > { %3346 = vrot.lane.b32.xlu1 %v3325_v37, %s13993_s23  ;;  %v3670_v61 = vand.u32 4294901760, %v3669_v19  ;;  %v3682_v34 = vand.u32 4294901760, %v11779_v8 }
 0x5ca   : > { %13991 = vst [vmem:[#allocation35_spill] sm:$0xff] %v11782_v1  ;;  %13992 = vst [vmem:[#allocation36_spill] sm:$0xff] %v11787_v40  ;;  %3344 = vrot.lane.b32.xlu0 %v3324_v28, %s13993_s23  ;;  %9384 = vmatpush1.bf16.msra.mxu0 %v11782_v1  ;;  %v3663_v11 = vand.u32 4294901760, %v3662_v50  ;;  %v3675_v9 = vand.u32 4294901760, %v11784_v52  ;;  %v11865_v50 = vsub.f32 %v8331_v49, %v11843_v16 }
 0x5cb   : > { %9385 = vmatprep.subr.bf16.mxu0 %v13888_v4  ;;  %v3683_v53 = vsub.f32 %v11779_v8, %v3682_v34 }
 0x5cc   : > { %v11798_v0 = vpack.c.bf16 %v3670_v61, %v3663_v11  ;;  %v3676_v62 = vsub.f32 %v11784_v52, %v3675_v9  ;;  %v11801_v54 = vpack.c.bf16 %v3682_v34, %v3675_v9  ;;  %13999 = vst [vmem:[#allocation24_spill] sm:$0xff] %v11865_v50  ;;  %v3433_v9 = vsel %vm1278_vm5, %v8334_v59, 0 }
 0x5cd   : > { %3350 = vrot.lane.b32.xlu1 %v3327_v29, %s13993_s23  ;;  %v3684_v35 = vand.u32 4294901760, %v3683_v53  ;;  %v11884_v6 = vand.u32 4294901760, %v3433_v9 }
 0x5ce   : > { %13994 = vst [vmem:[#allocation21_spill] sm:$0xff] %v11801_v54  ;;  %3348 = vrot.lane.b32.xlu0 %v3326_v15, %s13993_s23  ;;  %v3677_v43 = vand.u32 4294901760, %v3676_v62 }
 0x5d0   : > { %v11811_v24 = vpack.c.bf16 %v3684_v35, %v3677_v43 }
 0x5d1   : > { %3358 = vrot.lane.b32.xlu1 %v3325_v37, %s10659_s18 }
 0x5d2   : > { %3356 = vrot.lane.b32.xlu0 %v3324_v28, %s10659_s18 }
 0x5d5   : > { %3362 = vrot.lane.b32.xlu1 %v3327_v29, %s10659_s18 }
 0x5d6   : > { %3360 = vrot.lane.b32.xlu0 %v3326_v15, %s10659_s18  ;;  %s469_s18 = scalar_lea.vmem [#allocation6], %s13503_s29 }
 0x5d9   : > { %3370 = vrot.lane.b32.xlu1 %v3325_v37, %s10660_s1 }
 0x5da   : > { %3368 = vrot.lane.b32.xlu0 %v3324_v28, %s10660_s1 }
 0x5dd   : > { %3374 = vrot.lane.b32.xlu1 %v3327_v29, %s10660_s1 }
 0x5de   : > { %3372 = vrot.lane.b32.xlu0 %v3326_v15, %s10660_s1 }
 0x633   : > { %v3335_v57 = vpop.permute.xlu1 %3334 }
 0x634   : > { %v3469_v33 = vand.u32 4294901760, %v3335_v57  ;;  %v3333_v12 = vpop.permute.xlu0 %3332 }
 0x635   : > { %v3466_v60 = vand.u32 4294901760, %v3333_v12 }
 0x636   : > { %v11824_v46 = vsub.f32 %v3335_v57, %v3469_v33  ;;  %v8336_v57 = vld [vmem:[%s13869_s5 + $0xa8] sm:$0xff] }
 0x637   : > { %v11826_v31 = vpack.c.bf16 %v3469_v33, %v3466_v60  ;;  %v11828_v23 = vsub.f32 %v3333_v12, %v3466_v60  ;;  %v3339_v5 = vpop.permute.xlu1 %3338 }
 0x638   : > { %v13741_v51 = vand.u32 4294901760, %v11824_v46  ;;  %v3475_v58 = vand.u32 4294901760, %v3339_v5  ;;  %v3337_v25 = vpop.permute.xlu0 %3336 }
 0x639   : > { %13995 = vst [vmem:[#allocation38_spill] sm:$0xff] %v11826_v31  ;;  %v13740_v3 = vand.u32 4294901760, %v11828_v23  ;;  %v3472_v44 = vand.u32 4294901760, %v3337_v25  ;;  %9387 = vmatpush1.bf16.msra.mxu0 %v11826_v31 }
 0x63a   : > { %v11836_v37 = vsub.f32 %v3339_v5, %v3475_v58  ;;  %9388 = vmatprep.subr.bf16.mxu0 %v13888_v4  ;;  %v13734_v5 = vand.u32 4294901760, %v11865_v50 }
 0x63b   : > { %v11839_v45 = vpack.c.bf16 %v3475_v58, %v3472_v44  ;;  %v11841_v28 = vsub.f32 %v3337_v25, %v3472_v44  ;;  %v3347_v42 = vpop.permute.xlu1 %3346  ;;  %v11849_v27 = vpack.c.bf16 %v13741_v51, %v13740_v3  ;;  %v8333_v58 = vld [vmem:[%s13869_s5 + $0x90] sm:$0xff] }
 0x63c   : > { %v13739_v10 = vand.u32 4294901760, %v11836_v37  ;;  %v3481_v18 = vand.u32 4294901760, %v3347_v42  ;;  %v3345_v29 = vpop.permute.xlu0 %3344 }
 0x63d   : > { %13996 = vst [vmem:[#allocation40_spill] sm:$0xff] %v11839_v45  ;;  %13997 = vst [vmem:[#allocation22_spill] sm:$0xff] %v11849_v27  ;;  %v13736_v32 = vand.u32 4294901760, %v11841_v28  ;;  %v3478_v15 = vand.u32 4294901760, %v3345_v29  ;;  %9390 = vmatpush1.bf16.msra.mxu0 %v11839_v45 }
 0x63e   : > { %v11857_v14 = vsub.f32 %v3347_v42, %v3481_v18  ;;  %9391 = vmatprep.subr.bf16.mxu0 %v13888_v4 }
 0x63f   : > { %v11860_v56 = vpack.c.bf16 %v3481_v18, %v3478_v15  ;;  %v11862_v63 = vsub.f32 %v3345_v29, %v3478_v15  ;;  %v3351_v19 = vpop.permute.xlu1 %3350  ;;  %v11873_v53 = vpack.c.bf16 %v13739_v10, %v13736_v32  ;;  %v3436_v18 = vsel %vm1278_vm5, %v8336_v57, 0  ;;  %v8338_v29 = vld [vmem:[%s13869_s5 + $0xb8] sm:$0xff] }
 0x640   : > { %v13735_v61 = vand.u32 4294901760, %v11857_v14  ;;  %v3487_v34 = vand.u32 4294901760, %v3351_v19  ;;  %v3349_v11 = vpop.permute.xlu0 %3348  ;;  %v11935_v30 = vand.u32 4294901760, %v3436_v18  ;;  %v3439_v39 = vsel %vm1278_vm5, %v8338_v29, 0  ;;  %v8337_v29 = vld [vmem:[%s13869_s5 + $0xb0] sm:$0xff] }
 0x641   : > { %13998 = vst [vmem:[#allocation43_spill] sm:$0xff] %v11860_v56  ;;  %14000 = vst [vmem:[#allocation45_spill] sm:$0xff] %v11873_v53  ;;  %v13733_v62 = vand.u32 4294901760, %v11862_v63  ;;  %v3484_v20 = vand.u32 4294901760, %v3349_v11  ;;  %9393 = vmatpush1.bf16.msra.mxu0 %v11860_v56  ;;  %v11978_v48 = vand.u32 4294901760, %v8337_v29  ;;  %v8346_v56 = vld [vmem:[%s13869_s5 + $0xf8] sm:$0xff] }
 0x642   : > { %v11877_v35 = vsub.f32 %v3351_v19, %v3487_v34  ;;  %9394 = vmatprep.subr.bf16.mxu0 %v13888_v4  ;;  %v11970_v17 = vsub.f32 %v3436_v18, %v11935_v30 }
 0x643   : > { %v11880_v36 = vpack.c.bf16 %v3487_v34, %v3484_v20  ;;  %v11882_v43 = vsub.f32 %v3349_v11, %v3484_v20  ;;  %v3359_v26 = vpop.permute.xlu1 %3358  ;;  %v11898_v25 = vpack.c.bf16 %v13735_v61, %v13733_v62  ;;  %v11914_v34 = vsub.f32 %v3433_v9, %v11884_v6  ;;  %v8335_v20 = vld [vmem:[%s13869_s5 + $0xa0] sm:$0xff] }
 0x644   : > { %v13738_v33 = vand.u32 4294901760, %v11877_v35  ;;  %v3493_v12 = vand.u32 4294901760, %v3359_v26  ;;  %v3357_v60 = vpop.permute.xlu0 %3356  ;;  %v11916_v11 = vand.u32 4294901760, %v8333_v58  ;;  %14009 = vst [vmem:[#allocation23_spill] sm:$0xff] %v11970_v17 }
 0x645   : > { %14001 = vst [vmem:[#allocation27_spill] sm:$0xff] %v11880_v36  ;;  %14002 = vst [vmem:[#allocation29_spill] sm:$0xff] %v11898_v25  ;;  %v13737_v49 = vand.u32 4294901760, %v11882_v43  ;;  %v3490_v44 = vand.u32 4294901760, %v3357_v60  ;;  %9396 = vmatpush1.bf16.msra.mxu0 %v11880_v36 }
 0x646   : > { %v11902_v42 = vsub.f32 %v3359_v26, %v3493_v12  ;;  %9397 = vmatprep.subr.bf16.mxu0 %v13888_v4  ;;  %14004 = vst [vmem:[#allocation32_spill] sm:$0xff] %v11914_v34  ;;  %v11949_v10 = vsub.f32 %v8333_v58, %v11916_v11 }
 0x647   : > { %v11909_v15 = vpack.c.bf16 %v3493_v12, %v3490_v44  ;;  %v11911_v59 = vsub.f32 %v3357_v60, %v3490_v44  ;;  %v3363_v19 = vpop.permute.xlu1 %3362  ;;  %v11925_v12 = vsub.f32 %v11865_v50, %v13734_v5  ;;  %v11931_v9 = vpack.c.bf16 %v13738_v33, %v13737_v49 }
 0x648   : > { %v13747_v26 = vand.u32 4294901760, %v11902_v42  ;;  %v3499_v57 = vand.u32 4294901760, %v3363_v19  ;;  %v3361_v2 = vpop.permute.xlu0 %3360  ;;  %v11941_v5 = vand.u32 4294901760, %v8335_v20  ;;  %14007 = vst [vmem:[#allocation19_spill] sm:$0xff] %v11949_v10  ;;  %v14019_v40 = vand.u32 4294901760, %v11949_v10 }
 0x649   : > { %14003 = vst [vmem:[#allocation46_spill] sm:$0xff] %v11909_v15  ;;  %14005 = vst [vmem:[#allocation37_spill] sm:$0xff] %v11931_v9  ;;  %v13746_v60 = vand.u32 4294901760, %v11911_v59  ;;  %v3496_v44 = vand.u32 4294901760, %v3361_v2  ;;  %9399 = vmatpush1.bf16.msra.mxu0 %v11909_v15  ;;  %v3547_v7 = vand.u32 4294901760, %v11925_v12  ;;  %v14012_v12 = vand.u32 4294901760, %v11914_v34 }
 0x64a   : > { %v11938_v62 = vsub.f32 %v3363_v19, %v3499_v57  ;;  %9400 = vmatprep.subr.bf16.mxu0 %v13888_v4  ;;  %v8340_v19 = vld [vmem:[%s13869_s5 + $0xc8] sm:$0xff]  ;;  %v11976_v38 = vsub.f32 %v8335_v20, %v11941_v5  ;;  %v8342_v20 = vld [vmem:[%s13869_s5 + $0xd8] sm:$0xff]  ;;  %v8341_v15 = vld [vmem:[%s13869_s5 + $0xd0] sm:$0xff] }
 0x64b   : > { %v11943_v61 = vpack.c.bf16 %v3499_v57, %v3496_v44  ;;  %v11945_v32 = vsub.f32 %v3361_v2, %v3496_v44  ;;  %v3371_v49 = vpop.permute.xlu1 %3370  ;;  %v11958_v2 = vand.u32 4294901760, %v3439_v39  ;;  %v11964_v58 = vpack.c.bf16 %v13747_v26, %v13746_v60 }
 0x64c   : > { %v3505_v57 = vand.u32 4294901760, %v3371_v49  ;;  %v3369_v51 = vpop.permute.xlu0 %3368  ;;  %14010 = vst [vmem:[#allocation26_spill] sm:$0xff] %v11976_v38  ;;  %v3442_v60 = vsel %vm1278_vm5, %v8340_v19, 0  ;;  %v3555_v18 = vsub.f32 %v11914_v34, %v14012_v12  ;;  %v3445_v12 = vsel %vm1278_vm5, %v8342_v20, 0 }
 0x64d   : > { %14006 = vst [vmem:[#allocation41_spill] sm:$0xff] %v11943_v61  ;;  %14008 = vst [vmem:[#allocation20_spill] sm:$0xff] %v11964_v58  ;;  %v3502_v33 = vand.u32 4294901760, %v3369_v51  ;;  %9402 = vmatpush1.bf16.msra.mxu0 %v11943_v61  ;;  %v11994_v19 = vsub.f32 %v3439_v39, %v11958_v2  ;;  %v12005_v27 = vand.u32 4294901760, %v3442_v60  ;;  %v8339_v39 = vld [vmem:[%s13869_s5 + $0xc0] sm:$0xff] }
 0x64e   : > { %v11972_v3 = vsub.f32 %v3371_v49, %v3505_v57  ;;  %9403 = vmatprep.subr.bf16.mxu0 %v13888_v4  ;;  %v3556_v54 = vand.u32 4294901760, %v3555_v18  ;;  %v12030_v61 = vand.u32 4294901760, %v8339_v39 }
 0x64f   : > { %v11981_v26 = vpack.c.bf16 %v3505_v57, %v3502_v33  ;;  %v11983_v44 = vsub.f32 %v3369_v51, %v3502_v33  ;;  %v3375_v21 = vpop.permute.xlu1 %3374  ;;  %14013 = vst [vmem:[#allocation31_spill] sm:$0xff] %v11994_v19  ;;  %v14014_v51 = vand.u32 4294901760, %v11945_v32  ;;  %v14015_v33 = vand.u32 4294901760, %v11938_v62 }
 0x650   : > { %v3511_v9 = vand.u32 4294901760, %v3375_v21  ;;  %v3373_v25 = vpop.permute.xlu0 %3372  ;;  %v14031_v18 = vand.u32 4294901760, %v11994_v19 }
 0x651   : > { %14011 = vst [vmem:[#allocation28_spill] sm:$0xff] %v11981_v26  ;;  %v12000_v57 = vpack.c.bf16 %v14015_v33, %v14014_v51  ;;  %v3508_v49 = vand.u32 4294901760, %v3373_v25  ;;  %9405 = vmatpush1.bf16.msra.mxu0 %v11981_v26  ;;  %v12015_v33 = vsub.f32 %v8337_v29, %v11978_v48  ;;  %v3561_v26 = vsub.f32 %v11949_v10, %v14019_v40 }
 0x652   : > { %v12010_v58 = vsub.f32 %v3375_v21, %v3511_v9  ;;  %9406 = vmatprep.subr.bf16.mxu0 %v13888_v4  ;;  %v8344_v21 = vld [vmem:[%s13869_s5 + $0xe8] sm:$0xff]  ;;  %v14023_v40 = vand.u32 4294901760, %v11970_v17  ;;  %v12044_v51 = vsub.f32 %v3442_v60, %v12005_v27  ;;  %v12046_v29 = vand.u32 4294901760, %v3445_v12 }
 0x653   : > { %14016 = vst [vmem:[#allocation34_spill] sm:$0xff] %v12000_v57  ;;  %14017 = vst [vmem:[#allocation39_spill] sm:$0xff] %v12015_v33  ;;  %v12018_v57 = vpack.c.bf16 %v3511_v9, %v3508_v49  ;;  %v12020_v53 = vsub.f32 %v3373_v25, %v3508_v49  ;;  %v14020_v9 = vand.u32 4294901760, %v11983_v44  ;;  %v14021_v25 = vand.u32 4294901760, %v11972_v3 }
 0x654   : > { %v3570_v20 = vsub.f32 %v11970_v17, %v14023_v40  ;;  %14024 = vst [vmem:[#allocation13_spill] sm:$0xff] %v12044_v51  ;;  %v14026_v40 = vand.u32 4294901760, %v11824_v46 }
 0x655   : > { %14018 = vst [vmem:[#allocation42_spill] sm:$0xff] %v12018_v57  ;;  %v12036_v49 = vpack.c.bf16 %v14021_v25, %v14020_v9  ;;  %9408 = vmatpush1.bf16.msra.mxu0 %v12018_v57  ;;  %v14025_v9 = vand.u32 4294901760, %v11976_v38  ;;  %v14027_v57 = vand.u32 4294901760, %v11828_v23  ;;  %v14028_v45 = vand.u32 4294901760, %v12020_v53 }
 0x656   : > { %9409 = vmatprep.subr.bf16.mxu0 %v13888_v4  ;;  %v3697_v60 = vsub.f32 %v11824_v46, %v14026_v40  ;;  %v3585_v40 = vsub.f32 %v11994_v19, %v14031_v18  ;;  %v3571_v17 = vand.u32 4294901760, %v3570_v20  ;;  %v14033_v18 = vand.u32 4294901760, %v12015_v33 }
 0x657   : > { %14022 = vst [vmem:[#allocation44_spill] sm:$0xff] %v12036_v49  ;;  %v3576_v25 = vsub.f32 %v11976_v38, %v14025_v9  ;;  %v3448_v49 = vsel %vm1278_vm5, %v8344_v21, 0  ;;  %v3690_v36 = vsub.f32 %v11828_v23, %v14027_v57  ;;  %v14029_v9 = vand.u32 4294901760, %v12010_v58 }
 0x658   : > { %3548 = vmatmul.mubr.f32.vlgmr.msra.gmra.mrb[12].mxu0 %v3547_v7  ;;  %v3562_v21 = vand.u32 4294901760, %v3561_v26  ;;  %v12076_v38 = vsub.f32 %v8339_v39, %v12030_v61  ;;  %v12078_v57 = vand.u32 4294901760, %v8341_v15  ;;  %v12085_v7 = vand.u32 4294901760, %v3448_v49  ;;  %v8343_v26 = vld [vmem:[%s13869_s5 + $0xe0] sm:$0xff] }
 0x659   : > { %v12070_v31 = vpack.c.bf16 %v14029_v9, %v14028_v45  ;;  %9411 = vmatpush1.bf16.msra.mxu0 %v11798_v0  ;;  %3557 = vmatprep.mubr.f32.mxu0 %v3556_v54  ;;  %v12083_v45 = vsub.f32 %v3445_v12, %v12046_v29  ;;  %v3577_v39 = vand.u32 4294901760, %v3576_v25  ;;  %v3591_v0 = vsub.f32 %v12015_v33, %v14033_v18 }
 0x65a   : > { %9412 = vmatprep.subr.bf16.mxu0 %v13888_v4  ;;  %v3451_v54 = vsel %vm1278_vm5, %v8346_v56, 0  ;;  %v3698_v20 = vand.u32 4294901760, %v3697_v60  ;;  %v3691_v9 = vand.u32 4294901760, %v3690_v36  ;;  %v14034_v12 = vand.u32 4294901760, %v11836_v37 }
 0x65b   : > { %14030 = vst [vmem:[#allocation14_spill] sm:$0xff] %v12070_v31  ;;  %14032 = vst [vmem:[#allocation15_spill] sm:$0xff] %v12083_v45  ;;  %v14035_v31 = vand.u32 4294901760, %v11841_v28  ;;  %v3586_v10 = vand.u32 4294901760, %v3585_v40  ;;  %v12103_v34 = vsub.f32 %v8341_v15, %v12078_v57  ;;  %v12105_v18 = vand.u32 4294901760, %v8343_v26  ;;  %v8345_v15 = vld [vmem:[%s13869_s5 + $0xf0] sm:$0xff] }
 0x65c   : > { %v3711_v1 = vsub.f32 %v11836_v37, %v14034_v12  ;;  %3563 = vmatmul.mubr.f32.gmra.mrb[14].mxu0 %v3562_v21  ;;  %v14036_v56 = vand.u32 4294901760, %v12044_v51  ;;  %v12115_v21 = vand.u32 4294901760, %v3451_v54  ;;  %v14037_v40 = vand.u32 4294901760, %v11857_v14 }
 0x65d   : > { %v3704_v19 = vsub.f32 %v11841_v28, %v14035_v31  ;;  %9414 = vmatpush1.bf16.msra.mxu0 %v11811_v24  ;;  %3572 = vmatprep.mubr.f32.mxu0 %v3571_v17  ;;  %v12113_v31 = vsub.f32 %v3448_v49, %v12085_v7  ;;  %v14038_v17 = vand.u32 4294901760, %v11862_v63  ;;  %v9416_v49 = vpack.c.bf16 %v3698_v20, %v3691_v9 }
 0x65e   : > { %v3600_v36 = vsub.f32 %v12044_v51, %v14036_v56  ;;  %v3725_v24 = vsub.f32 %v11857_v14, %v14037_v40  ;;  %9415 = vmatprep.subr.bf16.mxu0 %v13888_v4  ;;  %v3712_v56 = vand.u32 4294901760, %v3711_v1  ;;  %v3592_v25 = vand.u32 4294901760, %v3591_v0 }
 0x65f   : > { %v3718_v12 = vsub.f32 %v11862_v63, %v14038_v17  ;;  %v3705_v60 = vand.u32 4294901760, %v3704_v19  ;;  %v14039_v51 = vand.u32 4294901760, %v12076_v38  ;;  %v13787_v13 = vand.u32 4294901760, %v12103_v34 }
 0x660   : > { %3578 = vmatmul.mubr.f32.gmra.mrb[16].mxu0 %v3577_v39  ;;  %v12132_v50 = vsub.f32 %v8343_v26, %v12105_v18  ;;  %v12134_v40 = vand.u32 4294901760, %v8345_v15  ;;  %v3601_v17 = vand.u32 4294901760, %v3600_v36  ;;  %v14040_v1 = vand.u32 4294901760, %v12083_v45 }
 0x661   : > { %v3606_v33 = vsub.f32 %v12076_v38, %v14039_v51  ;;  %9417 = vmatpush1.bf16.msra.mxu0 %v9416_v49  ;;  %3587 = vmatprep.mubr.f32.mxu0 %v3586_v10  ;;  %v12141_v0 = vsub.f32 %v3451_v54, %v12115_v21  ;;  %v3726_v51 = vand.u32 4294901760, %v3725_v24  ;;  %v3719_v20 = vand.u32 4294901760, %v3718_v12 }
 0x662   : > { %v3615_v19 = vsub.f32 %v12083_v45, %v14040_v1  ;;  %9418 = vmatprep.subr.bf16.mxu0 %v13888_v4  ;;  %v14042_v26 = vand.u32 4294901760, %v11877_v35  ;;  %v14043_v10 = vand.u32 4294901760, %v11882_v43  ;;  %v9419_v49 = vpack.c.bf16 %v3712_v56, %v3705_v60 }
 0x663   : > { %14041 = vst [vmem:[#allocation16_spill] sm:$0xff] %v12141_v0  ;;  %v3607_v1 = vand.u32 4294901760, %v3606_v33  ;;  %v3621_v54 = vsub.f32 %v12103_v34, %v13787_v13  ;;  %v13788_v24 = vand.u32 4294901760, %v12132_v50  ;;  %v12155_v12 = vsub.f32 %v8345_v15, %v12134_v40 }
 0x664   : > { %v3739_v9 = vsub.f32 %v11877_v35, %v14042_v26  ;;  %v3732_v36 = vsub.f32 %v11882_v43, %v14043_v10  ;;  %3593 = vmatmul.mubr.f32.gmra.mrb[18].mxu0 %v3592_v25  ;;  %v3616_v39 = vand.u32 4294901760, %v3615_v19  ;;  %v14044_v26 = vand.u32 4294901760, %v12113_v31 }
 0x665   : > { %9420 = vmatpush1.bf16.msra.mxu0 %v9419_v49  ;;  %3602 = vmatprep.mubr.f32.mxu0 %v3601_v17  ;;  %v13789_v60 = vand.u32 4294901760, %v12141_v0  ;;  %v9422_v33 = vpack.c.bf16 %v3726_v51, %v3719_v20  ;;  %v14045_v10 = vand.u32 4294901760, %v11902_v42  ;;  %v14046_v15 = vand.u32 4294901760, %v11911_v59 }
 0x666   : > { %v3630_v45 = vsub.f32 %v12113_v31, %v14044_v26  ;;  %9421 = vmatprep.subr.bf16.mxu0 %v13888_v4  ;;  %v3740_v25 = vand.u32 4294901760, %v3739_v9  ;;  %v3733_v56 = vand.u32 4294901760, %v3732_v36  ;;  %v3622_v19 = vand.u32 4294901760, %v3621_v54 }
 0x667   : > { %v3753_v13 = vsub.f32 %v11902_v42, %v14045_v10  ;;  %v3746_v17 = vsub.f32 %v11911_v59, %v14046_v15  ;;  %v3636_v49 = vsub.f32 %v12132_v50, %v13788_v24  ;;  %v3650_v26 = vand.u32 4294901760, %v12155_v12 }
 0x668   : > { %3608 = vmatmul.mubr.f32.gmra.mrb[20].mxu0 %v3607_v1  ;;  %v3631_v51 = vand.u32 4294901760, %v3630_v45  ;;  %v3645_v20 = vsub.f32 %v12141_v0, %v13789_v60  ;;  %v14047_v9 = vand.u32 4294901760, %v11938_v62  ;;  %v14048_v1 = vand.u32 4294901760, %v11945_v32 }
 0x669   : > { %9423 = vmatpush1.bf16.msra.mxu0 %v9422_v33  ;;  %3617 = vmatprep.mubr.f32.mxu0 %v3616_v39  ;;  %v3754_v10 = vand.u32 4294901760, %v3753_v13  ;;  %v3747_v15 = vand.u32 4294901760, %v3746_v17  ;;  %v9425_v24 = vpack.c.bf16 %v3740_v25, %v3733_v56  ;;  %v3637_v39 = vand.u32 4294901760, %v3636_v49 }
 0x66a   : > { %v3767_v36 = vsub.f32 %v11938_v62, %v14047_v9  ;;  %v3760_v54 = vsub.f32 %v11945_v32, %v14048_v1  ;;  %9424 = vmatprep.subr.bf16.mxu0 %v13888_v4  ;;  %v3651_v45 = vsub.f32 %v12155_v12, %v3650_v26  ;;  %v3646_v33 = vand.u32 4294901760, %v3645_v20 }
 0x66b   : > { %v14049_v1 = vand.u32 4294901760, %v11972_v3  ;;  %v14050_v13 = vand.u32 4294901760, %v11983_v44  ;;  %v9428_v56 = vpack.c.bf16 %v3754_v10, %v3747_v15 }
 0x66c   : > { %3623 = vmatmul.mubr.f32.gmra.mrb[22].mxu0 %v3622_v19  ;;  %v3768_v60 = vand.u32 4294901760, %v3767_v36  ;;  %v3761_v9 = vand.u32 4294901760, %v3760_v54  ;;  %v3652_v17 = vand.u32 4294901760, %v3651_v45  ;;  %v14052_v36 = vand.u32 4294901760, %v12020_v53 }
 0x66d   : > { %9426 = vmatpush1.bf16.msra.mxu0 %v9425_v24  ;;  %3632 = vmatprep.mubr.f32.mxu0 %v3631_v51  ;;  %v3781_v0 = vsub.f32 %v11972_v3, %v14049_v1  ;;  %v3774_v25 = vsub.f32 %v11983_v44, %v14050_v13  ;;  %v14051_v51 = vand.u32 4294901760, %v12010_v58  ;;  %v14054_v45 = vpack.c.bf16 %v11779_v8, %v11784_v52  ;;  %v14069_v1 = vld [vmem:[#allocation27_spill] sm:$0xff] }
 0x66e   : > { %9427 = vmatprep.subr.bf16.mxu0 %v13888_v4  ;;  %v9431_v24 = vpack.c.bf16 %v3768_v60, %v3761_v9  ;;  %v3788_v54 = vsub.f32 %v12020_v53, %v14052_v36  ;;  %v14053_v60 = vpack.c.bf16 %v11762_v22, %v11768_v55  ;;  %v9449_v22 = vpack.c.bf16 %v11836_v37, %v11841_v28  ;;  %v14055_v28 = vld [vmem:[#allocation24_spill] sm:$0xff]  ;;  %v14068_v9 = vld [vmem:[#allocation15_spill] sm:$0xff]  ;;  %v12313_v36 = vld [vmem:[%s13871_s6] sm:$0xff] }
 0x66f   : > { %v3782_v19 = vand.u32 4294901760, %v3781_v0  ;;  %v3775_v49 = vand.u32 4294901760, %v3774_v25  ;;  %v3795_v20 = vsub.f32 %v12010_v58, %v14051_v51  ;;  %v9452_v55 = vpack.c.bf16 %v11857_v14, %v11862_v63  ;;  %v14057_v14 = vld [vmem:[#allocation32_spill] sm:$0xff]  ;;  %v14058_v63 = vld [vmem:[#allocation19_spill] sm:$0xff]  ;;  %v14072_v51 = vld [vmem:[#allocation41_spill] sm:$0xff] }
 0x670   : > { %3638 = vmatmul.mubr.f32.gmra.mrb[24].mxu0 %v3637_v39  ;;  %v3789_v15 = vand.u32 4294901760, %v3788_v54  ;;  %v9455_v8 = vpack.c.bf16 %v11877_v35, %v11882_v43  ;;  %v9458_v52 = vpack.c.bf16 %v11902_v42, %v11911_v59  ;;  %v9467_v37 = vpack.c.bf16 %v12010_v58, %v12020_v53  ;;  %v14061_v53 = vld [vmem:[#allocation26_spill] sm:$0xff]  ;;  %v14063_v43 = vld [vmem:[#allocation31_spill] sm:$0xff]  ;;  %v14065_v59 = vld [vmem:[#allocation40_spill] sm:$0xff] }
 0x671   : > { %9429 = vmatpush1.bf16.msra.mxu0 %v9428_v56  ;;  %3647 = vmatprep.mubr.f32.mxu0 %v3646_v33  ;;  %v3796_v10 = vand.u32 4294901760, %v3795_v20  ;;  %v9434_v39 = vpack.c.bf16 %v3782_v19, %v3775_v49  ;;  %v9446_v33 = vpack.c.bf16 %v11824_v46, %v11828_v23  ;;  %v9461_v46 = vpack.c.bf16 %v11938_v62, %v11945_v32  ;;  %v14056_v32 = vld [vmem:[#allocation18_spill] sm:$0xff]  ;;  %v14060_v62 = vld [vmem:[#allocation23_spill] sm:$0xff]  ;;  %v14066_v58 = vld [vmem:[#allocation13_spill] sm:$0xff] }
 0x672   : > { %9430 = vmatprep.subr.bf16.mxu0 %v13888_v4  ;;  %v9464_v23 = vpack.c.bf16 %v11972_v3, %v11983_v44  ;;  %v14059_v3 = vld [vmem:[#allocation35_spill] sm:$0xff]  ;;  %v14062_v35 = vld [vmem:[#allocation38_spill] sm:$0xff]  ;;  %v10661_v13 = vmov 1   ;;  %v12296_v19 = vld [vmem:[%s13871_s6 + $0x30] sm:$0xff]  ;;  %v14073_v20 = vand.u32 4294901760, %v11814_v47 }
 0x673   : > { %v9437_v0 = vpack.c.bf16 %v3796_v10, %v3789_v15  ;;  %v14064_v42 = vld [vmem:[#allocation39_spill] sm:$0xff]  ;;  %10396 = vset.pattern.permute.xlu1 %v10661_v13  ;;  %10395 = vset.pattern.permute.xlu0 %v10661_v13  ;;  %v12287_v56 = vld [vmem:[%s13871_s6 + $0x20] sm:$0xff]  ;;  %v12303_v49 = vld [vmem:[%s13871_s6 + $0x38] sm:$0xff] }
 0x674   : > { %3653 = vmatmul.mubr.f32.gmra.mrb[26].mxu0 %v3652_v17  ;;  %v14067_v44 = vld [vmem:[#allocation43_spill] sm:$0xff]  ;;  %3414 = vperm.xlu0 %10395, %v12287_v56   ;;  %v14070_v17 = vld [vmem:[#allocation46_spill] sm:$0xff]  ;;  %v14074_v10 = vld [vmem:[#allocation28_spill] sm:$0xff] }
 0x675   : > { %9432 = vmatpush1.bf16.msra.mxu0 %v9431_v24  ;;  %3823 = vmatprep.mubr.f32.mxu0 %v11809_v41  ;;  %v12279_v25 = vld [vmem:[%s13871_s6 + $0x28] sm:$0xff]  ;;  %v14071_v24 = vld [vmem:[#allocation16_spill] sm:$0xff]  ;;  %v12333_v15 = vld [vmem:[%s13871_s6 + $0x18] sm:$0xff] }
 0x676   : > { %9433 = vmatprep.subr.bf16.mxu0 %v13888_v4  ;;  %3418 = vperm.xlu1 %10396, %v12279_v25   ;;  %v12319_v54 = vld [vmem:[%s13871_s6 + $0x8] sm:$0xff] }
 0x678   : > { %3426 = vperm.xlu0 %10395, %v12303_v49  }
 0x679   : > { %9435 = vmatpush1.bf16.msra.mxu0 %v9434_v39  ;;  %v14075_v39 = vld [vmem:[#allocation42_spill] sm:$0xff] }
 0x67a   : > { %9436 = vmatprep.subr.bf16.mxu0 %v13888_v4  ;;  %3422 = vperm.xlu1 %10396, %v12296_v19  }
 0x67c   : > { %3402 = vperm.xlu0 %10395, %v12319_v54  }
 0x67d   : > { %9438 = vmatpush1.bf16.msra.mxu0 %v9437_v0  ;;  %v10491_v0 = vld [vmem:[%s13872_s8] sm:$0xff] }
 0x67e   : > { %9439 = vmatprep.subr.bf16.mxu0 %v13888_v4  ;;  %3398 = vperm.xlu1 %10396, %v12313_v36  }
 0x680   : > { %3825 = vmatmul.mubr.f32.vlgmr.msra.gmra.mrb[12].mxu0 %v11843_v16  ;;  %3410 = vperm.xlu0 %10395, %v12333_v15  }
 0x681   : > { %9441 = vmatpush1.bf16.msra.mxu0 %v14053_v60  ;;  %3830 = vmatprep.mubr.f32.mxu0 %v11884_v6  ;;  %v14076_v60 = vand.u32 4294901760, %v14055_v28 }
 0x682   : > { %9442 = vmatprep.subr.bf16.mxu0 %v13888_v4 }
 0x684   : > { %3832 = vmatmul.mubr.f32.gmra.mrb[14].mxu0 %v11916_v11 }
 0x685   : > { %9444 = vmatpush1.bf16.msra.mxu0 %v14054_v45  ;;  %3837 = vmatprep.mubr.f32.mxu0 %v11935_v30  ;;  %v10492_v45 = vld [vmem:[%s13872_s8 + $0x8] sm:$0xff] }
 0x686   : > { %9445 = vmatprep.subr.bf16.mxu0 %v13888_v4  ;;  %4597 = vperm.xlu0 %10395, %v10492_v45   ;;  %v14095_v45 = vld [vmem:[#allocation20_spill] sm:$0xff] }
 0x688   : > { %3839 = vmatmul.mubr.f32.gmra.mrb[16].mxu0 %v11941_v5 }
 0x689   : > { %9447 = vmatpush1.bf16.msra.mxu0 %v9446_v33  ;;  %3844 = vmatprep.mubr.f32.mxu0 %v11958_v2  ;;  %v14077_v33 = vld [vmem:[#allocation36_spill] sm:$0xff] }
 0x68a   : > { %9448 = vmatprep.subr.bf16.mxu0 %v13888_v4 }
 0x68c   : > { %3846 = vmatmul.mubr.f32.gmra.mrb[18].mxu0 %v11978_v48 }
 0x68d   : > { %9450 = vmatpush1.bf16.msra.mxu0 %v9449_v22  ;;  %3851 = vmatprep.mubr.f32.mxu0 %v12005_v27  ;;  %v14078_v22 = vand.u32 4294901760, %v14057_v14 }
 0x68e   : > { %9451 = vmatprep.subr.bf16.mxu0 %v13888_v4 }
 0x690   : > { %3853 = vmatmul.mubr.f32.gmra.mrb[20].mxu0 %v12030_v61 }
 0x691   : > { %9453 = vmatpush1.bf16.msra.mxu0 %v9452_v55  ;;  %3858 = vmatprep.mubr.f32.mxu0 %v12046_v29  ;;  %v10493_v55 = vld [vmem:[%s13872_s8 + $0x10] sm:$0xff] }
 0x692   : > { %9454 = vmatprep.subr.bf16.mxu0 %v13888_v4 }
 0x694   : > { %3860 = vmatmul.mubr.f32.gmra.mrb[22].mxu0 %v12078_v57 }
 0x695   : > { %9456 = vmatpush1.bf16.msra.mxu0 %v9455_v8  ;;  %3865 = vmatprep.mubr.f32.mxu0 %v12085_v7  ;;  %v14079_v8 = vand.u32 4294901760, %v14058_v63 }
 0x696   : > { %9457 = vmatprep.subr.bf16.mxu0 %v13888_v4 }
 0x698   : > { %3867 = vmatmul.mubr.f32.gmra.mrb[24].mxu0 %v12105_v18 }
 0x699   : > { %9459 = vmatpush1.bf16.msra.mxu0 %v9458_v52  ;;  %3872 = vmatprep.mubr.f32.mxu0 %v12115_v21  ;;  %v10494_v52 = vld [vmem:[%s13872_s8 + $0x18] sm:$0xff] }
 0x69a   : > { %9460 = vmatprep.subr.bf16.mxu0 %v13888_v4  ;;  %4605 = vperm.xlu0 %10395, %v10494_v52  }
 0x69c   : > { %3874 = vmatmul.mubr.f32.gmra.mrb[26].mxu0 %v12134_v40 }
 0x69d   : > { %9462 = vmatpush1.bf16.msra.mxu0 %v9461_v46  ;;  %3985 = vmatprep.mubr.f32.mxu0 %v11814_v47  ;;  %v12327_v47 = vld [vmem:[%s13871_s6 + $0x10] sm:$0xff]  ;;  %v14080_v46 = vld [vmem:[#allocation21_spill] sm:$0xff] }
 0x69e   : > { %9463 = vmatprep.subr.bf16.mxu0 %v13888_v4  ;;  %3406 = vperm.xlu1 %10396, %v12327_v47  }
 0x6a1   : > { %9465 = vmatpush1.bf16.msra.mxu0 %v9464_v23  ;;  %v14081_v23 = vand.u32 4294901760, %v14060_v62 }
 0x6a2   : > { %9466 = vmatprep.subr.bf16.mxu0 %v13888_v4  ;;  %4593 = vperm.xlu1 %10396, %v10491_v0   ;;  %v14089_v0 = vld [vmem:[#allocation29_spill] sm:$0xff] }
 0x6a5   : > { %9468 = vmatpush1.bf16.msra.mxu0 %v9467_v37  ;;  %v14082_v37 = vand.u32 4294901760, %v14061_v53 }
 0x6a6   : > { %9469 = vmatprep.subr.bf16.mxu0 %v13888_v4  ;;  %4601 = vperm.xlu1 %10396, %v10493_v55  }
 0x6a8   : > { %3988 = vmatmul.mubr.f32.vlgmr.msra.gmra.mrb[12].mxu0 %v14055_v28  ;;  %v14083_v28 = vld [vmem:[#allocation22_spill] sm:$0xff] }
 0x6a9   : > { %9471 = vmatpush1.bf16.msra.mxu0 %v14056_v32  ;;  %3994 = vmatprep.mubr.f32.mxu0 %v14057_v14  ;;  %v14084_v14 = vand.u32 4294901760, %v14063_v43 }
 0x6aa   : > { %9472 = vmatprep.subr.bf16.mxu0 %v13888_v4 }
 0x6ac   : > { %3997 = vmatmul.mubr.f32.gmra.mrb[14].mxu0 %v14058_v63  ;;  %v14085_v63 = vand.u32 4294901760, %v14064_v42 }
 0x6ad   : > { %9474 = vmatpush1.bf16.msra.mxu0 %v14059_v3  ;;  %4003 = vmatprep.mubr.f32.mxu0 %v14060_v62  ;;  %v14087_v62 = vand.u32 4294901760, %v14066_v58 }
 0x6ae   : > { %9475 = vmatprep.subr.bf16.mxu0 %v13888_v4 }
 0x6b0   : > { %4006 = vmatmul.mubr.f32.gmra.mrb[16].mxu0 %v14061_v53  ;;  %v14088_v53 = vand.u32 4294901760, %v12076_v38 }
 0x6b1   : > { %9477 = vmatpush1.bf16.msra.mxu0 %v14062_v35  ;;  %4012 = vmatprep.mubr.f32.mxu0 %v14063_v43  ;;  %v14090_v43 = vand.u32 4294901760, %v14068_v9 }
 0x6b2   : > { %9478 = vmatprep.subr.bf16.mxu0 %v13888_v4 }
 0x6b4   : > { %4015 = vmatmul.mubr.f32.gmra.mrb[18].mxu0 %v14064_v42  ;;  %v14091_v42 = vand.u32 4294901760, %v12103_v34 }
 0x6b5   : > { %9480 = vmatpush1.bf16.msra.mxu0 %v14065_v59  ;;  %4021 = vmatprep.mubr.f32.mxu0 %v14066_v58  ;;  %v14093_v58 = vand.u32 4294901760, %v12113_v31 }
 0x6b6   : > { %9481 = vmatprep.subr.bf16.mxu0 %v13888_v4 }
 0x6b8   : > { %4024 = vmatmul.mubr.f32.gmra.mrb[20].mxu0 %v12076_v38  ;;  %v14094_v38 = vand.u32 4294901760, %v12132_v50 }
 0x6b9   : > { %9483 = vmatpush1.bf16.msra.mxu0 %v14067_v44  ;;  %4030 = vmatprep.mubr.f32.mxu0 %v14068_v9  ;;  %v14096_v9 = vand.u32 4294901760, %v14071_v24 }
 0x6ba   : > { %9484 = vmatprep.subr.bf16.mxu0 %v13888_v4 }
 0x6bc   : > { %4033 = vmatmul.mubr.f32.gmra.mrb[22].mxu0 %v12103_v34  ;;  %v14097_v34 = vld [vmem:[#allocation34_spill] sm:$0xff] }
 0x6bd   : > { %9486 = vmatpush1.bf16.msra.mxu0 %v14069_v1  ;;  %4039 = vmatprep.mubr.f32.mxu0 %v12113_v31  ;;  %v14098_v31 = vld [vmem:[#allocation44_spill] sm:$0xff] }
 0x6be   : > { %9487 = vmatprep.subr.bf16.mxu0 %v13888_v4 }
 0x6c0   : > { %4042 = vmatmul.mubr.f32.gmra.mrb[24].mxu0 %v12132_v50  ;;  %v14099_v50 = vld [vmem:[#allocation14_spill] sm:$0xff] }
 0x6c1   : > { %9489 = vmatpush1.bf16.msra.mxu0 %v14070_v17  ;;  %4048 = vmatprep.mubr.f32.mxu0 %v14071_v24 }
 0x6c2   : > { %9490 = vmatprep.subr.bf16.mxu0 %v13888_v4 }
 0x6c4   : > { %4051 = vmatmul.mubr.f32.gmra.mrb[26].mxu0 %v12155_v12 }
 0x6c5   : > { %9492 = vmatpush1.bf16.msra.mxu0 %v14072_v51  ;;  %4143 = vmatprep.mubr.f32.mxu0 %v14073_v20  ;;  %v14086_v20 = vld [vmem:[#allocation45_spill] sm:$0xff] }
 0x6c6   : > { %9493 = vmatprep.subr.bf16.mxu0 %v13888_v4 }
 0x6c9   : > { %9495 = vmatpush1.bf16.msra.mxu0 %v14074_v10 }
 0x6ca   : > { %9496 = vmatprep.subr.bf16.mxu0 %v13888_v4 }
 0x6cd   : > { %9498 = vmatpush1.bf16.msra.mxu0 %v14075_v39 }
 0x6ce   : > { %9499 = vmatprep.subr.bf16.mxu0 %v13888_v4 }
 0x6d0   : > { %4147 = vmatmul.mubr.f32.vlgmr.msra.gmra.mrb[12].mxu0 %v14076_v60  ;;  %v14092_v60 = vld [vmem:[#allocation37_spill] sm:$0xff] }
 0x6d1   : > { %9501 = vmatpush1.bf16.msra.mxu0 %v14077_v33  ;;  %4154 = vmatprep.mubr.f32.mxu0 %v14078_v22 }
 0x6d2   : > { %9502 = vmatprep.subr.bf16.mxu0 %v13888_v4 }
 0x6d4   : > { %4158 = vmatmul.mubr.f32.gmra.mrb[14].mxu0 %v14079_v8 }
 0x6d5   : > { %9504 = vmatpush1.bf16.msra.mxu0 %v14080_v46  ;;  %4165 = vmatprep.mubr.f32.mxu0 %v14081_v23 }
 0x6d6   : > { %9505 = vmatprep.subr.bf16.mxu0 %v13888_v4 }
 0x6d8   : > { %4169 = vmatmul.mubr.f32.gmra.mrb[16].mxu0 %v14082_v37 }
 0x6d9   : > { %9507 = vmatpush1.bf16.msra.mxu0 %v14083_v28  ;;  %4176 = vmatprep.mubr.f32.mxu0 %v14084_v14 }
 0x6da   : > { %9508 = vmatprep.subr.bf16.mxu0 %v13888_v4 }
 0x6dc   : > { %4180 = vmatmul.mubr.f32.gmra.mrb[18].mxu0 %v14085_v63 }
 0x6dd   : > { %9510 = vmatpush1.bf16.msra.mxu0 %v14086_v20  ;;  %4187 = vmatprep.mubr.f32.mxu0 %v14087_v62 }
 0x6de   : > { %9511 = vmatprep.subr.bf16.mxu0 %v13888_v4 }
 0x6e0   : > { %4191 = vmatmul.mubr.f32.gmra.mrb[20].mxu0 %v14088_v53 }
 0x6e1   : > { %9513 = vmatpush1.bf16.msra.mxu0 %v14089_v0  ;;  %4198 = vmatprep.mubr.f32.mxu0 %v14090_v43 }
 0x6e2   : > { %9514 = vmatprep.subr.bf16.mxu0 %v13888_v4 }
 0x6e4   : > { %4202 = vmatmul.mubr.f32.gmra.mrb[22].mxu0 %v14091_v42 }
 0x6e5   : > { %9516 = vmatpush1.bf16.msra.mxu0 %v14092_v60  ;;  %4209 = vmatprep.mubr.f32.mxu0 %v14093_v58 }
 0x6e6   : > { %9517 = vmatprep.subr.bf16.mxu0 %v13888_v4 }
 0x6e8   : > { %4213 = vmatmul.mubr.f32.gmra.mrb[24].mxu0 %v14094_v38  ;;  %v8352_v38 = vld [vmem:[%s13979_s7 + $0x48] sm:$0xff] }
 0x6e9   : > { %9519 = vmatpush1.bf16.msra.mxu0 %v14095_v45  ;;  %4220 = vmatprep.mubr.f32.mxu0 %v14096_v9 }
 0x6ea   : > { %9520 = vmatprep.subr.bf16.mxu0 %v13888_v4 }
 0x6ec   : > { %4224 = vmatmul.mubr.f32.gmra.mrb[26].mxu0 %v3650_v26 }
 0x6ed   : > { %9522 = vmatpush1.bf16.msra.mxu0 %v14097_v34  ;;  %4354 = vmatprep.mubr.f32.mxu0 %v11809_v41  ;;  %v8353_v34 = vld [vmem:[%s13979_s7 + $0x50] sm:$0xff] }
 0x6ee   : > { %9523 = vmatprep.subr.bf16.mxu0 %v13888_v4 }
 0x6f1   : > { %9525 = vmatpush1.bf16.msra.mxu0 %v14098_v31 }
 0x6f2   : > { %9526 = vmatprep.subr.bf16.mxu0 %v13888_v4 }
 0x6f3   : > { %v3415_v12 = vpop.permute.xlu0 %3414 }
 0x6f5   : > { %9528 = vmatpush1.bf16.msra.mxu0 %v14099_v50  ;;  %v4628_v50 = vsel %vm1278_vm5, %v8352_v38, 0 }
 0x6f6   : > { %9529 = vmatprep.subr.bf16.mxu0 %v13888_v4 }
 0x6f8   : > { %4356 = vmatmul.mubr.f32.vlgmr.msra.gmra.mrb[12].mxu0 %v11843_v16 }
 0x6f9   : > { %9531 = vmatpush1.bf16.msra.mxu0 %v14056_v32  ;;  %4361 = vmatprep.mubr.f32.mxu0 %v11884_v6 }
 0x6fa   : > { %9532 = vmatprep.subr.bf16.mxu0 %v13888_v4 }
 0x6fc   : > { %4363 = vmatmul.mubr.f32.gmra.mrb[14].mxu0 %v11916_v11 }
 0x6fd   : > { %9534 = vmatpush1.bf16.msra.mxu0 %v14059_v3  ;;  %4368 = vmatprep.mubr.f32.mxu0 %v11935_v30 }
 0x6fe   : > { %9535 = vmatprep.subr.bf16.mxu0 %v13888_v4 }
 0x700   : > { %4370 = vmatmul.mubr.f32.gmra.mrb[16].mxu0 %v11941_v5 }
 0x701   : > { %9537 = vmatpush1.bf16.msra.mxu0 %v14062_v35  ;;  %4375 = vmatprep.mubr.f32.mxu0 %v11958_v2 }
 0x702   : > { %9538 = vmatprep.subr.bf16.mxu0 %v13888_v4 }
 0x704   : > { %4377 = vmatmul.mubr.f32.gmra.mrb[18].mxu0 %v11978_v48 }
 0x705   : > { %9540 = vmatpush1.bf16.msra.mxu0 %v14065_v59  ;;  %4382 = vmatprep.mubr.f32.mxu0 %v12005_v27 }
 0x706   : > { %9541 = vmatprep.subr.bf16.mxu0 %v13888_v4 }
 0x708   : > { %4384 = vmatmul.mubr.f32.gmra.mrb[20].mxu0 %v12030_v61 }
 0x709   : > { %9543 = vmatpush1.bf16.msra.mxu0 %v14067_v44  ;;  %4389 = vmatprep.mubr.f32.mxu0 %v12046_v29 }
 0x70a   : > { %9544 = vmatprep.subr.bf16.mxu0 %v13888_v4 }
 0x70c   : > { %4391 = vmatmul.mubr.f32.gmra.mrb[22].mxu0 %v12078_v57 }
 0x70d   : > { %9546 = vmatpush1.bf16.msra.mxu0 %v14069_v1  ;;  %4396 = vmatprep.mubr.f32.mxu0 %v12085_v7 }
 0x70e   : > { %9547 = vmatprep.subr.bf16.mxu0 %v13888_v4 }
 0x710   : > { %4398 = vmatmul.mubr.f32.gmra.mrb[24].mxu0 %v12105_v18 }
 0x711   : > { %9549 = vmatpush1.bf16.msra.mxu0 %v14070_v17  ;;  %4403 = vmatprep.mubr.f32.mxu0 %v12115_v21 }
 0x712   : > { %9550 = vmatprep.subr.bf16.mxu0 %v13888_v4 }
 0x714   : > { %4405 = vmatmul.mubr.f32.gmra.mrb[26].mxu0 %v12134_v40 }
 0x715   : > { %9552 = vmatpush1.bf16.msra.mxu0 %v14072_v51  ;;  %4495 = vmatprep.mubr.f32.mxu0 %v11809_v41  ;;  %v3427_v51 = vpop.permute.xlu0 %3426 }
 0x716   : > { %9553 = vmatprep.subr.bf16.mxu0 %v13888_v4 }
 0x719   : > { %9555 = vmatpush1.bf16.msra.mxu0 %v14074_v10  ;;  %v3403_v37 = vpop.permute.xlu0 %3402 }
 0x71a   : > { %9556 = vmatprep.subr.bf16.mxu0 %v13888_v4 }
 0x71d   : > { %9558 = vmatpush1.bf16.msra.mxu0 %v14075_v39  ;;  %v3411_v42 = vpop.permute.xlu0 %3410 }
 0x720   : > { %4497 = vmatmul.mubr.f32.vlgmr.msra.gmra.mrb[12].mxu0 %v11843_v16 }
 0x721   : > { %4502 = vmatprep.mubr.f32.mxu0 %v11884_v6 }
 0x724   : > { %4504 = vmatmul.mubr.f32.gmra.mrb[14].mxu0 %v11916_v11 }
 0x725   : > { %4509 = vmatprep.mubr.f32.mxu0 %v11935_v30 }
 0x728   : > { %4511 = vmatmul.mubr.f32.gmra.mrb[16].mxu0 %v11941_v5 }
 0x729   : > { %4516 = vmatprep.mubr.f32.mxu0 %v11958_v2 }
 0x72c   : > { %4518 = vmatmul.mubr.f32.gmra.mrb[18].mxu0 %v11978_v48  ;;  %v8351_v48 = vld [vmem:[%s13979_s7 + $0x40] sm:$0xff] }
 0x72d   : > { %4523 = vmatprep.mubr.f32.mxu0 %v12005_v27  ;;  %v4625_v30 = vsel %vm1278_vm5, %v8351_v48, 0 }
 0x72e   : > { %v12455_v41 = vand.u32 4294901760, %v4625_v30 }
 0x730   : > { %4525 = vmatmul.mubr.f32.gmra.mrb[20].mxu0 %v12030_v61  ;;  %v12458_v16 = vsub.f32 %v4625_v30, %v12455_v41 }
 0x731   : > { %4530 = vmatprep.mubr.f32.mxu0 %v12046_v29 }
 0x732   : > { %v4719_v27 = vand.u32 4294901760, %v12458_v16 }
 0x734   : > { %4532 = vmatmul.mubr.f32.gmra.mrb[22].mxu0 %v12078_v57  ;;  %v4720_v61 = vsub.f32 %v12458_v16, %v4719_v27 }
 0x735   : > { %4537 = vmatprep.mubr.f32.mxu0 %v12085_v7 }
 0x736   : > { %v4721_v6 = vand.u32 4294901760, %v4720_v61  ;;  %v8354_v61 = vld [vmem:[%s13979_s7 + $0x58] sm:$0xff] }
 0x738   : > { %4539 = vmatmul.mubr.f32.gmra.mrb[24].mxu0 %v12105_v18 }
 0x739   : > { %4544 = vmatprep.mubr.f32.mxu0 %v12115_v21  ;;  %v3419_v21 = vpop.permute.xlu1 %3418 }
 0x73c   : > { %4546 = vmatmul.mubr.f32.gmra.mrb[26].mxu0 %v12134_v40 }
 0x73d   : > { %8853 = vmatprep.mubr.f32.mxu0 %v4721_v6  ;;  %v3423_v35 = vpop.permute.xlu1 %3422 }
 0x741   : > { %v3399_v39 = vpop.permute.xlu1 %3398 }
 0x745   : > { %v3407_v62 = vpop.permute.xlu1 %3406 }
 0x7f3   : > { %v4498_v5 = vpop.f32.mrb[12].mxu0 }
 0x7f4   : > { %v4500_v11 = vpop.f32.mrb[13].mxu0  ;;  %v9923_v8 = vadd.f32 %v4498_v5, %v3399_v39  ;;  %v4631_v5 = vsel %vm1278_vm5, %v8353_v34, 0 }
 0x7f5   : > { %v12475_v11 = vand.u32 4294901760, %v4628_v50 }
 0x7f7   : > { %v4505_v2 = vpop.f32.mrb[14].mxu0 }
 0x7f8   : > { %v4507_v29 = vpop.f32.mrb[15].mxu0  ;;  %v9924_v20 = vadd.f32 %v4505_v2, %v3403_v37  ;;  %v8355_v2 = vld [vmem:[%s13979_s7 + $0x60] sm:$0xff] }
 0x7fb   : > { %v4512_v57 = vpop.f32.mrb[16].mxu0 }
 0x7fc   : > { %v4514_v7 = vpop.f32.mrb[17].mxu0  ;;  %v9925_v43 = vadd.f32 %v4512_v57, %v3407_v62 }
 0x7fd   : > { %v4634_v7 = vsel %vm1278_vm5, %v8354_v61, 0 }
 0x7ff   : > { %v4519_v18 = vpop.f32.mrb[18].mxu0 }
 0x800   : > { %v4521_v40 = vpop.f32.mrb[19].mxu0  ;;  %v9926_v45 = vadd.f32 %v4519_v18, %v3411_v42 }
 0x801   : > { %v8356_v40 = vld [vmem:[%s13979_s7 + $0x68] sm:$0xff] }
 0x803   : > { %v4526_v26 = vpop.f32.mrb[20].mxu0 }
 0x804   : > { %v9927_v32 = vadd.f32 %v4526_v26, %v3415_v12  ;;  %v4528_v3 = vpop.f32.mrb[21].mxu0 }
 0x805   : > { %v12488_v3 = vsub.f32 %v4628_v50, %v12475_v11 }
 0x806   : > { %v8347_v59 = vmul.f32 -1.442695, %v9927_v32  ;;  %v4637_v32 = vsel %vm1278_vm5, %v8355_v2, 0 }
 0x807   : > { %v4533_v44 = vpop.f32.mrb[22].mxu0 }
 0x808   : > { %10433 = vpow2.f32 %v8347_v59  ;;  %v9928_v1 = vadd.f32 %v4533_v44, %v3419_v21  ;;  %v4535_v17 = vpop.f32.mrb[23].mxu0  ;;  %v12481_v21 = vand.u32 4294901760, %v4631_v5  ;;  %v8357_v59 = vld [vmem:[%s13979_s7 + $0x70] sm:$0xff] }
 0x80a   : > { %v8348_v24 = vmul.f32 -1.442695, %v9928_v1  ;;  %v12500_v39 = vsub.f32 %v4631_v5, %v12481_v21 }
 0x80b   : > { %v4540_v10 = vpop.f32.mrb[24].mxu0 }
 0x80c   : > { %10435 = vpow2.f32 %v8348_v24  ;;  %v9929_v33 = vadd.f32 %v4540_v10, %v3423_v35  ;;  %v4542_v22 = vpop.f32.mrb[25].mxu0  ;;  %v12490_v35 = vand.u32 4294901760, %v4634_v7  ;;  %v4640_v24 = vsel %vm1278_vm5, %v8356_v40, 0 }
 0x80d   : > { %v12511_v37 = vand.u32 4294901760, %v4640_v24 }
 0x80e   : > { %v8349_v55 = vmul.f32 -1.442695, %v9929_v33  ;;  %v12502_v33 = vand.u32 4294901760, %v4637_v32 }
 0x80f   : > { %v4547_v52 = vpop.f32.mrb[26].mxu0  ;;  %v12531_v50 = vsub.f32 %v4640_v24, %v12511_v37 }
 0x810   : > { %10437 = vpow2.f32 %v8349_v55  ;;  %v9930_v46 = vadd.f32 %v4547_v52, %v3427_v51  ;;  %v4549_v23 = vpop.f32.mrb[27].mxu0  ;;  %v8358_v51 = vld [vmem:[%s13979_s7 + $0x78] sm:$0xff]  ;;  %v4643_v52 = vsel %vm1278_vm5, %v8357_v59, 0  ;;  %v12520_v42 = vsub.f32 %v4637_v32, %v12502_v33 }
 0x811   : > { %10439 = vtanh.f32 %v9923_v8  ;;  %v12509_v23 = vsub.f32 %v4634_v7, %v12490_v35  ;;  %v4769_v32 = vand.u32 4294901760, %v12531_v50 }
 0x812   : > { %v10434_v28 = vpop.eup %10433  ;;  %v8350_v14 = vmul.f32 -1.442695, %v9930_v46  ;;  %v4729_v46 = vand.u32 4294901760, %v12488_v3 }
 0x813   : > { %v4567_v63 = vadd.f32 1.0, %v10434_v28  ;;  %v4646_v28 = vsel %vm1278_vm5, %v8358_v51, 0 }
 0x814   : > { %10441 = vpow2.f32 %v8350_v14  ;;  %v4730_v34 = vsub.f32 %v12488_v3, %v4729_v46 }
 0x815   : > { %10443 = vrcp.f32 %v4567_v63 }
 0x816   : > { %v10436_v53 = vpop.eup %10435  ;;  %10445 = vtanh.f32 %v9924_v20 }
 0x817   : > { %v4568_v0 = vadd.f32 1.0, %v10436_v53 }
 0x819   : > { %10447 = vrcp.f32 %v4568_v0 }
 0x81a   : > { %v10438_v60 = vpop.eup %10437  ;;  %10449 = vtanh.f32 %v9925_v43  ;;  %v4739_v43 = vand.u32 4294901760, %v12500_v39 }
 0x81b   : > { %v4569_v58 = vadd.f32 1.0, %v10438_v60  ;;  %v10440_v9 = vpop.eup %10439  ;;  %v12522_v60 = vand.u32 4294901760, %v4643_v52 }
 0x81c   : > { %v4740_v2 = vsub.f32 %v12500_v39, %v4739_v43 }
 0x81d   : > { %10451 = vrcp.f32 %v4569_v58 }
 0x81e   : > { %v10442_v31 = vpop.eup %10441  ;;  %10453 = vtanh.f32 %v9926_v45  ;;  %v4741_v24 = vand.u32 4294901760, %v4740_v2 }
 0x81f   : > { %v10444_v48 = vpop.eup %10443  ;;  %v4570_v30 = vadd.f32 1.0, %v10442_v31  ;;  %v4749_v31 = vand.u32 4294901760, %v12509_v23 }
 0x820   : > { %v4579_v6 = vmul.f32 %v10444_v48, %v10440_v9  ;;  %v10446_v29 = vpop.eup %10445  ;;  %v12533_v48 = vand.u32 4294901760, %v4646_v28 }
 0x821   : > { %10455 = vrcp.f32 %v4570_v30 }
 0x822   : > { %v4649_v57 = vand.u32 4294901760, %v4579_v6 }
 0x823   : > { %v10448_v18 = vpop.eup %10447 }
 0x824   : > { %v4580_v12 = vmul.f32 %v10448_v18, %v10446_v29  ;;  %v4799_v26 = vsub.f32 %v4579_v6, %v4649_v57  ;;  %v10450_v44 = vpop.eup %10449  ;;  %v4759_v29 = vand.u32 4294901760, %v12520_v42 }
 0x826   : > { %v4652_v1 = vand.u32 4294901760, %v4580_v12  ;;  %v4800_v17 = vand.u32 4294901760, %v4799_v26  ;;  %v4760_v51 = vsub.f32 %v12520_v42, %v4759_v29 }
 0x827   : > { %v10452_v10 = vpop.eup %10451 }
 0x828   : > { %v4581_v22 = vmul.f32 %v10452_v10, %v10450_v44  ;;  %v12504_v55 = vpack.c.bf16 %v4652_v1, %v4649_v57  ;;  %v4806_v8 = vsub.f32 %v4580_v12, %v4652_v1  ;;  %v10454_v14 = vpop.eup %10453  ;;  %v4801_v20 = vsub.f32 %v4799_v26, %v4800_v17 }
 0x829   : > { %v12540_v57 = vsub.f32 %v4643_v52, %v12522_v60  ;;  %v4731_v12 = vand.u32 4294901760, %v4730_v34  ;;  %v12550_v1 = vsub.f32 %v4646_v28, %v12533_v48  ;;  %v4770_v28 = vsub.f32 %v12531_v50, %v4769_v32 }
 0x82a   : > { %v4655_v63 = vand.u32 4294901760, %v4581_v22  ;;  %9560 = vmatprep.subr.bf16.mxu0 %v12504_v55  ;;  %v4807_v62 = vand.u32 4294901760, %v4806_v8  ;;  %v12515_v53 = vpack.c.bf16 %v4806_v8, %v4799_v26  ;;  %v4802_v61 = vand.u32 4294901760, %v4801_v20 }
 0x82b   : > { %v10456_v0 = vpop.eup %10455  ;;  %9562 = vmatpush3.bf16.msra.mxu0 %v12504_v55  ;;  %v4750_v26 = vsub.f32 %v12509_v23, %v4749_v31  ;;  %v4779_v10 = vand.u32 4294901760, %v12540_v57  ;;  %v4789_v20 = vand.u32 4294901760, %v12550_v1 }
 0x82c   : > { %v4582_v58 = vmul.f32 %v10456_v0, %v10454_v14  ;;  %v4808_v38 = vsub.f32 %v4806_v8, %v4807_v62  ;;  %v4813_v45 = vsub.f32 %v4581_v22, %v4655_v63  ;;  %v12524_v9 = vpack.c.bf16 %v4807_v62, %v4800_v17 }
 0x82d   : > { %v4751_v52 = vand.u32 4294901760, %v4750_v26  ;;  %v4761_v62 = vand.u32 4294901760, %v4760_v51  ;;  %v4780_v0 = vsub.f32 %v12540_v57, %v4779_v10 }
 0x82e   : > { %v4658_v30 = vand.u32 4294901760, %v4582_v58  ;;  %v4809_v6 = vand.u32 4294901760, %v4808_v38  ;;  %v4814_v5 = vand.u32 4294901760, %v4813_v45  ;;  %v4771_v38 = vand.u32 4294901760, %v4770_v28 }
 0x82f   : > { %v4781_v34 = vand.u32 4294901760, %v4780_v0 }
 0x830   : > { %v12542_v7 = vpack.c.bf16 %v4658_v30, %v4655_v63  ;;  %v9567_v18 = vpack.c.bf16 %v4809_v6, %v4802_v61  ;;  %v4820_v40 = vsub.f32 %v4582_v58, %v4658_v30  ;;  %v4815_v59 = vsub.f32 %v4813_v45, %v4814_v5  ;;  %v14104_v61 = vld [vmem:[#allocation33_spill] sm:$0xff] }
 0x832   : > { %9564 = vmatprep.subr.bf16.mxu0 %v12542_v7  ;;  %v4821_v44 = vand.u32 4294901760, %v4820_v40  ;;  %v9579_v17 = vpack.c.bf16 %v4820_v40, %v4813_v45  ;;  %v4816_v14 = vand.u32 4294901760, %v4815_v59  ;;  %v4790_v45 = vsub.f32 %v12550_v1, %v4789_v20 }
 0x833   : > { %9566 = vmatpush3.bf16.msra.mxu0 %v12542_v7 }
 0x834   : > { %9568 = vmatprep.subr.bf16.mxu0 %v9567_v18  ;;  %v4822_v22 = vsub.f32 %v4820_v40, %v4821_v44  ;;  %v9595_v8 = vpack.c.bf16 %v4821_v44, %v4814_v5  ;;  %v4791_v30 = vand.u32 4294901760, %v4790_v45  ;;  %v10663_v40 = vmov 2  }
 0x835   : > { %10397 = vset.pattern.permute.xlu1 %v10663_v40  ;;  %10398 = vset.pattern.permute.xlu0 %v10663_v40 }
 0x836   : > { %8854 = vmatmul.mubr.f32.vlgmr.msra.gmra.mrb[28].mxu0 %v4731_v12  ;;  %v4823_v63 = vand.u32 4294901760, %v4822_v22 }
 0x837   : > { %9570 = vmatpush3.bf16.msra.mxu0 %v9567_v18  ;;  %8856 = vmatprep.mubr.f32.mxu0 %v4741_v24 }
 0x838   : > { %v9571_v58 = vpack.c.bf16 %v4823_v63, %v4816_v14 }
 0x83a   : > { %8857 = vmatmul.mubr.f32.gmra.mrb[30].mxu0 %v4751_v52  ;;  %9572 = vmatprep.subr.bf16.mxu0 %v9571_v58 }
 0x83b   : > { %9574 = vmatpush3.bf16.msra.mxu0 %v9571_v58  ;;  %8859 = vmatprep.mubr.f32.mxu0 %v4761_v62 }
 0x83c   : > { %9576 = vmatprep.subr.bf16.mxu0 %v12515_v53 }
 0x83e   : > { %8860 = vmatmul.mubr.f32.gmra.mrb[8].mxu0 %v4771_v38 }
 0x83f   : > { %8862 = vmatprep.mubr.f32.mxu0 %v4781_v34 }
 0x842   : > { %8863 = vmatmul.mubr.f32.gmra.mrb[10].mxu0 %v4791_v30 }
 0x843   : > { %8873 = vmatprep.mubr.f32.mxu0 %v12455_v41 }
 0x846   : > { %8874 = vmatmul.mubr.f32.vlgmr.msra.gmra.mrb[28].mxu0 %v12475_v11 }
 0x847   : > { %9578 = vmatpush3.bf16.msra.mxu0 %v12515_v53  ;;  %8876 = vmatprep.mubr.f32.mxu0 %v12481_v21 }
 0x848   : > { %9580 = vmatprep.subr.bf16.mxu0 %v9579_v17 }
 0x84a   : > { %8877 = vmatmul.mubr.f32.gmra.mrb[30].mxu0 %v12490_v35 }
 0x84b   : > { %9582 = vmatpush3.bf16.msra.mxu0 %v9579_v17  ;;  %8879 = vmatprep.mubr.f32.mxu0 %v12502_v33 }
 0x84c   : > { %9584 = vmatprep.subr.bf16.mxu0 %v12504_v55 }
 0x84e   : > { %8880 = vmatmul.mubr.f32.gmra.mrb[8].mxu0 %v12511_v37 }
 0x84f   : > { %8882 = vmatprep.mubr.f32.mxu0 %v12522_v60 }
 0x852   : > { %8883 = vmatmul.mubr.f32.gmra.mrb[10].mxu0 %v12533_v48 }
 0x853   : > { %8893 = vmatprep.mubr.f32.mxu0 %v12458_v16  ;;  %v4598_v16 = vpop.permute.xlu0 %4597 }
 0x856   : > { %8894 = vmatmul.mubr.f32.vlgmr.msra.gmra.mrb[28].mxu0 %v12488_v3 }
 0x857   : > { %9586 = vmatpush3.bf16.msra.mxu0 %v12504_v55  ;;  %8896 = vmatprep.mubr.f32.mxu0 %v12500_v39 }
 0x858   : > { %9588 = vmatprep.subr.bf16.mxu0 %v12542_v7 }
 0x85a   : > { %8897 = vmatmul.mubr.f32.gmra.mrb[30].mxu0 %v12509_v23  ;;  %v4606_v23 = vpop.permute.xlu0 %4605 }
 0x85b   : > { %9590 = vmatpush3.bf16.msra.mxu0 %v12542_v7  ;;  %8899 = vmatprep.mubr.f32.mxu0 %v12520_v42 }
 0x85c   : > { %9592 = vmatprep.subr.bf16.mxu0 %v12524_v9 }
 0x85e   : > { %8900 = vmatmul.mubr.f32.gmra.mrb[8].mxu0 %v12531_v50  ;;  %v14103_v50 = vld [vmem:[#allocation30_spill] sm:$0xff] }
 0x85f   : > { %8902 = vmatprep.mubr.f32.mxu0 %v12540_v57 }
 0x862   : > { %8903 = vmatmul.mubr.f32.gmra.mrb[10].mxu0 %v12550_v1 }
 0x863   : > { %8913 = vmatprep.mubr.f32.mxu0 %v4719_v27  ;;  %v4594_v27 = vpop.permute.xlu1 %4593 }
 0x866   : > { %8914 = vmatmul.mubr.f32.vlgmr.msra.gmra.mrb[28].mxu0 %v4729_v46  ;;  %v14100_v46 = vld [vmem:[#allocation25_spill] sm:$0xff] }
 0x867   : > { %9594 = vmatpush3.bf16.msra.mxu0 %v12524_v9  ;;  %8916 = vmatprep.mubr.f32.mxu0 %v4739_v43  ;;  %v4602_v43 = vpop.permute.xlu1 %4601 }
 0x868   : > { %9596 = vmatprep.subr.bf16.mxu0 %v9595_v8 }
 0x86a   : > { %8917 = vmatmul.mubr.f32.gmra.mrb[30].mxu0 %v4749_v31 }
 0x86b   : > { %9598 = vmatpush3.bf16.msra.mxu0 %v9595_v8  ;;  %8919 = vmatprep.mubr.f32.mxu0 %v4759_v29 }
 0x86c   : > { %9600 = vmatprep.subr.bf16.mxu0 %v12504_v55 }
 0x86e   : > { %8920 = vmatmul.mubr.f32.gmra.mrb[8].mxu0 %v4769_v32 }
 0x86f   : > { %8922 = vmatprep.mubr.f32.mxu0 %v4779_v10 }
 0x872   : > { %8923 = vmatmul.mubr.f32.gmra.mrb[10].mxu0 %v4789_v20 }
 0x873   : > { %8933 = vmatprep.mubr.f32.mxu0 %v12455_v41 }
 0x876   : > { %8934 = vmatmul.mubr.f32.vlgmr.msra.gmra.mrb[28].mxu0 %v12475_v11 }
 0x877   : > { %9602 = vmatpush3.bf16.msra.mxu0 %v12504_v55  ;;  %8936 = vmatprep.mubr.f32.mxu0 %v12481_v21 }
 0x878   : > { %9604 = vmatprep.subr.bf16.mxu0 %v12542_v7 }
 0x87a   : > { %8937 = vmatmul.mubr.f32.gmra.mrb[30].mxu0 %v12490_v35 }
 0x87b   : > { %9606 = vmatpush3.bf16.msra.mxu0 %v12542_v7  ;;  %8939 = vmatprep.mubr.f32.mxu0 %v12502_v33 }
 0x87e   : > { %8940 = vmatmul.mubr.f32.gmra.mrb[8].mxu0 %v12511_v37 }
 0x87f   : > { %8942 = vmatprep.mubr.f32.mxu0 %v12522_v60 }
 0x882   : > { %8943 = vmatmul.mubr.f32.gmra.mrb[10].mxu0 %v12533_v48 }
 0x883   : > { %8953 = vmatprep.mubr.f32.mxu0 %v12455_v41 }
 0x886   : > { %8954 = vmatmul.mubr.f32.vlgmr.msra.gmra.mrb[28].mxu0 %v12475_v11 }
 0x887   : > { %8956 = vmatprep.mubr.f32.mxu0 %v12481_v21  ;;  %v14101_v21 = vld [vmem:[#allocation17_spill] sm:$0xff] }
 0x88a   : > { %8957 = vmatmul.mubr.f32.gmra.mrb[30].mxu0 %v12490_v35 }
 0x88b   : > { %8959 = vmatprep.mubr.f32.mxu0 %v12502_v33 }
 0x88e   : > { %8960 = vmatmul.mubr.f32.gmra.mrb[8].mxu0 %v12511_v37  ;;  %v14102_v37 = vld [vmem:[#allocation12_spill] sm:$0xff] }
 0x88f   : > { %8962 = vmatprep.mubr.f32.mxu0 %v12522_v60 }
 0x892   : > { %8963 = vmatmul.mubr.f32.gmra.mrb[10].mxu0 %v12533_v48 }
 0x959   : > { %v8955_v3 = vpop.f32.mrb[28].mxu0 }
 0x95a   : > { %v9931_v39 = vadd.f32 %v8955_v3, %v4598_v16  ;;  %v5388_v55 = vpop.f32.mrb[29].mxu0 }
 0x95b   : > { %v9932_v41 = vadd.f32 %v5388_v55, %v4594_v27 }
 0x95c   : > { %v5439_v11 = vadd.f32 %v9931_v39, %v14100_v46 }
 0x95d   : > { %v5438_v53 = vadd.f32 %v9932_v41, %v14101_v21  ;;  %v8958_v35 = vpop.f32.mrb[30].mxu0 }
 0x95e   : > { %v9933_v33 = vadd.f32 %v8958_v35, %v4606_v23  ;;  %v5400_v42 = vpop.f32.mrb[31].mxu0  ;;  %v5443_v9 = vmul.f32 %v14102_v37, %v5439_v11 }
 0x95f   : > { %v9934_v60 = vadd.f32 %v5400_v42, %v4602_v43  ;;  %v5442_v31 = vmul.f32 %v14102_v37, %v5438_v53 }
 0x960   : > { %v5441_v48 = vadd.f32 %v9933_v33, %v14103_v50  ;;  %5452 = vrot.lane.b32.xlu0 %v5443_v9, %s10662_s27  ;;  %v8360_v33 = vld [vmem:[%s13869_s5 + $0x108] sm:$0xff] }
 0x961   : > { %v5440_v6 = vadd.f32 %v9934_v60, %v14104_v61  ;;  %v12625_v5 = vpop.f32.mrb[8].mxu0  ;;  %5450 = vrot.lane.b32.xlu1 %v5442_v31, %s10662_s27  ;;  %v5574_v9 = vsel %vm1278_vm5, %v8360_v33, 0 }
 0x962   : > { %14105 = vst [vmem:[#allocation24_spill] sm:$0xff] %v12625_v5  ;;  %v12627_v2 = vpop.f32.mrb[9].mxu0  ;;  %v5445_v29 = vmul.f32 %v14102_v37, %v5441_v48  ;;  %v12691_v31 = vand.u32 4294901760, %v5574_v9 }
 0x963   : > { %14106 = vst [vmem:[#allocation18_spill] sm:$0xff] %v12627_v2  ;;  %v5444_v57 = vmul.f32 %v14102_v37, %v5440_v6 }
 0x964   : > { %5456 = vrot.lane.b32.xlu0 %v5445_v29, %s10662_s27  ;;  %v12696_v48 = vsub.f32 %v5574_v9, %v12691_v31 }
 0x965   : > { %v12631_v7 = vpop.f32.mrb[10].mxu0  ;;  %5454 = vrot.lane.b32.xlu1 %v5444_v57, %s10662_s27  ;;  %v1140_v57 = vld [vmem:[%s13872_s8 + $0x20] sm:$0xff]  ;;  %s13507_s27 = sand.u32 1, %s14223_s26  }
 0x966   : > { %14107 = vst [vmem:[#allocation32_spill] sm:$0xff] %v12631_v7  ;;  %v12633_v18 = vpop.f32.mrb[11].mxu0  ;;  %v13792_v61 = vand.u32 4294901760, %v12696_v48 }
 0x967   : > { %14108 = vst [vmem:[#allocation19_spill] sm:$0xff] %v12633_v18 }
 0x968   : > { %v5684_v6 = vsub.f32 %v12696_v48, %v13792_v61 }
 0x96a   : > { %v5685_v29 = vand.u32 4294901760, %v5684_v6 }
 0x96c   : > { %5686 = vmatprep.mubr.f32.mxu1 %v5685_v29 }
 0x9d2   : > { %v5453_v12 = vpop.permute.xlu0 %5452 }
 0x9d3   : > { %v5464_v26 = vsel %vm5462_vm7, 0.0, %v5453_v12  ;;  %v5451_v32 = vpop.permute.xlu1 %5450  ;;  %v14113_v12 = vmov 0  }
 0x9d4   : > { %v5469_v59 = vsel %vm5467_vm8, %v5464_v26, 0.0  ;;  %v5463_v44 = vsel %vm5462_vm7, 0.0, %v5451_v32 }
 0x9d5   : > { %v5468_v1 = vsel %vm5467_vm8, %v5463_v44, 0.0  ;;  %5478 = vrot.lane.b32.xlu0 %v5469_v59, %s13993_s23  ;;  %v5601_v17 = vand.u32 4294901760, %v5469_v59 }
 0x9d6   : > { %5476 = vrot.lane.b32.xlu1 %v5468_v1, %s13993_s23  ;;  %v5457_v24 = vpop.permute.xlu0 %5456  ;;  %v5598_v51 = vand.u32 4294901760, %v5468_v1 }
 0x9d7   : > { %v5466_v10 = vsel %vm5462_vm7, 0.0, %v5457_v24  ;;  %v5455_v22 = vpop.permute.xlu1 %5454  ;;  %v12644_v8 = vsub.f32 %v5469_v59, %v5601_v17 }
 0x9d8   : > { %v5471_v52 = vsel %vm5467_vm8, %v5466_v10, 0.0  ;;  %v5465_v14 = vsel %vm5462_vm7, 0.0, %v5455_v22  ;;  %v12648_v63 = vpack.c.bf16 %v5601_v17, %v5598_v51  ;;  %v12650_v28 = vsub.f32 %v5468_v1, %v5598_v51 }
 0x9d9   : > { %v5470_v20 = vsel %vm5467_vm8, %v5465_v14, 0.0  ;;  %5482 = vrot.lane.b32.xlu0 %v5471_v52, %s13993_s23  ;;  %v5607_v62 = vand.u32 4294901760, %v5471_v52  ;;  %v5812_v0 = vand.u32 4294901760, %v12644_v8 }
 0x9da   : > { %14109 = vst [vmem:[#allocation35_spill] sm:$0xff] %v12648_v63  ;;  %5480 = vrot.lane.b32.xlu1 %v5470_v20, %s13993_s23  ;;  %9609 = vmatpush1.bf16.msra.mxu1 %v12648_v63  ;;  %v5604_v58 = vand.u32 4294901760, %v5470_v20  ;;  %v5805_v38 = vand.u32 4294901760, %v12650_v28  ;;  %s13510_s23 = sshll.u32 %s10639_s15, 7 }
 0x9db   : > { %9610 = vmatprep.subr.bf16.mxu1 %v13888_v4  ;;  %v12661_v34 = vsub.f32 %v5471_v52, %v5607_v62  ;;  %v5813_v30 = vsub.f32 %v12644_v8, %v5812_v0  ;;  %s13522_s15 = scalar_lea.hbm %s13659_s12, %s13510_s23  ;;  %s13531_s6 = scalar_lea.hbm %s13660_s13, %s13510_s23 }
 0x9dc   : > { %v12664_v16 = vpack.c.bf16 %v5607_v62, %v5604_v58  ;;  %v12666_v27 = vsub.f32 %v5470_v20, %v5604_v58  ;;  %v5806_v3 = vsub.f32 %v12650_v28, %v5805_v38  ;;  %v12669_v39 = vpack.c.bf16 %v5812_v0, %v5805_v38 }
 0x9dd   : > { %5490 = vrot.lane.b32.xlu0 %v5469_v59, %s10660_s1  ;;  %v5814_v55 = vand.u32 4294901760, %v5813_v30  ;;  %v5826_v41 = vand.u32 4294901760, %v12661_v34 }
 0x9de   : > { %14110 = vst [vmem:[#allocation23_spill] sm:$0xff] %v12664_v16  ;;  %14111 = vst [vmem:[#allocation26_spill] sm:$0xff] %v12669_v39  ;;  %5488 = vrot.lane.b32.xlu1 %v5468_v1, %s10660_s1  ;;  %9612 = vmatpush1.bf16.msra.mxu1 %v12664_v16  ;;  %v5807_v46 = vand.u32 4294901760, %v5806_v3  ;;  %v5819_v11 = vand.u32 4294901760, %v12666_v27  ;;  %v8362_v3 = vld [vmem:[%s13869_s5 + $0x118] sm:$0xff] }
 0x9df   : > { %9613 = vmatprep.subr.bf16.mxu1 %v13888_v4  ;;  %v5827_v21 = vsub.f32 %v12661_v34, %v5826_v41  ;;  %v5577_v9 = vsel %vm1278_vm5, %v8362_v3, 0 }
 0x9e0   : > { %v12680_v53 = vpack.c.bf16 %v5814_v55, %v5807_v46  ;;  %v5820_v35 = vsub.f32 %v12666_v27, %v5819_v11  ;;  %v12683_v43 = vpack.c.bf16 %v5826_v41, %v5819_v11 }
 0x9e1   : > { %5494 = vrot.lane.b32.xlu0 %v5471_v52, %s10660_s1  ;;  %v5828_v42 = vand.u32 4294901760, %v5827_v21 }
 0x9e2   : > { %14112 = vst [vmem:[#allocation38_spill] sm:$0xff] %v12683_v43  ;;  %5492 = vrot.lane.b32.xlu1 %v5470_v20, %s10660_s1  ;;  %v5821_v60 = vand.u32 4294901760, %v5820_v35  ;;  %s10665_s1 = smov 112  }
 0x9e4   : > { %v12693_v50 = vpack.c.bf16 %v5828_v42, %v5821_v60 }
 0x9e5   : > { %5502 = vrot.lane.b32.xlu0 %v5469_v59, %s10664_s21 }
 0x9e6   : > { %5500 = vrot.lane.b32.xlu1 %v5468_v1, %s10664_s21 }
 0x9e9   : > { %5506 = vrot.lane.b32.xlu0 %v5471_v52, %s10664_s21 }
 0x9ea   : > { %5504 = vrot.lane.b32.xlu1 %v5470_v20, %s10664_s21  ;;  %s8153_s21 = sshll.u32 %s469_s18, 4  ;;  %s13524_s21 = int_to_ptr.vmem [resolvable:$true] %s8153_s21 }
 0x9eb   : > { %s10507_s26 = scalar_lea.vmem %s13524_s21, 128 }
 0x9ec   : > { %p10508_p3 = scmp.ne.s32.totalorder %s13524_s21, %s10507_s26 }
 0x9ed   : > { %5514 = vrot.lane.b32.xlu0 %v5469_v59, %s10665_s1 }
 0x9ee   : > { %5512 = vrot.lane.b32.xlu1 %v5468_v1, %s10665_s1  ;;  %p10509_p4 = pnand %p10508_p3, %p10784_p9 }
 0x9f0   : > { %p10510_p5 = pneg %p10509_p4 }
 0x9f1   : > { %5518 = vrot.lane.b32.xlu0 %v5471_v52, %s10665_s1 }
 0x9f2   : > { %5516 = vrot.lane.b32.xlu1 %v5470_v20, %s10665_s1  ;;  %s476_s1 = scalar_lea.vmem [#allocation8], %s13503_s29 }
 0x9f3   : > { %s8167_s4 = sshll.u32 %s476_s1, 4  ;;  %s13533_s4 = int_to_ptr.vmem [resolvable:$true] %s8167_s4 }
 0x9f5   : > { %5562 = vperm.xlu0 %10398, %v12279_v25   ;;  %v1141_v25 = vld [vmem:[%s13872_s8 + $0x28] sm:$0xff] }
 0x9f6   : > { %5558 = vperm.xlu1 %10397, %v12287_v56   ;;  %v1142_v56 = vld [vmem:[%s13872_s8 + $0x30] sm:$0xff] }
 0x9f9   : > { %5542 = vperm.xlu0 %10398, %v12313_v36  }
 0x9fa   : > { %5566 = vperm.xlu1 %10397, %v12296_v19   ;;  %v1143_v19 = vld [vmem:[%s13872_s8 + $0x38] sm:$0xff] }
 0x9fd   : > { %5550 = vperm.xlu0 %10398, %v12327_v47  }
 0x9fe   : > { %5570 = vperm.xlu1 %10397, %v12303_v49  }
 0xa01   : > { %10399 = vset.pattern.permute.xlu0 %v14113_v12 }
 0xa02   : > { %5546 = vperm.xlu1 %10397, %v12319_v54   ;;  %2463 = vperm.xlu0 %10399, %v1140_v57  }
 0xa06   : > { %5554 = vperm.xlu1 %10397, %v12333_v15   ;;  %10402 = vset.pattern.permute.xlu0 %v10661_v13 }
 0xa07   : > { %4613 = vperm.xlu0 %10402, %v1141_v25  }
 0xa0a   : > { %10400 = vset.pattern.permute.xlu1 %v14113_v12 }
 0xa0b   : > { %2468 = vperm.xlu1 %10400, %v1141_v25   ;;  %4617 = vperm.xlu0 %10402, %v1142_v56  }
 0xa0f   : > { %10401 = vset.pattern.permute.xlu1 %v10661_v13  ;;  %10405 = vset.pattern.permute.xlu0 %v10663_v40 }
 0xa10   : > { %4609 = vperm.xlu1 %10401, %v1140_v57   ;;  %6749 = vperm.xlu0 %10405, %v1140_v57  }
 0xa14   : > { %10403 = vset.pattern.permute.xlu1 %v14113_v12  ;;  %6761 = vperm.xlu0 %10405, %v1143_v19  }
 0xa15   : > { %2473 = vperm.xlu1 %10403, %v1142_v56  }
 0xa18   : > { %10408 = vset.pattern.permute.xlu0 %v14113_v12 }
 0xa19   : > { %2478 = vperm.xlu1 %10403, %v1143_v19  }
 0xa1d   : > { %10404 = vset.pattern.permute.xlu1 %v10661_v13 }
 0xa1e   : > { %4621 = vperm.xlu1 %10404, %v1143_v19   ;;  %v12792_v19 = vand.u32 4294901760, %v5577_v9 }
 0xa22   : > { %10406 = vset.pattern.permute.xlu1 %v10663_v40  ;;  %v8359_v40 = vld [vmem:[%s13869_s5 + $0x100] sm:$0xff] }
 0xa23   : > { %6753 = vperm.xlu1 %10406, %v1141_v25   ;;  %v12751_v14 = vand.u32 4294901760, %v8359_v40 }
 0xa25   : > { %v12773_v21 = vsub.f32 %v8359_v40, %v12751_v14 }
 0xa27   : > { %6757 = vperm.xlu1 %10406, %v1142_v56   ;;  %14118 = vst [vmem:[#allocation43_spill] sm:$0xff] %v12773_v21 }
 0xa2b   : > { %10407 = vset.pattern.permute.xlu1 %v14113_v12 }
 0xa47   : > { %v5479_v49 = vpop.permute.xlu0 %5478 }
 0xa48   : > { %v5613_v36 = vand.u32 4294901760, %v5479_v49  ;;  %v5477_v54 = vpop.permute.xlu1 %5476 }
 0xa49   : > { %v5610_v47 = vand.u32 4294901760, %v5477_v54 }
 0xa4a   : > { %v12732_v15 = vsub.f32 %v5479_v49, %v5613_v36  ;;  %v8364_v49 = vld [vmem:[%s13869_s5 + $0x128] sm:$0xff] }
 0xa4b   : > { %v12734_v26 = vpack.c.bf16 %v5613_v36, %v5610_v47  ;;  %v12736_v32 = vsub.f32 %v5477_v54, %v5610_v47  ;;  %v5483_v59 = vpop.permute.xlu0 %5482 }
 0xa4c   : > { %v13801_v13 = vand.u32 4294901760, %v12732_v15  ;;  %v5619_v44 = vand.u32 4294901760, %v5483_v59  ;;  %v5481_v1 = vpop.permute.xlu1 %5480 }
 0xa4d   : > { %14114 = vst [vmem:[#allocation31_spill] sm:$0xff] %v12734_v26  ;;  %v13800_v17 = vand.u32 4294901760, %v12736_v32  ;;  %v5616_v24 = vand.u32 4294901760, %v5481_v1  ;;  %9615 = vmatpush1.bf16.msra.mxu1 %v12734_v26 }
 0xa4e   : > { %v12744_v51 = vsub.f32 %v5483_v59, %v5619_v44  ;;  %9616 = vmatprep.subr.bf16.mxu1 %v13888_v4  ;;  %v13794_v59 = vand.u32 4294901760, %v12773_v21 }
 0xa4f   : > { %v12747_v10 = vpack.c.bf16 %v5619_v44, %v5616_v24  ;;  %v12749_v22 = vsub.f32 %v5481_v1, %v5616_v24  ;;  %v5491_v52 = vpop.permute.xlu0 %5490  ;;  %v12757_v20 = vpack.c.bf16 %v13801_v13, %v13800_v17  ;;  %v8361_v44 = vld [vmem:[%s13869_s5 + $0x110] sm:$0xff] }
 0xa50   : > { %v13799_v62 = vand.u32 4294901760, %v12744_v51  ;;  %v5625_v0 = vand.u32 4294901760, %v5491_v52  ;;  %v5489_v58 = vpop.permute.xlu1 %5488 }
 0xa51   : > { %14115 = vst [vmem:[#allocation39_spill] sm:$0xff] %v12747_v10  ;;  %14116 = vst [vmem:[#allocation40_spill] sm:$0xff] %v12757_v20  ;;  %v13796_v38 = vand.u32 4294901760, %v12749_v22  ;;  %v5622_v30 = vand.u32 4294901760, %v5489_v58  ;;  %9618 = vmatpush1.bf16.msra.mxu1 %v12747_v10 }
 0xa52   : > { %v12765_v55 = vsub.f32 %v5491_v52, %v5625_v0  ;;  %9619 = vmatprep.subr.bf16.mxu1 %v13888_v4 }
 0xa53   : > { %v12768_v41 = vpack.c.bf16 %v5625_v0, %v5622_v30  ;;  %v12770_v46 = vsub.f32 %v5489_v58, %v5622_v30  ;;  %v5495_v11 = vpop.permute.xlu0 %5494  ;;  %v12781_v60 = vpack.c.bf16 %v13799_v62, %v13796_v38  ;;  %v5580_v0 = vsel %vm1278_vm5, %v8364_v49, 0  ;;  %v8366_v58 = vld [vmem:[%s13869_s5 + $0x138] sm:$0xff] }
 0xa54   : > { %v13795_v35 = vand.u32 4294901760, %v12765_v55  ;;  %v5631_v33 = vand.u32 4294901760, %v5495_v11  ;;  %v5493_v42 = vpop.permute.xlu1 %5492  ;;  %v12843_v23 = vand.u32 4294901760, %v5580_v0  ;;  %v5583_v45 = vsel %vm1278_vm5, %v8366_v58, 0  ;;  %v8365_v58 = vld [vmem:[%s13869_s5 + $0x130] sm:$0xff] }
 0xa55   : > { %14117 = vst [vmem:[#allocation13_spill] sm:$0xff] %v12768_v41  ;;  %14119 = vst [vmem:[#allocation15_spill] sm:$0xff] %v12781_v60  ;;  %v13793_v6 = vand.u32 4294901760, %v12770_v46  ;;  %v5628_v29 = vand.u32 4294901760, %v5493_v42  ;;  %9621 = vmatpush1.bf16.msra.mxu1 %v12768_v41  ;;  %v12886_v5 = vand.u32 4294901760, %v8365_v58  ;;  %v8374_v41 = vld [vmem:[%s13869_s5 + $0x178] sm:$0xff] }
 0xa56   : > { %v12785_v57 = vsub.f32 %v5495_v11, %v5631_v33  ;;  %9622 = vmatprep.subr.bf16.mxu1 %v13888_v4  ;;  %v12878_v18 = vsub.f32 %v5580_v0, %v12843_v23 }
 0xa57   : > { %v12788_v12 = vpack.c.bf16 %v5631_v33, %v5628_v29  ;;  %v12790_v25 = vsub.f32 %v5493_v42, %v5628_v29  ;;  %v5503_v56 = vpop.permute.xlu0 %5502  ;;  %v12806_v1 = vpack.c.bf16 %v13795_v35, %v13793_v6  ;;  %v12822_v33 = vsub.f32 %v5577_v9, %v12792_v19  ;;  %v8363_v29 = vld [vmem:[%s13869_s5 + $0x120] sm:$0xff] }
 0xa58   : > { %v13798_v36 = vand.u32 4294901760, %v12785_v57  ;;  %v5637_v54 = vand.u32 4294901760, %v5503_v56  ;;  %v5501_v47 = vpop.permute.xlu1 %5500  ;;  %v12824_v42 = vand.u32 4294901760, %v8361_v44  ;;  %14128 = vst [vmem:[#allocation22_spill] sm:$0xff] %v12878_v18 }
 0xa59   : > { %14120 = vst [vmem:[#allocation27_spill] sm:$0xff] %v12788_v12  ;;  %14121 = vst [vmem:[#allocation46_spill] sm:$0xff] %v12806_v1  ;;  %v13797_v40 = vand.u32 4294901760, %v12790_v25  ;;  %v5634_v24 = vand.u32 4294901760, %v5501_v47  ;;  %9624 = vmatpush1.bf16.msra.mxu1 %v12788_v12 }
 0xa5a   : > { %v12810_v52 = vsub.f32 %v5503_v56, %v5637_v54  ;;  %9625 = vmatprep.subr.bf16.mxu1 %v13888_v4  ;;  %14123 = vst [vmem:[#allocation41_spill] sm:$0xff] %v12822_v33  ;;  %v12857_v62 = vsub.f32 %v8361_v44, %v12824_v42 }
 0xa5b   : > { %v12817_v30 = vpack.c.bf16 %v5637_v54, %v5634_v24  ;;  %v12819_v3 = vsub.f32 %v5501_v47, %v5634_v24  ;;  %v5507_v11 = vpop.permute.xlu0 %5506  ;;  %v12833_v54 = vsub.f32 %v12773_v21, %v13794_v59  ;;  %v12839_v9 = vpack.c.bf16 %v13798_v36, %v13797_v40 }
 0xa5c   : > { %v13804_v56 = vand.u32 4294901760, %v12810_v52  ;;  %v5643_v49 = vand.u32 4294901760, %v5507_v11  ;;  %v5505_v61 = vpop.permute.xlu1 %5504  ;;  %v12849_v59 = vand.u32 4294901760, %v8363_v29  ;;  %14126 = vst [vmem:[#allocation36_spill] sm:$0xff] %v12857_v62  ;;  %v14138_v39 = vand.u32 4294901760, %v12857_v62 }
 0xa5d   : > { %14122 = vst [vmem:[#allocation16_spill] sm:$0xff] %v12817_v30  ;;  %14124 = vst [vmem:[#allocation28_spill] sm:$0xff] %v12839_v9  ;;  %v13803_v47 = vand.u32 4294901760, %v12819_v3  ;;  %v5640_v24 = vand.u32 4294901760, %v5505_v61  ;;  %9627 = vmatpush1.bf16.msra.mxu1 %v12817_v30  ;;  %v5691_v37 = vand.u32 4294901760, %v12833_v54  ;;  %v14131_v54 = vand.u32 4294901760, %v12822_v33 }
 0xa5e   : > { %v12846_v6 = vsub.f32 %v5507_v11, %v5643_v49  ;;  %9628 = vmatprep.subr.bf16.mxu1 %v13888_v4  ;;  %v8368_v11 = vld [vmem:[%s13869_s5 + $0x148] sm:$0xff]  ;;  %v12884_v7 = vsub.f32 %v8363_v29, %v12849_v59  ;;  %v8370_v29 = vld [vmem:[%s13869_s5 + $0x158] sm:$0xff]  ;;  %v8369_v30 = vld [vmem:[%s13869_s5 + $0x150] sm:$0xff] }
 0xa5f   : > { %v12851_v35 = vpack.c.bf16 %v5643_v49, %v5640_v24  ;;  %v12853_v38 = vsub.f32 %v5505_v61, %v5640_v24  ;;  %v5515_v40 = vpop.permute.xlu0 %5514  ;;  %v12866_v61 = vand.u32 4294901760, %v5583_v45  ;;  %v12872_v44 = vpack.c.bf16 %v13804_v56, %v13803_v47 }
 0xa60   : > { %v5649_v49 = vand.u32 4294901760, %v5515_v40  ;;  %v5513_v13 = vpop.permute.xlu1 %5512  ;;  %14129 = vst [vmem:[#allocation45_spill] sm:$0xff] %v12884_v7  ;;  %v5586_v47 = vsel %vm1278_vm5, %v8368_v11, 0  ;;  %v5699_v0 = vsub.f32 %v12822_v33, %v14131_v54  ;;  %v5589_v54 = vsel %vm1278_vm5, %v8370_v29, 0 }
 0xa61   : > { %14125 = vst [vmem:[#allocation42_spill] sm:$0xff] %v12851_v35  ;;  %14127 = vst [vmem:[#allocation21_spill] sm:$0xff] %v12872_v44  ;;  %v5646_v36 = vand.u32 4294901760, %v5513_v13  ;;  %9630 = vmatpush1.bf16.msra.mxu1 %v12851_v35  ;;  %v12902_v11 = vsub.f32 %v5583_v45, %v12866_v61  ;;  %v12913_v20 = vand.u32 4294901760, %v5586_v47  ;;  %v8367_v45 = vld [vmem:[%s13869_s5 + $0x140] sm:$0xff] }
 0xa62   : > { %v12880_v17 = vsub.f32 %v5515_v40, %v5649_v49  ;;  %9631 = vmatprep.subr.bf16.mxu1 %v13888_v4  ;;  %v5700_v43 = vand.u32 4294901760, %v5699_v0  ;;  %v12938_v35 = vand.u32 4294901760, %v8367_v45 }
 0xa63   : > { %v12889_v56 = vpack.c.bf16 %v5649_v49, %v5646_v36  ;;  %v12891_v24 = vsub.f32 %v5513_v13, %v5646_v36  ;;  %v5519_v2 = vpop.permute.xlu0 %5518  ;;  %14132 = vst [vmem:[#allocation37_spill] sm:$0xff] %v12902_v11  ;;  %v14133_v13 = vand.u32 4294901760, %v12853_v38  ;;  %v14134_v36 = vand.u32 4294901760, %v12846_v6 }
 0xa64   : > { %v5655_v9 = vand.u32 4294901760, %v5519_v2  ;;  %v5517_v1 = vpop.permute.xlu1 %5516  ;;  %v14150_v0 = vand.u32 4294901760, %v12902_v11 }
 0xa65   : > { %14130 = vst [vmem:[#allocation29_spill] sm:$0xff] %v12889_v56  ;;  %v12908_v49 = vpack.c.bf16 %v14134_v36, %v14133_v13  ;;  %v5652_v40 = vand.u32 4294901760, %v5517_v1  ;;  %9633 = vmatpush1.bf16.msra.mxu1 %v12889_v56  ;;  %v12923_v36 = vsub.f32 %v8365_v58, %v12886_v5  ;;  %v5705_v56 = vsub.f32 %v12857_v62, %v14138_v39 }
 0xa66   : > { %v12918_v44 = vsub.f32 %v5519_v2, %v5655_v9  ;;  %9634 = vmatprep.subr.bf16.mxu1 %v13888_v4  ;;  %v8372_v2 = vld [vmem:[%s13869_s5 + $0x168] sm:$0xff]  ;;  %v14142_v39 = vand.u32 4294901760, %v12878_v18  ;;  %v12952_v13 = vsub.f32 %v5586_v47, %v12913_v20  ;;  %v12954_v58 = vand.u32 4294901760, %v5589_v54 }
 0xa67   : > { %14135 = vst [vmem:[#allocation20_spill] sm:$0xff] %v12908_v49  ;;  %14136 = vst [vmem:[#allocation34_spill] sm:$0xff] %v12923_v36  ;;  %v12926_v49 = vpack.c.bf16 %v5655_v9, %v5652_v40  ;;  %v12928_v60 = vsub.f32 %v5517_v1, %v5652_v40  ;;  %v14139_v9 = vand.u32 4294901760, %v12891_v24  ;;  %v14140_v1 = vand.u32 4294901760, %v12880_v17 }
 0xa68   : > { %v5714_v29 = vsub.f32 %v12878_v18, %v14142_v39  ;;  %14143 = vst [vmem:[#allocation25_spill] sm:$0xff] %v12952_v13  ;;  %v14145_v39 = vand.u32 4294901760, %v12732_v15 }
 0xa69   : > { %14137 = vst [vmem:[#allocation44_spill] sm:$0xff] %v12926_v49  ;;  %v12944_v40 = vpack.c.bf16 %v14140_v1, %v14139_v9  ;;  %9636 = vmatpush1.bf16.msra.mxu1 %v12926_v49  ;;  %v14144_v9 = vand.u32 4294901760, %v12884_v7  ;;  %v14146_v49 = vand.u32 4294901760, %v12736_v32  ;;  %v14147_v10 = vand.u32 4294901760, %v12928_v60 }
 0xa6a   : > { %9637 = vmatprep.subr.bf16.mxu1 %v13888_v4  ;;  %v5841_v47 = vsub.f32 %v12732_v15, %v14145_v39  ;;  %v5729_v39 = vsub.f32 %v12902_v11, %v14150_v0  ;;  %v5715_v18 = vand.u32 4294901760, %v5714_v29  ;;  %v14152_v0 = vand.u32 4294901760, %v12923_v36 }
 0xa6b   : > { %14141 = vst [vmem:[#allocation14_spill] sm:$0xff] %v12944_v40  ;;  %v5720_v1 = vsub.f32 %v12884_v7, %v14144_v9  ;;  %v5592_v40 = vsel %vm1278_vm5, %v8372_v2, 0  ;;  %v5834_v12 = vsub.f32 %v12736_v32, %v14146_v49  ;;  %v14148_v9 = vand.u32 4294901760, %v12918_v44 }
 0xa6c   : > { %5692 = vmatmul.mubr.f32.vlgmr.msra.gmra.mrb[20].mxu1 %v5691_v37  ;;  %v5706_v2 = vand.u32 4294901760, %v5705_v56  ;;  %v12984_v7 = vsub.f32 %v8367_v45, %v12938_v35  ;;  %v12986_v49 = vand.u32 4294901760, %v8369_v30  ;;  %v12993_v37 = vand.u32 4294901760, %v5592_v40  ;;  %v8371_v56 = vld [vmem:[%s13869_s5 + $0x160] sm:$0xff] }
 0xa6d   : > { %v12978_v26 = vpack.c.bf16 %v14148_v9, %v14147_v10  ;;  %9639 = vmatpush1.bf16.msra.mxu1 %v12680_v53  ;;  %5701 = vmatprep.mubr.f32.mxu1 %v5700_v43  ;;  %v12991_v10 = vsub.f32 %v5589_v54, %v12954_v58  ;;  %v5721_v45 = vand.u32 4294901760, %v5720_v1  ;;  %v5735_v53 = vsub.f32 %v12923_v36, %v14152_v0 }
 0xa6e   : > { %9640 = vmatprep.subr.bf16.mxu1 %v13888_v4  ;;  %v5595_v43 = vsel %vm1278_vm5, %v8374_v41, 0  ;;  %v5842_v29 = vand.u32 4294901760, %v5841_v47  ;;  %v5835_v9 = vand.u32 4294901760, %v5834_v12  ;;  %v14153_v54 = vand.u32 4294901760, %v12744_v51 }
 0xa6f   : > { %14149 = vst [vmem:[#allocation17_spill] sm:$0xff] %v12978_v26  ;;  %14151 = vst [vmem:[#allocation30_spill] sm:$0xff] %v12991_v10  ;;  %v14154_v26 = vand.u32 4294901760, %v12749_v22  ;;  %v5730_v62 = vand.u32 4294901760, %v5729_v39  ;;  %v13011_v33 = vsub.f32 %v8369_v30, %v12986_v49  ;;  %v13013_v0 = vand.u32 4294901760, %v8371_v56  ;;  %v8373_v30 = vld [vmem:[%s13869_s5 + $0x170] sm:$0xff] }
 0xa70   : > { %v5855_v16 = vsub.f32 %v12744_v51, %v14153_v54  ;;  %5707 = vmatmul.mubr.f32.gmra.mrb[22].mxu1 %v5706_v2  ;;  %v14155_v41 = vand.u32 4294901760, %v12952_v13  ;;  %v13023_v2 = vand.u32 4294901760, %v5595_v43  ;;  %v14156_v39 = vand.u32 4294901760, %v12765_v55 }
 0xa71   : > { %v5848_v11 = vsub.f32 %v12749_v22, %v14154_v26  ;;  %9642 = vmatpush1.bf16.msra.mxu1 %v12693_v50  ;;  %5716 = vmatprep.mubr.f32.mxu1 %v5715_v18  ;;  %v13021_v26 = vsub.f32 %v5592_v40, %v12993_v37  ;;  %v14157_v18 = vand.u32 4294901760, %v12770_v46  ;;  %v9644_v40 = vpack.c.bf16 %v5842_v29, %v5835_v9 }
 0xa72   : > { %v5744_v12 = vsub.f32 %v12952_v13, %v14155_v41  ;;  %v5869_v50 = vsub.f32 %v12765_v55, %v14156_v39  ;;  %9643 = vmatprep.subr.bf16.mxu1 %v13888_v4  ;;  %v5856_v41 = vand.u32 4294901760, %v5855_v16  ;;  %v5736_v1 = vand.u32 4294901760, %v5735_v53 }
 0xa73   : > { %v5862_v54 = vsub.f32 %v12770_v46, %v14157_v18  ;;  %v5849_v47 = vand.u32 4294901760, %v5848_v11  ;;  %v14158_v13 = vand.u32 4294901760, %v12984_v7  ;;  %v13843_v63 = vand.u32 4294901760, %v13011_v33 }
 0xa74   : > { %5722 = vmatmul.mubr.f32.gmra.mrb[24].mxu1 %v5721_v45  ;;  %v13040_v21 = vsub.f32 %v8371_v56, %v13013_v0  ;;  %v13042_v39 = vand.u32 4294901760, %v8373_v30  ;;  %v5745_v18 = vand.u32 4294901760, %v5744_v12  ;;  %v14159_v16 = vand.u32 4294901760, %v12991_v10 }
 0xa75   : > { %v5750_v36 = vsub.f32 %v12984_v7, %v14158_v13  ;;  %9645 = vmatpush1.bf16.msra.mxu1 %v9644_v40  ;;  %5731 = vmatprep.mubr.f32.mxu1 %v5730_v62  ;;  %v13049_v53 = vsub.f32 %v5595_v43, %v13023_v2  ;;  %v5870_v13 = vand.u32 4294901760, %v5869_v50  ;;  %v5863_v29 = vand.u32 4294901760, %v5862_v54 }
 0xa76   : > { %v5759_v11 = vsub.f32 %v12991_v10, %v14159_v16  ;;  %9646 = vmatprep.subr.bf16.mxu1 %v13888_v4  ;;  %v14161_v56 = vand.u32 4294901760, %v12785_v57  ;;  %v14162_v62 = vand.u32 4294901760, %v12790_v25  ;;  %v9647_v40 = vpack.c.bf16 %v5856_v41, %v5849_v47 }
 0xa77   : > { %14160 = vst [vmem:[#allocation33_spill] sm:$0xff] %v13049_v53  ;;  %v5751_v16 = vand.u32 4294901760, %v5750_v36  ;;  %v5765_v43 = vsub.f32 %v13011_v33, %v13843_v63  ;;  %v13844_v50 = vand.u32 4294901760, %v13040_v21  ;;  %v13063_v54 = vsub.f32 %v8373_v30, %v13042_v39 }
 0xa78   : > { %v5883_v9 = vsub.f32 %v12785_v57, %v14161_v56  ;;  %v5876_v12 = vsub.f32 %v12790_v25, %v14162_v62  ;;  %5737 = vmatmul.mubr.f32.gmra.mrb[26].mxu1 %v5736_v1  ;;  %v5760_v45 = vand.u32 4294901760, %v5759_v11  ;;  %v14163_v56 = vand.u32 4294901760, %v13021_v26 }
 0xa79   : > { %9648 = vmatpush1.bf16.msra.mxu1 %v9647_v40  ;;  %5746 = vmatprep.mubr.f32.mxu1 %v5745_v18  ;;  %v13845_v47 = vand.u32 4294901760, %v13049_v53  ;;  %v9650_v36 = vpack.c.bf16 %v5870_v13, %v5863_v29  ;;  %v14164_v62 = vand.u32 4294901760, %v12810_v52  ;;  %v14165_v30 = vand.u32 4294901760, %v12819_v3 }
 0xa7a   : > { %v5774_v10 = vsub.f32 %v13021_v26, %v14163_v56  ;;  %9649 = vmatprep.subr.bf16.mxu1 %v13888_v4  ;;  %v5884_v1 = vand.u32 4294901760, %v5883_v9  ;;  %v5877_v41 = vand.u32 4294901760, %v5876_v12  ;;  %v5766_v11 = vand.u32 4294901760, %v5765_v43 }
 0xa7b   : > { %v5897_v63 = vsub.f32 %v12810_v52, %v14164_v62  ;;  %v5890_v18 = vsub.f32 %v12819_v3, %v14165_v30  ;;  %v5780_v40 = vsub.f32 %v13040_v21, %v13844_v50  ;;  %v5794_v56 = vand.u32 4294901760, %v13063_v54 }
 0xa7c   : > { %5752 = vmatmul.mubr.f32.gmra.mrb[28].mxu1 %v5751_v16  ;;  %v5775_v13 = vand.u32 4294901760, %v5774_v10  ;;  %v5789_v29 = vsub.f32 %v13049_v53, %v13845_v47  ;;  %v14166_v9 = vand.u32 4294901760, %v12846_v6  ;;  %v14167_v16 = vand.u32 4294901760, %v12853_v38 }
 0xa7d   : > { %9651 = vmatpush1.bf16.msra.mxu1 %v9650_v36  ;;  %5761 = vmatprep.mubr.f32.mxu1 %v5760_v45  ;;  %v5898_v62 = vand.u32 4294901760, %v5897_v63  ;;  %v5891_v30 = vand.u32 4294901760, %v5890_v18  ;;  %v9653_v50 = vpack.c.bf16 %v5884_v1, %v5877_v41  ;;  %v5781_v45 = vand.u32 4294901760, %v5780_v40 }
 0xa7e   : > { %v5911_v12 = vsub.f32 %v12846_v6, %v14166_v9  ;;  %v5904_v43 = vsub.f32 %v12853_v38, %v14167_v16  ;;  %9652 = vmatprep.subr.bf16.mxu1 %v13888_v4  ;;  %v5795_v10 = vsub.f32 %v13063_v54, %v5794_v56  ;;  %v5790_v36 = vand.u32 4294901760, %v5789_v29 }
 0xa7f   : > { %v14168_v16 = vand.u32 4294901760, %v12880_v17  ;;  %v14169_v63 = vand.u32 4294901760, %v12891_v24  ;;  %v9656_v41 = vpack.c.bf16 %v5898_v62, %v5891_v30 }
 0xa80   : > { %5767 = vmatmul.mubr.f32.gmra.mrb[30].mxu1 %v5766_v11  ;;  %v5912_v47 = vand.u32 4294901760, %v5911_v12  ;;  %v5905_v9 = vand.u32 4294901760, %v5904_v43  ;;  %v5796_v18 = vand.u32 4294901760, %v5795_v10  ;;  %v14171_v12 = vand.u32 4294901760, %v12928_v60 }
 0xa81   : > { %9654 = vmatpush1.bf16.msra.mxu1 %v9653_v50  ;;  %5776 = vmatprep.mubr.f32.mxu1 %v5775_v13  ;;  %v5925_v53 = vsub.f32 %v12880_v17, %v14168_v16  ;;  %v5918_v1 = vsub.f32 %v12891_v24, %v14169_v63  ;;  %v14170_v13 = vand.u32 4294901760, %v12918_v44  ;;  %v14173_v10 = vpack.c.bf16 %v12661_v34, %v12666_v27  ;;  %v14188_v16 = vld [vmem:[#allocation27_spill] sm:$0xff]  ;;  %v14189_v63 = vld [vmem:[#allocation16_spill] sm:$0xff] }
 0xa82   : > { %9655 = vmatprep.subr.bf16.mxu1 %v13888_v4  ;;  %v9659_v50 = vpack.c.bf16 %v5912_v47, %v5905_v9  ;;  %v5932_v43 = vsub.f32 %v12928_v60, %v14171_v12  ;;  %v14172_v47 = vpack.c.bf16 %v12644_v8, %v12650_v28  ;;  %v9677_v8 = vpack.c.bf16 %v12744_v51, %v12749_v22  ;;  %v14174_v22 = vld [vmem:[#allocation43_spill] sm:$0xff]  ;;  %v14187_v9 = vld [vmem:[#allocation30_spill] sm:$0xff] }
 0xa83   : > { %v5926_v11 = vand.u32 4294901760, %v5925_v53  ;;  %v5919_v40 = vand.u32 4294901760, %v5918_v1  ;;  %v5939_v29 = vsub.f32 %v12918_v44, %v14170_v13  ;;  %v9680_v28 = vpack.c.bf16 %v12765_v55, %v12770_v46  ;;  %v14176_v55 = vld [vmem:[#allocation41_spill] sm:$0xff]  ;;  %v14177_v46 = vld [vmem:[#allocation36_spill] sm:$0xff]  ;;  %v14196_v13 = vld [vmem:[#allocation26_spill] sm:$0xff] }
 0xa84   : > { %5782 = vmatmul.mubr.f32.gmra.mrb[32].mxu1 %v5781_v45  ;;  %v5933_v30 = vand.u32 4294901760, %v5932_v43  ;;  %v9683_v34 = vpack.c.bf16 %v12785_v57, %v12790_v25  ;;  %v9686_v27 = vpack.c.bf16 %v12810_v52, %v12819_v3  ;;  %v9695_v51 = vpack.c.bf16 %v12918_v44, %v12928_v60  ;;  %v14180_v60 = vld [vmem:[#allocation45_spill] sm:$0xff]  ;;  %v14181_v57 = vld [vmem:[#allocation31_spill] sm:$0xff]  ;;  %v14183_v52 = vld [vmem:[#allocation34_spill] sm:$0xff] }
 0xa85   : > { %9657 = vmatpush1.bf16.msra.mxu1 %v9656_v41  ;;  %5791 = vmatprep.mubr.f32.mxu1 %v5790_v36  ;;  %v5940_v62 = vand.u32 4294901760, %v5939_v29  ;;  %v9662_v45 = vpack.c.bf16 %v5926_v11, %v5919_v40  ;;  %v9674_v36 = vpack.c.bf16 %v12732_v15, %v12736_v32  ;;  %v9689_v15 = vpack.c.bf16 %v12846_v6, %v12853_v38  ;;  %v14175_v38 = vld [vmem:[#allocation35_spill] sm:$0xff]  ;;  %v14179_v6 = vld [vmem:[#allocation22_spill] sm:$0xff]  ;;  %v14182_v25 = vld [vmem:[#allocation37_spill] sm:$0xff] }
 0xa86   : > { %9658 = vmatprep.subr.bf16.mxu1 %v13888_v4  ;;  %v9692_v32 = vpack.c.bf16 %v12880_v17, %v12891_v24  ;;  %v14178_v17 = vld [vmem:[#allocation23_spill] sm:$0xff]  ;;  %v14185_v44 = vld [vmem:[#allocation25_spill] sm:$0xff]  ;;  %v14191_v41 = vld [vmem:[#allocation42_spill] sm:$0xff]  ;;  %v14195_v40 = vand.u32 4294901760, %v14174_v22  ;;  %v14197_v29 = vand.u32 4294901760, %v14176_v55  ;;  %v14200_v43 = vand.u32 4294901760, %v14179_v6 }
 0xa87   : > { %v9665_v53 = vpack.c.bf16 %v5940_v62, %v5933_v30  ;;  %v14184_v3 = vld [vmem:[#allocation39_spill] sm:$0xff]  ;;  %v14186_v24 = vld [vmem:[#allocation13_spill] sm:$0xff]  ;;  %v14194_v11 = vld [vmem:[#allocation44_spill] sm:$0xff]  ;;  %v14201_v62 = vand.u32 4294901760, %v14180_v60 }
 0xa88   : > { %5797 = vmatmul.mubr.f32.gmra.mrb[34].mxu1 %v5796_v18  ;;  %v14190_v1 = vld [vmem:[#allocation33_spill] sm:$0xff]  ;;  %v14192_v18 = vand.u32 4294901760, %v12696_v48  ;;  %v14199_v12 = vld [vmem:[#allocation38_spill] sm:$0xff]  ;;  %v14202_v30 = vld [vmem:[#allocation40_spill] sm:$0xff] }
 0xa89   : > { %9660 = vmatpush1.bf16.msra.mxu1 %v9659_v50  ;;  %5967 = vmatprep.mubr.f32.mxu1 %v12691_v31  ;;  %v14193_v50 = vld [vmem:[#allocation29_spill] sm:$0xff] }
 0xa8a   : > { %9661 = vmatprep.subr.bf16.mxu1 %v13888_v4 }
 0xa8d   : > { %9663 = vmatpush1.bf16.msra.mxu1 %v9662_v45  ;;  %v14203_v45 = vand.u32 4294901760, %v14182_v25 }
 0xa8e   : > { %9664 = vmatprep.subr.bf16.mxu1 %v13888_v4 }
 0xa91   : > { %9666 = vmatpush1.bf16.msra.mxu1 %v9665_v53  ;;  %v14204_v53 = vand.u32 4294901760, %v14183_v52 }
 0xa92   : > { %9667 = vmatprep.subr.bf16.mxu1 %v13888_v4 }
 0xa94   : > { %5969 = vmatmul.mubr.f32.vlgmr.msra.gmra.mrb[20].mxu1 %v12751_v14 }
 0xa95   : > { %9669 = vmatpush1.bf16.msra.mxu1 %v14172_v47  ;;  %5974 = vmatprep.mubr.f32.mxu1 %v12792_v19  ;;  %v14205_v47 = vld [vmem:[#allocation15_spill] sm:$0xff] }
 0xa96   : > { %9670 = vmatprep.subr.bf16.mxu1 %v13888_v4 }
 0xa98   : > { %5976 = vmatmul.mubr.f32.gmra.mrb[22].mxu1 %v12824_v42 }
 0xa99   : > { %9672 = vmatpush1.bf16.msra.mxu1 %v14173_v10  ;;  %5981 = vmatprep.mubr.f32.mxu1 %v12843_v23  ;;  %v14206_v10 = vand.u32 4294901760, %v14185_v44 }
 0xa9a   : > { %9673 = vmatprep.subr.bf16.mxu1 %v13888_v4 }
 0xa9c   : > { %5983 = vmatmul.mubr.f32.gmra.mrb[24].mxu1 %v12849_v59 }
 0xa9d   : > { %9675 = vmatpush1.bf16.msra.mxu1 %v9674_v36  ;;  %5988 = vmatprep.mubr.f32.mxu1 %v12866_v61  ;;  %v14207_v36 = vand.u32 4294901760, %v12984_v7 }
 0xa9e   : > { %9676 = vmatprep.subr.bf16.mxu1 %v13888_v4 }
 0xaa0   : > { %5990 = vmatmul.mubr.f32.gmra.mrb[26].mxu1 %v12886_v5 }
 0xaa1   : > { %9678 = vmatpush1.bf16.msra.mxu1 %v9677_v8  ;;  %5995 = vmatprep.mubr.f32.mxu1 %v12913_v20  ;;  %v14208_v8 = vld [vmem:[#allocation46_spill] sm:$0xff] }
 0xaa2   : > { %9679 = vmatprep.subr.bf16.mxu1 %v13888_v4 }
 0xaa4   : > { %5997 = vmatmul.mubr.f32.gmra.mrb[28].mxu1 %v12938_v35 }
 0xaa5   : > { %9681 = vmatpush1.bf16.msra.mxu1 %v9680_v28  ;;  %6002 = vmatprep.mubr.f32.mxu1 %v12954_v58  ;;  %v14209_v28 = vand.u32 4294901760, %v14187_v9 }
 0xaa6   : > { %9682 = vmatprep.subr.bf16.mxu1 %v13888_v4 }
 0xaa8   : > { %6004 = vmatmul.mubr.f32.gmra.mrb[30].mxu1 %v12986_v49 }
 0xaa9   : > { %9684 = vmatpush1.bf16.msra.mxu1 %v9683_v34  ;;  %6009 = vmatprep.mubr.f32.mxu1 %v12993_v37  ;;  %v14210_v34 = vand.u32 4294901760, %v13011_v33 }
 0xaaa   : > { %9685 = vmatprep.subr.bf16.mxu1 %v13888_v4 }
 0xaac   : > { %6011 = vmatmul.mubr.f32.gmra.mrb[32].mxu1 %v13013_v0 }
 0xaad   : > { %9687 = vmatpush1.bf16.msra.mxu1 %v9686_v27  ;;  %6016 = vmatprep.mubr.f32.mxu1 %v13023_v2  ;;  %v14211_v27 = vld [vmem:[#allocation28_spill] sm:$0xff] }
 0xaae   : > { %9688 = vmatprep.subr.bf16.mxu1 %v13888_v4 }
 0xab0   : > { %6018 = vmatmul.mubr.f32.gmra.mrb[34].mxu1 %v13042_v39 }
 0xab1   : > { %9690 = vmatpush1.bf16.msra.mxu1 %v9689_v15  ;;  %6129 = vmatprep.mubr.f32.mxu1 %v12696_v48  ;;  %v14198_v48 = vand.u32 4294901760, %v14177_v46  ;;  %v14212_v15 = vand.u32 4294901760, %v13021_v26 }
 0xab2   : > { %9691 = vmatprep.subr.bf16.mxu1 %v13888_v4 }
 0xab5   : > { %9693 = vmatpush1.bf16.msra.mxu1 %v9692_v32  ;;  %v14214_v32 = vld [vmem:[#allocation21_spill] sm:$0xff] }
 0xab6   : > { %9694 = vmatprep.subr.bf16.mxu1 %v13888_v4 }
 0xab9   : > { %9696 = vmatpush1.bf16.msra.mxu1 %v9695_v51  ;;  %v14215_v51 = vand.u32 4294901760, %v14190_v1 }
 0xaba   : > { %9697 = vmatprep.subr.bf16.mxu1 %v13888_v4 }
 0xabc   : > { %6132 = vmatmul.mubr.f32.vlgmr.msra.gmra.mrb[20].mxu1 %v14174_v22  ;;  %v5563_v22 = vpop.permute.xlu0 %5562 }
 0xabd   : > { %9699 = vmatpush1.bf16.msra.mxu1 %v14175_v38  ;;  %6138 = vmatprep.mubr.f32.mxu1 %v14176_v55 }
 0xabe   : > { %9700 = vmatprep.subr.bf16.mxu1 %v13888_v4 }
 0xac0   : > { %6141 = vmatmul.mubr.f32.gmra.mrb[22].mxu1 %v14177_v46 }
 0xac1   : > { %9702 = vmatpush1.bf16.msra.mxu1 %v14178_v17  ;;  %6147 = vmatprep.mubr.f32.mxu1 %v14179_v6 }
 0xac2   : > { %9703 = vmatprep.subr.bf16.mxu1 %v13888_v4 }
 0xac4   : > { %6150 = vmatmul.mubr.f32.gmra.mrb[24].mxu1 %v14180_v60 }
 0xac5   : > { %9705 = vmatpush1.bf16.msra.mxu1 %v14181_v57  ;;  %6156 = vmatprep.mubr.f32.mxu1 %v14182_v25 }
 0xac6   : > { %9706 = vmatprep.subr.bf16.mxu1 %v13888_v4 }
 0xac8   : > { %6159 = vmatmul.mubr.f32.gmra.mrb[26].mxu1 %v14183_v52 }
 0xac9   : > { %9708 = vmatpush1.bf16.msra.mxu1 %v14184_v3  ;;  %6165 = vmatprep.mubr.f32.mxu1 %v14185_v44  ;;  %v5543_v44 = vpop.permute.xlu0 %5542 }
 0xaca   : > { %9709 = vmatprep.subr.bf16.mxu1 %v13888_v4 }
 0xacc   : > { %6168 = vmatmul.mubr.f32.gmra.mrb[28].mxu1 %v12984_v7  ;;  %v14213_v7 = vand.u32 4294901760, %v13040_v21 }
 0xacd   : > { %9711 = vmatpush1.bf16.msra.mxu1 %v14186_v24  ;;  %6174 = vmatprep.mubr.f32.mxu1 %v14187_v9 }
 0xace   : > { %9712 = vmatprep.subr.bf16.mxu1 %v13888_v4 }
 0xad0   : > { %6177 = vmatmul.mubr.f32.gmra.mrb[30].mxu1 %v13011_v33  ;;  %v14216_v33 = vld [vmem:[#allocation20_spill] sm:$0xff] }
 0xad1   : > { %9714 = vmatpush1.bf16.msra.mxu1 %v14188_v16  ;;  %6183 = vmatprep.mubr.f32.mxu1 %v13021_v26  ;;  %v14217_v26 = vld [vmem:[#allocation14_spill] sm:$0xff] }
 0xad2   : > { %9715 = vmatprep.subr.bf16.mxu1 %v13888_v4 }
 0xad4   : > { %6186 = vmatmul.mubr.f32.gmra.mrb[32].mxu1 %v13040_v21  ;;  %v14218_v21 = vld [vmem:[#allocation17_spill] sm:$0xff] }
 0xad5   : > { %9717 = vmatpush1.bf16.msra.mxu1 %v14189_v63  ;;  %6192 = vmatprep.mubr.f32.mxu1 %v14190_v1 }
 0xad6   : > { %9718 = vmatprep.subr.bf16.mxu1 %v13888_v4 }
 0xad8   : > { %6195 = vmatmul.mubr.f32.gmra.mrb[34].mxu1 %v13063_v54 }
 0xad9   : > { %9720 = vmatpush1.bf16.msra.mxu1 %v14191_v41  ;;  %6287 = vmatprep.mubr.f32.mxu1 %v14192_v18 }
 0xada   : > { %9721 = vmatprep.subr.bf16.mxu1 %v13888_v4 }
 0xadd   : > { %9723 = vmatpush1.bf16.msra.mxu1 %v14193_v50 }
 0xade   : > { %9724 = vmatprep.subr.bf16.mxu1 %v13888_v4 }
 0xae1   : > { %9726 = vmatpush1.bf16.msra.mxu1 %v14194_v11 }
 0xae2   : > { %9727 = vmatprep.subr.bf16.mxu1 %v13888_v4 }
 0xae4   : > { %6291 = vmatmul.mubr.f32.vlgmr.msra.gmra.mrb[20].mxu1 %v14195_v40 }
 0xae5   : > { %9729 = vmatpush1.bf16.msra.mxu1 %v14196_v13  ;;  %6298 = vmatprep.mubr.f32.mxu1 %v14197_v29  ;;  %v5551_v29 = vpop.permute.xlu0 %5550 }
 0xae6   : > { %9730 = vmatprep.subr.bf16.mxu1 %v13888_v4 }
 0xae8   : > { %6302 = vmatmul.mubr.f32.gmra.mrb[22].mxu1 %v14198_v48 }
 0xae9   : > { %9732 = vmatpush1.bf16.msra.mxu1 %v14199_v12  ;;  %6309 = vmatprep.mubr.f32.mxu1 %v14200_v43 }
 0xaea   : > { %9733 = vmatprep.subr.bf16.mxu1 %v13888_v4 }
 0xaec   : > { %6313 = vmatmul.mubr.f32.gmra.mrb[24].mxu1 %v14201_v62 }
 0xaed   : > { %9735 = vmatpush1.bf16.msra.mxu1 %v14202_v30  ;;  %6320 = vmatprep.mubr.f32.mxu1 %v14203_v45  ;;  %v8380_v45 = vld [vmem:[%s13979_s7 + $0x88] sm:$0xff] }
 0xaee   : > { %9736 = vmatprep.subr.bf16.mxu1 %v13888_v4 }
 0xaf0   : > { %6324 = vmatmul.mubr.f32.gmra.mrb[26].mxu1 %v14204_v53 }
 0xaf1   : > { %9738 = vmatpush1.bf16.msra.mxu1 %v14205_v47  ;;  %6331 = vmatprep.mubr.f32.mxu1 %v14206_v10  ;;  %v8381_v10 = vld [vmem:[%s13979_s7 + $0x90] sm:$0xff] }
 0xaf2   : > { %9739 = vmatprep.subr.bf16.mxu1 %v13888_v4 }
 0xaf4   : > { %6335 = vmatmul.mubr.f32.gmra.mrb[28].mxu1 %v14207_v36 }
 0xaf5   : > { %9741 = vmatpush1.bf16.msra.mxu1 %v14208_v8  ;;  %6342 = vmatprep.mubr.f32.mxu1 %v14209_v28  ;;  %v6768_v8 = vsel %vm1278_vm5, %v8380_v45, 0 }
 0xaf6   : > { %9742 = vmatprep.subr.bf16.mxu1 %v13888_v4 }
 0xaf8   : > { %6346 = vmatmul.mubr.f32.gmra.mrb[30].mxu1 %v14210_v34 }
 0xaf9   : > { %9744 = vmatpush1.bf16.msra.mxu1 %v14211_v27  ;;  %6353 = vmatprep.mubr.f32.mxu1 %v14212_v15  ;;  %v8382_v27 = vld [vmem:[%s13979_s7 + $0x98] sm:$0xff] }
 0xafa   : > { %9745 = vmatprep.subr.bf16.mxu1 %v13888_v4 }
 0xafc   : > { %6357 = vmatmul.mubr.f32.gmra.mrb[32].mxu1 %v14213_v7  ;;  %v6771_v7 = vsel %vm1278_vm5, %v8381_v10, 0 }
 0xafd   : > { %9747 = vmatpush1.bf16.msra.mxu1 %v14214_v32  ;;  %6364 = vmatprep.mubr.f32.mxu1 %v14215_v51  ;;  %v13322_v32 = vand.u32 4294901760, %v6768_v8  ;;  %v8383_v51 = vld [vmem:[%s13979_s7 + $0xa0] sm:$0xff] }
 0xafe   : > { %9748 = vmatprep.subr.bf16.mxu1 %v13888_v4 }
 0xb00   : > { %6368 = vmatmul.mubr.f32.gmra.mrb[34].mxu1 %v5794_v56 }
 0xb01   : > { %9750 = vmatpush1.bf16.msra.mxu1 %v14216_v33  ;;  %6498 = vmatprep.mubr.f32.mxu1 %v12691_v31 }
 0xb02   : > { %9751 = vmatprep.subr.bf16.mxu1 %v13888_v4 }
 0xb05   : > { %9753 = vmatpush1.bf16.msra.mxu1 %v14217_v26 }
 0xb06   : > { %9754 = vmatprep.subr.bf16.mxu1 %v13888_v4 }
 0xb09   : > { %9756 = vmatpush1.bf16.msra.mxu1 %v14218_v21  ;;  %v6774_v21 = vsel %vm1278_vm5, %v8382_v27, 0 }
 0xb0a   : > { %9757 = vmatprep.subr.bf16.mxu1 %v13888_v4 }
 0xb0c   : > { %6500 = vmatmul.mubr.f32.vlgmr.msra.gmra.mrb[20].mxu1 %v12751_v14 }
 0xb0d   : > { %9759 = vmatpush1.bf16.msra.mxu1 %v14175_v38  ;;  %6505 = vmatprep.mubr.f32.mxu1 %v12792_v19 }
 0xb0e   : > { %9760 = vmatprep.subr.bf16.mxu1 %v13888_v4 }
 0xb10   : > { %6507 = vmatmul.mubr.f32.gmra.mrb[22].mxu1 %v12824_v42 }
 0xb11   : > { %9762 = vmatpush1.bf16.msra.mxu1 %v14178_v17  ;;  %6512 = vmatprep.mubr.f32.mxu1 %v12843_v23 }
 0xb12   : > { %9763 = vmatprep.subr.bf16.mxu1 %v13888_v4 }
 0xb14   : > { %6514 = vmatmul.mubr.f32.gmra.mrb[24].mxu1 %v12849_v59 }
 0xb15   : > { %9765 = vmatpush1.bf16.msra.mxu1 %v14181_v57  ;;  %6519 = vmatprep.mubr.f32.mxu1 %v12866_v61 }
 0xb16   : > { %9766 = vmatprep.subr.bf16.mxu1 %v13888_v4 }
 0xb18   : > { %6521 = vmatmul.mubr.f32.gmra.mrb[26].mxu1 %v12886_v5 }
 0xb19   : > { %9768 = vmatpush1.bf16.msra.mxu1 %v14184_v3  ;;  %6526 = vmatprep.mubr.f32.mxu1 %v12913_v20 }
 0xb1a   : > { %9769 = vmatprep.subr.bf16.mxu1 %v13888_v4 }
 0xb1c   : > { %6528 = vmatmul.mubr.f32.gmra.mrb[28].mxu1 %v12938_v35 }
 0xb1d   : > { %9771 = vmatpush1.bf16.msra.mxu1 %v14186_v24  ;;  %6533 = vmatprep.mubr.f32.mxu1 %v12954_v58 }
 0xb1e   : > { %9772 = vmatprep.subr.bf16.mxu1 %v13888_v4 }
 0xb20   : > { %6535 = vmatmul.mubr.f32.gmra.mrb[30].mxu1 %v12986_v49 }
 0xb21   : > { %9774 = vmatpush1.bf16.msra.mxu1 %v14188_v16  ;;  %6540 = vmatprep.mubr.f32.mxu1 %v12993_v37 }
 0xb22   : > { %9775 = vmatprep.subr.bf16.mxu1 %v13888_v4 }
 0xb24   : > { %6542 = vmatmul.mubr.f32.gmra.mrb[32].mxu1 %v13013_v0 }
 0xb25   : > { %9777 = vmatpush1.bf16.msra.mxu1 %v14189_v63  ;;  %6547 = vmatprep.mubr.f32.mxu1 %v13023_v2 }
 0xb26   : > { %9778 = vmatprep.subr.bf16.mxu1 %v13888_v4 }
 0xb28   : > { %6549 = vmatmul.mubr.f32.gmra.mrb[34].mxu1 %v13042_v39 }
 0xb29   : > { %9780 = vmatpush1.bf16.msra.mxu1 %v14191_v41  ;;  %6639 = vmatprep.mubr.f32.mxu1 %v12691_v31 }
 0xb2a   : > { %9781 = vmatprep.subr.bf16.mxu1 %v13888_v4 }
 0xb2d   : > { %9783 = vmatpush1.bf16.msra.mxu1 %v14193_v50 }
 0xb2e   : > { %9784 = vmatprep.subr.bf16.mxu1 %v13888_v4  ;;  %v8379_v4 = vld [vmem:[%s13979_s7 + $0x80] sm:$0xff] }
 0xb31   : > { %9786 = vmatpush1.bf16.msra.mxu1 %v14194_v11 }
 0xb34   : > { %6641 = vmatmul.mubr.f32.vlgmr.msra.gmra.mrb[20].mxu1 %v12751_v14 }
 0xb35   : > { %6646 = vmatprep.mubr.f32.mxu1 %v12792_v19 }
 0xb38   : > { %6648 = vmatmul.mubr.f32.gmra.mrb[22].mxu1 %v12824_v42 }
 0xb39   : > { %6653 = vmatprep.mubr.f32.mxu1 %v12843_v23 }
 0xb3c   : > { %6655 = vmatmul.mubr.f32.gmra.mrb[24].mxu1 %v12849_v59 }
 0xb3d   : > { %6660 = vmatprep.mubr.f32.mxu1 %v12866_v61 }
 0xb40   : > { %6662 = vmatmul.mubr.f32.gmra.mrb[26].mxu1 %v12886_v5  ;;  %v6765_v5 = vsel %vm1278_vm5, %v8379_v4, 0 }
 0xb41   : > { %6667 = vmatprep.mubr.f32.mxu1 %v12913_v20  ;;  %v13301_v23 = vand.u32 4294901760, %v6765_v5 }
 0xb43   : > { %v13304_v31 = vsub.f32 %v6765_v5, %v13301_v23  ;;  %8993 = vmatprep.mubr.f32.mxu0 %v13301_v23  ;;  %v13328_v5 = vand.u32 4294901760, %v6771_v7 }
 0xb44   : > { %6669 = vmatmul.mubr.f32.gmra.mrb[28].mxu1 %v12938_v35 }
 0xb45   : > { %6674 = vmatprep.mubr.f32.mxu1 %v12954_v58  ;;  %v6859_v14 = vand.u32 4294901760, %v13304_v31 }
 0xb47   : > { %v6860_v20 = vsub.f32 %v13304_v31, %v6859_v14 }
 0xb48   : > { %6676 = vmatmul.mubr.f32.gmra.mrb[30].mxu1 %v12986_v49 }
 0xb49   : > { %6681 = vmatprep.mubr.f32.mxu1 %v12993_v37  ;;  %v6861_v35 = vand.u32 4294901760, %v6860_v20  ;;  %v8384_v20 = vld [vmem:[%s13979_s7 + $0xa8] sm:$0xff] }
 0xb4c   : > { %6683 = vmatmul.mubr.f32.gmra.mrb[32].mxu1 %v13013_v0 }
 0xb4d   : > { %6688 = vmatprep.mubr.f32.mxu1 %v13023_v2  ;;  %v5559_v2 = vpop.permute.xlu1 %5558 }
 0xb50   : > { %6690 = vmatmul.mubr.f32.gmra.mrb[34].mxu1 %v13042_v39 }
 0xb51   : > { %8973 = vmatprep.mubr.f32.mxu1 %v6861_v35  ;;  %v5567_v55 = vpop.permute.xlu1 %5566 }
 0xb55   : > { %v5571_v3 = vpop.permute.xlu1 %5570 }
 0xb59   : > { %v5547_v50 = vpop.permute.xlu1 %5546 }
 0xb5d   : > { %v5555_v62 = vpop.permute.xlu1 %5554 }
 0xc07   : > { %v6642_v19 = vpop.f32.mrb[20].mxu1 }
 0xc08   : > { %v6644_v59 = vpop.f32.mrb[21].mxu1  ;;  %v9935_v9 = vadd.f32 %v6642_v19, %v5543_v44 }
 0xc09   : > { %v6777_v59 = vsel %vm1278_vm5, %v8383_v51, 0 }
 0xc0b   : > { %v6649_v42 = vpop.f32.mrb[22].mxu1 }
 0xc0c   : > { %v6651_v61 = vpop.f32.mrb[23].mxu1  ;;  %v9936_v40 = vadd.f32 %v6649_v42, %v5547_v50  ;;  %v13335_v42 = vsub.f32 %v6768_v8, %v13322_v32 }
 0xc0d   : > { %v13337_v61 = vand.u32 4294901760, %v6774_v21 }
 0xc0f   : > { %v6656_v58 = vpop.f32.mrb[24].mxu1 }
 0xc10   : > { %v6658_v49 = vpop.f32.mrb[25].mxu1  ;;  %v9937_v12 = vadd.f32 %v6656_v58, %v5551_v29  ;;  %v8385_v58 = vld [vmem:[%s13979_s7 + $0xb0] sm:$0xff] }
 0xc13   : > { %v6663_v37 = vpop.f32.mrb[26].mxu1 }
 0xc14   : > { %v6665_v0 = vpop.f32.mrb[27].mxu1  ;;  %v9938_v53 = vadd.f32 %v6663_v37, %v5555_v62 }
 0xc17   : > { %v6670_v39 = vpop.f32.mrb[28].mxu1 }
 0xc18   : > { %v9939_v54 = vadd.f32 %v6670_v39, %v5559_v2  ;;  %v6672_v56 = vpop.f32.mrb[29].mxu1  ;;  %v6780_v2 = vsel %vm1278_vm5, %v8384_v20, 0  ;;  %v8386_v39 = vld [vmem:[%s13979_s7 + $0xb8] sm:$0xff]  ;;  %s10666_s7 = smov [#allocation6]  }
 0xc19   : > { %v13347_v56 = vsub.f32 %v6771_v7, %v13328_v5  ;;  %s10511_s8 = sshll.u32 %s10666_s7, 4  ;;  %s10512_s8 = int_to_ptr.vmem [resolvable:$false] %s10511_s8 }
 0xc1a   : > { %v8375_v38 = vmul.f32 -1.442695, %v9939_v54  ;;  %p10514_p6 = scmp.lt.s32.totalorder %s13524_s21, %s10512_s8 }
 0xc1b   : > { %v6677_v46 = vpop.f32.mrb[30].mxu1 }
 0xc1c   : > { %10457 = vpow2.f32 %v8375_v38  ;;  %v9940_v17 = vadd.f32 %v6677_v46, %v5563_v22  ;;  %v6679_v6 = vpop.f32.mrb[31].mxu1  ;;  %v13349_v22 = vand.u32 4294901760, %v6777_v59 }
 0xc1d   : > { %v6868_v6 = vand.u32 4294901760, %v13335_v42 }
 0xc1e   : > { %v8376_v60 = vmul.f32 -1.442695, %v9940_v17  ;;  %v6783_v17 = vsel %vm1278_vm5, %v8385_v58, 0 }
 0xc1f   : > { %v6684_v57 = vpop.f32.mrb[32].mxu1 }
 0xc20   : > { %10459 = vpow2.f32 %v8376_v60  ;;  %v9941_v25 = vadd.f32 %v6684_v57, %v5567_v55  ;;  %v6686_v52 = vpop.f32.mrb[33].mxu1  ;;  %v13356_v60 = vsub.f32 %v6774_v21, %v13337_v61  ;;  %v13358_v57 = vand.u32 4294901760, %v6780_v2 }
 0xc22   : > { %v8377_v24 = vmul.f32 -1.442695, %v9941_v25  ;;  %v6786_v25 = vsel %vm1278_vm5, %v8386_v39, 0  ;;  %v6886_v29 = vand.u32 4294901760, %v13356_v60 }
 0xc23   : > { %v6691_v16 = vpop.f32.mrb[34].mxu1 }
 0xc24   : > { %10461 = vpow2.f32 %v8377_v24  ;;  %v9942_v63 = vadd.f32 %v6691_v16, %v5571_v3  ;;  %v6693_v1 = vpop.f32.mrb[35].mxu1  ;;  %v6887_v27 = vsub.f32 %v13356_v60, %v6886_v29 }
 0xc25   : > { %10463 = vtanh.f32 %v9935_v9  ;;  %v13365_v1 = vsub.f32 %v6777_v59, %v13349_v22 }
 0xc26   : > { %v10458_v41 = vpop.eup %10457  ;;  %v8378_v18 = vmul.f32 -1.442695, %v9942_v63  ;;  %v6877_v63 = vand.u32 4294901760, %v13347_v56  ;;  %v6888_v59 = vand.u32 4294901760, %v6887_v27 }
 0xc27   : > { %v6711_v11 = vadd.f32 1.0, %v10458_v41  ;;  %v13367_v41 = vand.u32 4294901760, %v6783_v17 }
 0xc28   : > { %10465 = vpow2.f32 %v8378_v18 }
 0xc29   : > { %10467 = vrcp.f32 %v6711_v11  ;;  %v13385_v10 = vsub.f32 %v6783_v17, %v13367_v41 }
 0xc2a   : > { %v10460_v13 = vpop.eup %10459  ;;  %10469 = vtanh.f32 %v9936_v40 }
 0xc2b   : > { %v6712_v48 = vadd.f32 1.0, %v10460_v13  ;;  %v6869_v13 = vsub.f32 %v13335_v42, %v6868_v6  ;;  %v6915_v20 = vand.u32 4294901760, %v13385_v10 }
 0xc2d   : > { %10471 = vrcp.f32 %v6712_v48  ;;  %v13376_v48 = vsub.f32 %v6780_v2, %v13358_v57  ;;  %v6916_v39 = vsub.f32 %v13385_v10, %v6915_v20 }
 0xc2e   : > { %v10462_v43 = vpop.eup %10461  ;;  %10473 = vtanh.f32 %v9937_v12  ;;  %v13378_v12 = vand.u32 4294901760, %v6786_v25 }
 0xc2f   : > { %v6713_v30 = vadd.f32 1.0, %v10462_v43  ;;  %v10464_v47 = vpop.eup %10463  ;;  %v6917_v17 = vand.u32 4294901760, %v6916_v39 }
 0xc31   : > { %10475 = vrcp.f32 %v6713_v30 }
 0xc32   : > { %v10466_v36 = vpop.eup %10465  ;;  %10477 = vtanh.f32 %v9938_v53  ;;  %v6878_v53 = vsub.f32 %v13347_v56, %v6877_v63 }
 0xc33   : > { %v10468_v28 = vpop.eup %10467  ;;  %v6714_v34 = vadd.f32 1.0, %v10466_v36 }
 0xc34   : > { %v6723_v15 = vmul.f32 %v10468_v28, %v10464_v47  ;;  %v10470_v33 = vpop.eup %10469  ;;  %v6895_v47 = vand.u32 4294901760, %v13365_v1  ;;  %v6879_v21 = vand.u32 4294901760, %v6878_v53 }
 0xc35   : > { %10479 = vrcp.f32 %v6714_v34  ;;  %v6870_v34 = vand.u32 4294901760, %v6869_v13 }
 0xc36   : > { %v6789_v26 = vand.u32 4294901760, %v6723_v15 }
 0xc37   : > { %v10472_v4 = vpop.eup %10471 }
 0xc38   : > { %v6724_v35 = vmul.f32 %v10472_v4, %v10470_v33  ;;  %v6935_v19 = vsub.f32 %v6723_v15, %v6789_v26  ;;  %v10474_v49 = vpop.eup %10473  ;;  %v6905_v15 = vand.u32 4294901760, %v13376_v48  ;;  %v6896_v4 = vsub.f32 %v13365_v1, %v6895_v47 }
 0xc3a   : > { %v6792_v37 = vand.u32 4294901760, %v6724_v35  ;;  %v6936_v0 = vand.u32 4294901760, %v6935_v19  ;;  %v6897_v2 = vand.u32 4294901760, %v6896_v4 }
 0xc3b   : > { %v10476_v54 = vpop.eup %10475 }
 0xc3c   : > { %v6725_v38 = vmul.f32 %v10476_v54, %v10474_v49  ;;  %v13351_v55 = vpack.c.bf16 %v6792_v37, %v6789_v26  ;;  %v6942_v46 = vsub.f32 %v6724_v35, %v6792_v37  ;;  %v10478_v52 = vpop.eup %10477  ;;  %v6937_v44 = vsub.f32 %v6935_v19, %v6936_v0 }
 0xc3d   : > { %v13395_v26 = vsub.f32 %v6786_v25, %v13378_v12  ;;  %v6906_v37 = vsub.f32 %v13376_v48, %v6905_v15 }
 0xc3e   : > { %v6795_v3 = vand.u32 4294901760, %v6725_v38  ;;  %9788 = vmatprep.subr.bf16.mxu1 %v13351_v55  ;;  %v6943_v24 = vand.u32 4294901760, %v6942_v46  ;;  %v9803_v9 = vpack.c.bf16 %v6942_v46, %v6935_v19  ;;  %v6938_v62 = vand.u32 4294901760, %v6937_v44 }
 0xc3f   : > { %v10480_v16 = vpop.eup %10479  ;;  %9790 = vmatpush3.bf16.msra.mxu1 %v13351_v55 }
 0xc40   : > { %v6726_v18 = vmul.f32 %v10480_v16, %v10478_v52  ;;  %v6944_v50 = vsub.f32 %v6942_v46, %v6943_v24  ;;  %v6949_v11 = vsub.f32 %v6725_v38, %v6795_v3  ;;  %v13369_v40 = vpack.c.bf16 %v6943_v24, %v6936_v0 }
 0xc41   : > { %v6925_v0 = vand.u32 4294901760, %v13395_v26  ;;  %v6907_v38 = vand.u32 4294901760, %v6906_v37 }
 0xc42   : > { %v6798_v43 = vand.u32 4294901760, %v6726_v18  ;;  %v6945_v30 = vand.u32 4294901760, %v6944_v50  ;;  %v6950_v45 = vand.u32 4294901760, %v6949_v11 }
 0xc43   : > { %v6926_v46 = vsub.f32 %v13395_v26, %v6925_v0 }
 0xc44   : > { %v13387_v36 = vpack.c.bf16 %v6798_v43, %v6795_v3  ;;  %v9795_v8 = vpack.c.bf16 %v6945_v30, %v6938_v62  ;;  %v6956_v28 = vsub.f32 %v6726_v18, %v6798_v43  ;;  %v6951_v7 = vsub.f32 %v6949_v11, %v6950_v45  ;;  %v14219_v18 = vld [vmem:[#allocation18_spill] sm:$0xff] }
 0xc45   : > { %v6927_v25 = vand.u32 4294901760, %v6926_v46 }
 0xc46   : > { %9792 = vmatprep.subr.bf16.mxu1 %v13387_v36  ;;  %9796 = vmatprep.subr.bf16.mxu0 %v9795_v8  ;;  %v6957_v51 = vand.u32 4294901760, %v6956_v28  ;;  %v9807_v33 = vpack.c.bf16 %v6956_v28, %v6949_v11  ;;  %v6952_v58 = vand.u32 4294901760, %v6951_v7 }
 0xc47   : > { %9794 = vmatpush3.bf16.msra.mxu1 %v13387_v36  ;;  %9798 = vmatpush3.bf16.msra.mxu0 %v9795_v8  ;;  %v7556_v8 = vld [vmem:[%s13657_s10] sm:$0xff] }
 0xc48   : > { %v6958_v35 = vsub.f32 %v6956_v28, %v6957_v51  ;;  %v9823_v19 = vpack.c.bf16 %v6957_v51, %v6950_v45  ;;  %7560 = vperm.xlu0 %10408, %v7556_v8  }
 0xc4a   : > { %8974 = vmatmul.mubr.f32.vlgmr.msra.gmra.mrb[36].mxu1 %v6870_v34  ;;  %v6959_v49 = vand.u32 4294901760, %v6958_v35 }
 0xc4b   : > { %8976 = vmatprep.mubr.f32.mxu1 %v6879_v21 }
 0xc4c   : > { %v9799_v54 = vpack.c.bf16 %v6959_v49, %v6952_v58 }
 0xc4e   : > { %8977 = vmatmul.mubr.f32.gmra.mrb[38].mxu1 %v6888_v59  ;;  %9800 = vmatprep.subr.bf16.mxu0 %v9799_v54 }
 0xc4f   : > { %9802 = vmatpush3.bf16.msra.mxu0 %v9799_v54  ;;  %8979 = vmatprep.mubr.f32.mxu1 %v6897_v2 }
 0xc50   : > { %9804 = vmatprep.subr.bf16.mxu0 %v9803_v9 }
 0xc52   : > { %8980 = vmatmul.mubr.f32.gmra.mrb[40].mxu1 %v6907_v38  ;;  %8994 = vmatmul.mubr.f32.vlgmr.msra.gmra.mrb[32].mxu0 %v13322_v32 }
 0xc53   : > { %9806 = vmatpush3.bf16.msra.mxu0 %v9803_v9  ;;  %8982 = vmatprep.mubr.f32.mxu1 %v6917_v17 }
 0xc54   : > { %9808 = vmatprep.subr.bf16.mxu0 %v9807_v33  ;;  %8996 = vmatprep.mubr.f32.mxu0 %v13328_v5 }
 0xc56   : > { %8983 = vmatmul.mubr.f32.gmra.mrb[42].mxu1 %v6927_v25  ;;  %8997 = vmatmul.mubr.f32.gmra.mrb[34].mxu0 %v13337_v61 }
 0xc57   : > { %9810 = vmatpush3.bf16.msra.mxu0 %v9807_v33  ;;  %8999 = vmatprep.mubr.f32.mxu0 %v13349_v22 }
 0xc58   : > { %9812 = vmatprep.subr.bf16.mxu0 %v13351_v55 }
 0xc5a   : > { %9000 = vmatmul.mubr.f32.gmra.mrb[36].mxu0 %v13358_v57 }
 0xc5b   : > { %9002 = vmatprep.mubr.f32.mxu0 %v13367_v41 }
 0xc5e   : > { %9003 = vmatmul.mubr.f32.gmra.mrb[38].mxu0 %v13378_v12 }
 0xc5f   : > { %9013 = vmatprep.mubr.f32.mxu0 %v13304_v31  ;;  %v7554_v31 = vld [vmem:[%s13656_s9] sm:$0xff] }
 0xc62   : > { %9014 = vmatmul.mubr.f32.vlgmr.msra.gmra.mrb[40].mxu0 %v13335_v42 }
 0xc63   : > { %9814 = vmatpush3.bf16.msra.mxu0 %v13351_v55  ;;  %9016 = vmatprep.mubr.f32.mxu0 %v13347_v56  ;;  %v2469_v56 = vpop.permute.xlu1 %2468 }
 0xc64   : > { %9816 = vmatprep.subr.bf16.mxu0 %v13387_v36 }
 0xc66   : > { %9017 = vmatmul.mubr.f32.gmra.mrb[42].mxu0 %v13356_v60 }
 0xc67   : > { %9818 = vmatpush3.bf16.msra.mxu0 %v13387_v36  ;;  %9019 = vmatprep.mubr.f32.mxu0 %v13365_v1 }
 0xc68   : > { %9820 = vmatprep.subr.bf16.mxu0 %v13369_v40 }
 0xc6a   : > { %9020 = vmatmul.mubr.f32.gmra.mrb[36].mxu0 %v13376_v48 }
 0xc6b   : > { %9022 = vmatprep.mubr.f32.mxu0 %v13385_v10 }
 0xc6e   : > { %9023 = vmatmul.mubr.f32.gmra.mrb[38].mxu0 %v13395_v26 }
 0xc6f   : > { %9033 = vmatprep.mubr.f32.mxu0 %v6859_v14 }
 0xc72   : > { %9034 = vmatmul.mubr.f32.vlgmr.msra.gmra.mrb[44].mxu0 %v6868_v6  ;;  %v2464_v6 = vpop.permute.xlu0 %2463 }
 0xc73   : > { %9822 = vmatpush3.bf16.msra.mxu0 %v13369_v40  ;;  %9036 = vmatprep.mubr.f32.mxu0 %v6877_v63  ;;  %v14220_v40 = vld [vmem:[#allocation24_spill] sm:$0xff] }
 0xc74   : > { %9824 = vmatprep.subr.bf16.mxu0 %v9823_v19 }
 0xc76   : > { %9037 = vmatmul.mubr.f32.gmra.mrb[46].mxu0 %v6886_v29 }
 0xc77   : > { %9826 = vmatpush3.bf16.msra.mxu0 %v9823_v19  ;;  %9039 = vmatprep.mubr.f32.mxu0 %v6895_v47 }
 0xc78   : > { %9828 = vmatprep.subr.bf16.mxu0 %v13351_v55 }
 0xc7a   : > { %9040 = vmatmul.mubr.f32.gmra.mrb[36].mxu0 %v6905_v15  ;;  %v14222_v15 = vld [vmem:[#allocation19_spill] sm:$0xff] }
 0xc7b   : > { %9042 = vmatprep.mubr.f32.mxu0 %v6915_v20 }
 0xc7e   : > { %9043 = vmatmul.mubr.f32.gmra.mrb[38].mxu0 %v6925_v0 }
 0xc7f   : > { %9053 = vmatprep.mubr.f32.mxu0 %v13301_v23 }
 0xc82   : > { %9054 = vmatmul.mubr.f32.vlgmr.msra.gmra.mrb[48].mxu0 %v13322_v32 }
 0xc83   : > { %9830 = vmatpush3.bf16.msra.mxu0 %v13351_v55  ;;  %9056 = vmatprep.mubr.f32.mxu0 %v13328_v5 }
 0xc84   : > { %9832 = vmatprep.subr.bf16.mxu0 %v13387_v36 }
 0xc86   : > { %9057 = vmatmul.mubr.f32.gmra.mrb[50].mxu0 %v13337_v61 }
 0xc87   : > { %9834 = vmatpush3.bf16.msra.mxu0 %v13387_v36  ;;  %9059 = vmatprep.mubr.f32.mxu0 %v13349_v22  ;;  %v7557_v36 = vld [vmem:[%s13657_s10 + $0x8] sm:$0xff] }
 0xc88   : > { %7565 = vperm.xlu1 %10407, %v7557_v36  }
 0xc8a   : > { %9060 = vmatmul.mubr.f32.gmra.mrb[36].mxu0 %v13358_v57 }
 0xc8b   : > { %9062 = vmatprep.mubr.f32.mxu0 %v13367_v41 }
 0xc8e   : > { %9063 = vmatmul.mubr.f32.gmra.mrb[38].mxu0 %v13378_v12 }
 0xc8f   : > { %9073 = vmatprep.mubr.f32.mxu0 %v13301_v23  ;;  %v7569_v23 = vsel %vm1278_vm5, %v7554_v31, 0 }
 0xc90   : > { %v13465_v14 = vand.u32 4294901760, %v7569_v23 }
 0xc92   : > { %9074 = vmatmul.mubr.f32.vlgmr.msra.gmra.mrb[52].mxu0 %v13322_v32  ;;  %v13468_v32 = vsub.f32 %v7569_v23, %v13465_v14  ;;  %v7555_v23 = vld [vmem:[%s13656_s9 + $0x8] sm:$0xff] }
 0xc93   : > { %9076 = vmatprep.mubr.f32.mxu0 %v13328_v5 }
 0xc94   : > { %v7645_v5 = vand.u32 4294901760, %v13468_v32 }
 0xc96   : > { %9077 = vmatmul.mubr.f32.gmra.mrb[54].mxu0 %v13337_v61  ;;  %v7646_v42 = vsub.f32 %v13468_v32, %v7645_v5 }
 0xc97   : > { %9079 = vmatprep.mubr.f32.mxu0 %v13349_v22  ;;  %v4610_v22 = vpop.permute.xlu1 %4609 }
 0xc98   : > { %v7647_v61 = vand.u32 4294901760, %v7646_v42  ;;  %v9908_v44 = vadd.f32 %v4610_v22, %v2464_v6 }
 0xc9a   : > { %9080 = vmatmul.mubr.f32.gmra.mrb[36].mxu0 %v13358_v57  ;;  %9093 = vmatprep.mubr.f32.mxu1 %v7647_v61  ;;  %v4614_v57 = vpop.permute.xlu0 %4613  ;;  %v9909_v50 = vadd.f32 %v9908_v44, %v14219_v18 }
 0xc9b   : > { %9082 = vmatprep.mubr.f32.mxu0 %v13367_v41  ;;  %v2474_v55 = vpop.permute.xlu1 %2473  ;;  %v9903_v9 = vadd.f32 %v4614_v57, %v2469_v56  ;;  %v7572_v56 = vsel %vm1278_vm5, %v7555_v23, 0 }
 0xc9d   : > { %v9904_v13 = vadd.f32 %v9903_v9, %v14220_v40 }
 0xc9e   : > { %9083 = vmatmul.mubr.f32.gmra.mrb[38].mxu0 %v13378_v12  ;;  %v4618_v3 = vpop.permute.xlu0 %4617  ;;  %v14221_v12 = vld [vmem:[#allocation32_spill] sm:$0xff] }
 0xc9f   : > { %v2479_v60 = vpop.permute.xlu1 %2478  ;;  %v9918_v48 = vadd.f32 %v4618_v3, %v2474_v55  ;;  %v13488_v55 = vand.u32 4294901760, %v7572_v56 }
 0xca1   : > { %v9919_v7 = vadd.f32 %v9918_v48, %v14222_v15  ;;  %v7654_v57 = vsub.f32 %v7572_v56, %v13488_v55 }
 0xca2   : > { %v6750_v1 = vpop.permute.xlu0 %6749 }
 0xca3   : > { %v4622_v52 = vpop.permute.xlu1 %4621  ;;  %v9910_v53 = vadd.f32 %v9909_v50, %v6750_v1 }
 0xca4   : > { %v9913_v41 = vadd.f32 %v4622_v52, %v2479_v60 }
 0xca6   : > { %v9914_v43 = vadd.f32 %v9913_v41, %v14221_v12  ;;  %v6762_v62 = vpop.permute.xlu0 %6761 }
 0xca7   : > { %v6754_v16 = vpop.permute.xlu1 %6753 }
 0xca8   : > { %v9905_v30 = vadd.f32 %v9904_v13, %v6754_v16  ;;  %v9915_v33 = vadd.f32 %v9914_v43, %v6762_v62 }
 0xcab   : > { %v6758_v45 = vpop.permute.xlu1 %6757 }
 0xcac   : > { %v9920_v26 = vadd.f32 %v9919_v7, %v6758_v45 }
 0xd1d   : > { %v8975_v24 = vpop.f32.mrb[36].mxu1 }
 0xd1e   : > { %v6863_v63 = vpop.f32.mrb[37].mxu1 }
 0xd1f   : > { %v7655_v63 = vand.u32 4294901760, %v7654_v57 }
 0xd21   : > { %v8978_v11 = vpop.f32.mrb[38].mxu1  ;;  %v7656_v43 = vsub.f32 %v7654_v57, %v7655_v63 }
 0xd22   : > { %v6881_v29 = vpop.f32.mrb[39].mxu1 }
 0xd25   : > { %v8981_v47 = vpop.f32.mrb[40].mxu1  ;;  %v8995_v10 = vpop.f32.mrb[32].mxu0 }
 0xd26   : > { %v9906_v28 = vadd.f32 %v9905_v30, %v8981_v47  ;;  %v6899_v34 = vpop.f32.mrb[41].mxu1  ;;  %v7020_v27 = vpop.f32.mrb[33].mxu0 }
 0xd27   : > { %v9911_v51 = vadd.f32 %v9910_v53, %v6899_v34  ;;  %v7657_v27 = vand.u32 4294901760, %v7656_v43 }
 0xd29   : > { %v8984_v21 = vpop.f32.mrb[42].mxu1  ;;  %v8998_v4 = vpop.f32.mrb[34].mxu0 }
 0xd2a   : > { %v9916_v20 = vadd.f32 %v9915_v33, %v8984_v21  ;;  %v6919_v35 = vpop.f32.mrb[43].mxu1  ;;  %v7030_v19 = vpop.f32.mrb[35].mxu0 }
 0xd2b   : > { %v9921_v59 = vadd.f32 %v9920_v26, %v6919_v35 }
 0xd35   : > { %v9015_v58 = vpop.f32.mrb[40].mxu0 }
 0xd36   : > { %v7138_v49 = vpop.f32.mrb[41].mxu0 }
 0xd37   : > { %v14224_v49 = vld [vmem:[#allocation12_spill] sm:$0xff] }
 0xd39   : > { %v9018_v37 = vpop.f32.mrb[42].mxu0 }
 0xd3a   : > { %v7150_v0 = vpop.f32.mrb[43].mxu0 }
 0xd45   : > { %v9035_v2 = vpop.f32.mrb[44].mxu0 }
 0xd46   : > { %v7260_v39 = vpop.f32.mrb[45].mxu0 }
 0xd49   : > { %v9038_v54 = vpop.f32.mrb[46].mxu0 }
 0xd4a   : > { %v7274_v38 = vpop.f32.mrb[47].mxu0 }
 0xd55   : > { %v9055_v46 = vpop.f32.mrb[48].mxu0 }
 0xd56   : > { %v7395_v17 = vpop.f32.mrb[49].mxu0 }
 0xd59   : > { %v9058_v25 = vpop.f32.mrb[50].mxu0 }
 0xd5a   : > { %v7405_v31 = vpop.f32.mrb[51].mxu0 }
 0xd65   : > { %v9075_v42 = vpop.f32.mrb[52].mxu0 }
 0xd66   : > { %v7508_v61 = vpop.f32.mrb[53].mxu0 }
 0xd69   : > { %v9078_v22 = vpop.f32.mrb[54].mxu0 }
 0xd6a   : > { %v7518_v6 = vpop.f32.mrb[55].mxu0 }
 0xd6d   : > { %v9081_v60 = vpop.f32.mrb[36].mxu0 }
 0xd6e   : > { %v9907_v52 = vadd.f32 %v9906_v28, %v9081_v60  ;;  %v7528_v3 = vpop.f32.mrb[37].mxu0 }
 0xd6f   : > { %v9912_v44 = vadd.f32 %v9911_v51, %v7528_v3 }
 0xd70   : > { %v7578_v24 = vand.u32 4294901760, %v9907_v52 }
 0xd71   : > { %v7575_v9 = vand.u32 4294901760, %v9912_v44  ;;  %v9084_v16 = vpop.f32.mrb[38].mxu0 }
 0xd72   : > { %v7672_v1 = vsub.f32 %v9907_v52, %v7578_v24  ;;  %v9917_v41 = vadd.f32 %v9916_v20, %v9084_v16  ;;  %v7540_v18 = vpop.f32.mrb[39].mxu0 }
 0xd73   : > { %v9835_v50 = vpack.c.bf16 %v7578_v24, %v7575_v9  ;;  %v7665_v11 = vsub.f32 %v9912_v44, %v7575_v9  ;;  %v9922_v40 = vadd.f32 %v9921_v59, %v7540_v18 }
 0xd74   : > { %v7673_v13 = vand.u32 4294901760, %v7672_v1  ;;  %v7584_v29 = vand.u32 4294901760, %v9917_v41 }
 0xd75   : > { %v7666_v48 = vand.u32 4294901760, %v7665_v11  ;;  %v7581_v12 = vand.u32 4294901760, %v9922_v40  ;;  %9836 = vmatprep.subr.bf16.mxu1 %v9835_v50  ;;  %v9851_v62 = vpack.c.bf16 %v7672_v1, %v7665_v11 }
 0xd76   : > { %v7686_v30 = vsub.f32 %v9917_v41, %v7584_v29  ;;  %9838 = vmatpush3.bf16.msra.mxu1 %v9835_v50  ;;  %v7674_v45 = vsub.f32 %v7672_v1, %v7673_v13 }
 0xd77   : > { %v9839_v53 = vpack.c.bf16 %v7584_v29, %v7581_v12  ;;  %v7679_v47 = vsub.f32 %v9922_v40, %v7581_v12  ;;  %v7667_v10 = vsub.f32 %v7665_v11, %v7666_v48  ;;  %v9867_v36 = vpack.c.bf16 %v7673_v13, %v7666_v48 }
 0xd78   : > { %v7687_v8 = vand.u32 4294901760, %v7686_v30  ;;  %v7675_v28 = vand.u32 4294901760, %v7674_v45 }
 0xd79   : > { %v7680_v34 = vand.u32 4294901760, %v7679_v47  ;;  %9840 = vmatprep.subr.bf16.mxu1 %v9839_v53  ;;  %v7668_v15 = vand.u32 4294901760, %v7667_v10  ;;  %v9855_v7 = vpack.c.bf16 %v7686_v30, %v7679_v47 }
 0xd7a   : > { %9842 = vmatpush3.bf16.msra.mxu1 %v9839_v53  ;;  %v7688_v51 = vsub.f32 %v7686_v30, %v7687_v8 }
 0xd7b   : > { %v9843_v33 = vpack.c.bf16 %v7675_v28, %v7668_v15  ;;  %v7681_v26 = vsub.f32 %v7679_v47, %v7680_v34  ;;  %v9871_v21 = vpack.c.bf16 %v7687_v8, %v7680_v34 }
 0xd7c   : > { %v7689_v4 = vand.u32 4294901760, %v7688_v51 }
 0xd7d   : > { %9094 = vmatmul.mubr.f32.vlgmr.msra.gmra.mrb[44].mxu1 %v7657_v27  ;;  %9844 = vmatprep.subr.bf16.mxu1 %v9843_v33  ;;  %v7682_v20 = vand.u32 4294901760, %v7681_v26 }
 0xd7e   : > { %9846 = vmatpush3.bf16.msra.mxu1 %v9843_v33  ;;  %9104 = vmatprep.mubr.f32.mxu1 %v13465_v14 }
 0xd7f   : > { %v9847_v35 = vpack.c.bf16 %v7689_v4, %v7682_v20 }
 0xd81   : > { %9848 = vmatprep.subr.bf16.mxu1 %v9847_v35 }
 0xd82   : > { %9850 = vmatpush3.bf16.msra.mxu1 %v9847_v35 }
 0xd83   : > { %9852 = vmatprep.subr.bf16.mxu1 %v9851_v62 }
 0xd85   : > { %9105 = vmatmul.mubr.f32.vlgmr.msra.gmra.mrb[44].mxu1 %v13488_v55 }
 0xd86   : > { %9854 = vmatpush3.bf16.msra.mxu1 %v9851_v62  ;;  %9115 = vmatprep.mubr.f32.mxu1 %v13468_v32  ;;  %v7566_v32 = vpop.permute.xlu1 %7565 }
 0xd87   : > { %9856 = vmatprep.subr.bf16.mxu1 %v9855_v7 }
 0xd8a   : > { %9858 = vmatpush3.bf16.msra.mxu1 %v9855_v7 }
 0xd8b   : > { %9860 = vmatprep.subr.bf16.mxu1 %v9835_v50 }
 0xd8d   : > { %9116 = vmatmul.mubr.f32.vlgmr.msra.gmra.mrb[44].mxu1 %v7654_v57 }
 0xd8e   : > { %9862 = vmatpush3.bf16.msra.mxu1 %v9835_v50  ;;  %9126 = vmatprep.mubr.f32.mxu1 %v7645_v5  ;;  %v7561_v5 = vpop.permute.xlu0 %7560 }
 0xd8f   : > { %9864 = vmatprep.subr.bf16.mxu1 %v9839_v53 }
 0xd92   : > { %9866 = vmatpush3.bf16.msra.mxu1 %v9839_v53 }
 0xd93   : > { %9868 = vmatprep.subr.bf16.mxu1 %v9867_v36 }
 0xd95   : > { %9127 = vmatmul.mubr.f32.vlgmr.msra.gmra.mrb[44].mxu1 %v7655_v63 }
 0xd96   : > { %9870 = vmatpush3.bf16.msra.mxu1 %v9867_v36  ;;  %9137 = vmatprep.mubr.f32.mxu1 %v13465_v14 }
 0xd97   : > { %9872 = vmatprep.subr.bf16.mxu1 %v9871_v21 }
 0xd9a   : > { %9874 = vmatpush3.bf16.msra.mxu1 %v9871_v21 }
 0xd9b   : > { %9876 = vmatprep.subr.bf16.mxu1 %v9835_v50 }
 0xd9d   : > { %9138 = vmatmul.mubr.f32.vlgmr.msra.gmra.mrb[44].mxu1 %v13488_v55 }
 0xd9e   : > { %9878 = vmatpush3.bf16.msra.mxu1 %v9835_v50  ;;  %9148 = vmatprep.mubr.f32.mxu1 %v13465_v14 }
 0xd9f   : > { %9880 = vmatprep.subr.bf16.mxu1 %v9839_v53 }
 0xda2   : > { %9882 = vmatpush3.bf16.msra.mxu1 %v9839_v53 }
 0xda5   : > { %9149 = vmatmul.mubr.f32.vlgmr.msra.gmra.mrb[44].mxu1 %v13488_v55 }
 0xe78   : > { %v9150_v19 = vpop.f32.mrb[44].mxu1 }
 0xe79   : > { %v9943_v59 = vadd.f32 %v9150_v19, %v7566_v32  ;;  %v8092_v58 = vpop.f32.mrb[45].mxu1 }
 0xe7a   : > { %v9944_v14 = vadd.f32 %v8092_v58, %v7561_v5 }
 0xe7b   : > { %v8103_v37 = vmul.f32 %v9943_v59, %v14224_v49 }
 0xe7c   : > { %v13516_v0 = vmul.f32 %v9944_v14, %v14224_v49 }
 0xe7d   : > { %v8105_v2 = vmul.f32 1.442695, %v8103_v37  ;;  %8113 = vst.msk [vmem:[%s476_s1] sm:$0xff] %vm8110_vm9, %v8103_v37  ;;  %s10513_s1 = scalar_lea.vmem %s10512_s8, 256 }
 0xe7e   : > { %8112 = vst.msk [vmem:[%s469_s18] sm:$0xff] %vm8110_vm9, %v13516_v0  ;;  %p10515_p7 = scmp.lt.s32.totalorder %s10513_s1, %s10507_s26 }
 0xe7f   : > { %10481 = vpow2.f32 %v8105_v2 }
 0xe80   : > { %p10516_p8 = por %p10515_p7, %p10514_p6 }
 0xe82   : > { %p10517_p10 = pnand %p10516_p8, %p10510_p5 }
 0xe84   : > { %10520 = shalt.err (!%p10517_p10)
}
 0xe85   : > { %s10521_s5 = scalar_lea.hbm %s13522_s15, 128  ;;  %s10525_s7 = scalar_lea.hbm %s13659_s12, 256 }
 0xe86   : > { %p10522_p11 = scmp.ne.s32.totalorder %s13522_s15, %s10521_s5  ;;  %p10526_p1 = scmp.lt.u32.totalorder %s13522_s15, %s13659_s12 }
 0xe87   : > { %p10527_p2 = scmp.lt.u32.totalorder %s10525_s7, %s10521_s5  ;;  %p10529_p4 = scmp.lt.u32.totalorder %s10521_s5, %s13522_s15 }
 0xe88   : > { %p10523_p12 = pnand %p10522_p11, %p10784_p9 }
 0xe89   : > { %p10528_p3 = por %p10527_p2, %p10526_p1 }
 0xe8a   : > { %p10524_p0 = pneg %p10523_p12 }
 0xe8b   : > { %p10530_p5 = por %p10529_p4, %p10528_p3 }
 0xe8d   : > { %p10531_p6 = pnand %p10530_p5, %p10524_p0 }
 0xe8f   : > { %10534 = shalt.err (!%p10531_p6)
}
 0xe90   : > { %s14225_s26 = scalar_lea.sflag [#allocation7], %s13507_s27  ;;  %s10535_s1 = scalar_lea.vmem %s13533_s4, 128 }
 0xe91   : > { %10312 = dma.vmem_to_hbm [thread:$0]  (%p10784_p9), %s13524_s21, 128, %s13522_s15, %s14225_s26  }
 0xe92   : > { %p10536_p7 = scmp.ne.s32.totalorder %s13533_s4, %s10535_s1  ;;  %s10667_s19 = smov [#allocation8]  }
 0xe93   : > { %s10539_s5 = sshll.u32 %s10667_s19, 4  ;;  %s10540_s5 = int_to_ptr.vmem [resolvable:$false] %s10539_s5 }
 0xe94   : > { %p10537_p8 = pnand %p10536_p7, %p10784_p9  ;;  %s10541_s3 = scalar_lea.vmem %s10540_s5, 256 }
 0xe95   : > { %p10542_p11 = scmp.lt.s32.totalorder %s13533_s4, %s10540_s5  ;;  %p10543_p12 = scmp.lt.s32.totalorder %s10541_s3, %s10535_s1 }
 0xe96   : > { %p10538_p10 = pneg %p10537_p8 }
 0xe97   : > { %p10544_p0 = por %p10543_p12, %p10542_p11 }
 0xe99   : > { %p10545_p1 = pnand %p10544_p0, %p10538_p10 }
 0xe9b   : > { %10548 = shalt.err (!%p10545_p1)
}
 0xe9c   : > { %s10549_s21 = scalar_lea.hbm %s13531_s6, 128  ;;  %s10553_s7 = scalar_lea.hbm %s13660_s13, 256 }
 0xe9d   : > { %p10550_p2 = scmp.ne.s32.totalorder %s13531_s6, %s10549_s21  ;;  %p10554_p5 = scmp.lt.u32.totalorder %s13531_s6, %s13660_s13 }
 0xe9e   : > { %p10555_p6 = scmp.lt.u32.totalorder %s10553_s7, %s10549_s21  ;;  %p10557_p8 = scmp.lt.u32.totalorder %s10549_s21, %s13531_s6 }
 0xe9f   : > { %p10551_p3 = pnand %p10550_p2, %p10784_p9 }
 0xea0   : > { %p10556_p7 = por %p10555_p6, %p10554_p5 }
 0xea1   : > { %p10552_p4 = pneg %p10551_p3 }
 0xea2   : > { %p10558_p10 = por %p10557_p8, %p10556_p7 }
 0xea4   : > { %p10559_p11 = pnand %p10558_p10, %p10552_p4 }
 0xea6   : > { %10562 = shalt.err (!%p10559_p11)
}
 0xea7   : > { %s14226_s1 = scalar_lea.sflag [#allocation7], %s13507_s27  ;;  %s8325_s19 = sshll.u32 %s10821_s28, 3  ;;  %v10482_v54 = vpop.eup %10481 }
 0xea8   : > { %10313 = dma.vmem_to_hbm [thread:$0]  (%p10784_p9), %s13533_s4, 128, %s13531_s6, %s14226_s1  }
 0xea9   : > { %s490_s21 = scalar_lea.vmem %s13649_s2, %s8325_s19  ;;  %s462_s15 = scalar_lea.vmem [#allocation4], %s13503_s29 }
 0xeaa   : > { %v8104_v39 = vld [vmem:[%s490_s21] sm:$0xff]  ;;  %s8139_s18 = sshll.u32 %s462_s15, 4  ;;  %s13595_s8 = scalar_lea.hbm %s13658_s11, %s13510_s23  ;;  %s13597_s18 = int_to_ptr.vmem [resolvable:$true] %s8139_s18 }
 0xeab   : > { %v8107_v38 = vmul.f32 %v10482_v54, %v8104_v39  ;;  %s14227_s6 = sand.u32 1, %s10631_s0   ;;  %s10563_s29 = scalar_lea.vmem %s13597_s18, 128 }
 0xeac   : > { %s8115_s28 = scalar_lea.sflag [#allocation5], %s14227_s6  ;;  %p10564_p12 = scmp.ne.s32.totalorder %s13597_s18, %s10563_s29 }
 0xead   : > { %v8108_v46 = vadd.f32 %v8107_v38, %v13516_v0  ;;  %s10668_s4 = smov [#allocation4]  }
 0xeae   : > { %p10565_p0 = pnand %p10564_p12, %p10784_p9  ;;  %s10567_s26 = sshll.u32 %s10668_s4, 4  ;;  %s10568_s26 = int_to_ptr.vmem [resolvable:$false] %s10567_s26 }
 0xeaf   : > { %v8109_v17 = vmul.f32 %v14224_v49, %v8108_v46  ;;  %s10569_s1 = scalar_lea.vmem %s10568_s26, 256  ;;  %p10570_p2 = scmp.lt.s32.totalorder %s13597_s18, %s10568_s26 }
 0xeb0   : > { %p10566_p1 = pneg %p10565_p0  ;;  %p10571_p3 = scmp.lt.s32.totalorder %s10569_s1, %s10563_s29 }
 0xeb1   : > { %8111 = vst.msk [vmem:[%s462_s15] sm:$0xff] %vm8110_vm9, %v8109_v17 }
 0xeb2   : > { %p10572_p4 = por %p10571_p3, %p10570_p2 }
 0xeb4   : > { %p10573_p5 = pnand %p10572_p4, %p10566_p1 }
 0xeb6   : > { %10576 = shalt.err (!%p10573_p5)
}
 0xeb7   : > { %s10577_s23 = scalar_lea.hbm %s13595_s8, 128  ;;  %s10581_s3 = scalar_lea.hbm %s13658_s11, 256 }
 0xeb8   : > { %p10578_p6 = scmp.ne.s32.totalorder %s13595_s8, %s10577_s23  ;;  %p10582_p10 = scmp.lt.u32.totalorder %s13595_s8, %s13658_s11 }
 0xeb9   : > { %p10583_p11 = scmp.lt.u32.totalorder %s10581_s3, %s10577_s23  ;;  %p10585_p0 = scmp.lt.u32.totalorder %s10577_s23, %s13595_s8 }
 0xeba   : > { %p10579_p7 = pnand %p10578_p6, %p10784_p9 }
 0xebb   : > { %p10584_p12 = por %p10583_p11, %p10582_p10 }
 0xebc   : > { %p10580_p8 = pneg %p10579_p7 }
 0xebd   : > { %p10586_p1 = por %p10585_p0, %p10584_p12 }
 0xebf   : > { %p10587_p2 = pnand %p10586_p1, %p10580_p8 }
 0xec1   : > { %10590 = shalt.err (!%p10587_p2)
}
 0xec2   : > { %10311 = dma.vmem_to_hbm [thread:$0]  (%p10784_p9), %s13597_s18, 128, %s13595_s8, %s8115_s28  }
 0xec3 PF: > { %p10327_p3 = scmp.ge.s32.totalorder %s10647_s17, 2  ;;  %s8179_s27 = sand.u32 1, %s10627_s30  }
 0xec4   : > { %s8180_s7 = scalar_lea.sflag [#allocation5], %s8179_s27 }
 0xec5   : > { %p10318_p4 = pnand %p10327_p3, %p10793_p13 }
 0xec7   : > { %10618 = dma.done.wait (!%p10318_p4), %s8180_s7, 128  }
 0xec8   : > { %10620 = vsyncadd (!%p10318_p4), %s8180_s7, 4294967168  ;;  %s14228_s6 = sadd.s32 4294967294, %s10647_s17  }
 0xec9   : > { %s8188_s29 = sand.u32 1, %s14228_s6  }
 0xeca   : > { %s8189_s4 = scalar_lea.sflag [#allocation7], %s8188_s29 }
 0xecb   : > { %10622 = dma.done.wait (!%p10318_p4), %s8189_s4, 256  }
 0xecc   : > { %10624 = vsyncadd (!%p10318_p4), %s8189_s4, 4294967040  ;;  %s36_s17 = sadd.s32 1, %s10647_s17   ;;  %s14229_s30 = smov %s10631_s0 }
 0xecd   : > { %p33_p9 = scmp.ge.s32.totalorder %s36_s17, 4   ;;  %s14230_s0 = smov %s10635_s14 }
 0xece   : > { %s14231_s14 = smov %s10799_s25  ;;  %s14232_s15 = smov %s10643_s16 }
 0xecf   : > { %s14233_s16 = smov %s14235_s20  ;;  %35 = sbr.rel (!%p33_p9) target bundleno = 23 (0x17), region = 134 }
 0xed6   :  { %8203 = vsyncpa [#allocation5], 1 }
 0xed7   :  { %8205 = vsyncpa [#allocation5 + $0x1], 1 }
 0xed8   :  { %8206 = vsyncpa [#allocation7], 1 }
 0xed9   :  { %8208 = vsyncpa [#allocation7 + $0x1], 1 }

</bundles_post_ra>
